<compile_context>
chip_gen: v7x
topology: tpu7x:2x2x1
jax: 0.10.0
libtpu: 0.0.40
codegen_flags: <defaults>
</compile_context>

<pallas_src>
import functools

import jax
import jax.numpy as jnp
from jax.experimental import pallas as pl
from jax.experimental.pallas import tpu as pltpu


# -----------------------------------------------------------------------------
# helpers
# -----------------------------------------------------------------------------
def _round_up(x, m):
    return -(-x // m) * m


def _leaky(x, negative_slope):
    if negative_slope is None:
        return x
    return jnp.where(x >= 0.0, x, negative_slope * x)


def _pick_m_tile(M, tm_max):
    """(tile, num_blocks). Full-dim single block when small, else ragged grid."""
    if M <= tm_max:
        return M, 1                    # block dim == array dim (always allowed)
    return tm_max, pl.cdiv(M, tm_max)  # ragged last block: stores are masked


def _pick_lane_tile(N, tn_max):
    """(tile, padded_N). Full dim if <=128; else multiple-of-128 tiles,
    preferring >=2 output blocks so both v7x TensorCores get work."""
    if N <= 128:
        return N, N
    Np = _round_up(N, 128)
    tn = min(tn_max, Np)
    tn -= tn % 128
    while Np % tn:
        tn -= 128
    if Np // tn == 1 and tn % 256 == 0:
        tn //= 2                       # split so the parallel grid has 2 blocks
    return tn, Np


def _pick_k_tile(K, tk_max):
    """(tile, padded_K, single_block). Ragged K blocks are never allowed."""
    if K <= tk_max:
        return K, K, True              # whole K in one block
    Kp = _round_up(K, 128)
    tk = min(tk_max, Kp)
    tk -= tk % 128
    while Kp % tk:
        tk -= 128
    return tk, Kp, False


# -----------------------------------------------------------------------------
# Pallas kernels
# -----------------------------------------------------------------------------
def _mm_single_kernel(a_ref, b_ref, o_ref, *, negative_slope):
    """Whole-K matmul block + fused LeakyReLU (2-D grid, no accumulator)."""
    acc = jnp.dot(a_ref[...], b_ref[...], preferred_element_type=jnp.float32)
    o_ref[...] = _leaky(acc, negative_slope).astype(o_ref.dtype)


def _mm_acc_kernel(a_ref, b_ref, o_ref, acc_ref, *, negative_slope):
    """K-tiled matmul with f32 VMEM accumulator (3-D grid, K innermost)."""
    @pl.when(pl.program_id(2) == 0)
    def _init():
        acc_ref[...] = jnp.zeros_like(acc_ref)

    acc_ref[...] += jnp.dot(a_ref[...], b_ref[...],
                            preferred_element_type=jnp.float32)

    @pl.when(pl.program_id(2) == pl.num_programs(2) - 1)
    def _finalize():
        o_ref[...] = _leaky(acc_ref[...], negative_slope).astype(o_ref.dtype)


def _matvec_kernel(a_ref, w_ref, o_ref, *, negative_slope):
    """[tm,K] x [1,K] -> [tm,1] on the VPU/XLU (no MXU, no 128-lane padding)."""
    a = a_ref[...].astype(jnp.float32)
    w = w_ref[...].astype(jnp.float32)          # (1, K) broadcasts over rows
    acc = jnp.sum(a * w, axis=-1, keepdims=True)
    o_ref[...] = _leaky(acc, negative_slope).astype(o_ref.dtype)


# -----------------------------------------------------------------------------
# Pallas wrappers
# -----------------------------------------------------------------------------
def pallas_matmul(a, b, negative_slope=None, out_dtype=jnp.float32,
                  tm_max=256, tn_max=256, tk_max=2048):
    """a:[M,K] @ b:[K,N] -> [M,N]; bf16 operands, f32 accumulation, fused
    LeakyReLU epilogue.  Single-block-K fast path when K <= tk_max."""
    M, K = a.shape
    K2, N = b.shape
    assert K == K2
    a = a.astype(jnp.bfloat16)
    b = b.astype(jnp.bfloat16)

    tm, gm = _pick_m_tile(M, tm_max)
    tn, Ne = _pick_lane_tile(N, tn_max)
    tk, Kp, single_k = _pick_k_tile(K, tk_max)
    gn = Ne // tn

    # K must be explicitly zero-padded if ragged (garbage K would corrupt valid
    # outputs).  Neither pad triggers for this network's shapes.
    if Kp != K or Ne != N:
        a = jnp.pad(a, ((0, 0), (0, Kp - K)))
        b = jnp.pad(b, ((0, Kp - K), (0, Ne - N)))

    out_bytes = jnp.dtype(out_dtype).itemsize
    cost = pl.CostEstimate(
        flops=2 * M * Ne * Kp,
        transcendentals=0,
        # A is re-streamed once per N block, B once per M block.
        bytes_accessed=M * Kp * 2 * gn + Kp * Ne * 2 * gm + M * Ne * out_bytes,
    )

    if single_k:
        grid = (gm, gn)
        kernel = functools.partial(_mm_single_kernel,
                                   negative_slope=negative_slope)
        in_specs = [pl.BlockSpec((tm, Kp), lambda i, j: (i, 0)),
                    pl.BlockSpec((Kp, tn), lambda i, j: (0, j))]
        out_specs = pl.BlockSpec((tm, tn), lambda i, j: (i, j))
        scratch_shapes = []
        dims = ("parallel", "parallel")
        acc_bytes = 0
    else:
        grid = (gm, gn, Kp // tk)
        kernel = functools.partial(_mm_acc_kernel,
                                   negative_slope=negative_slope)
        in_specs = [pl.BlockSpec((tm, tk), lambda i, j, k: (i, k)),
                    pl.BlockSpec((tk, tn), lambda i, j, k: (k, j))]
        out_specs = pl.BlockSpec((tm, tn), lambda i, j, k: (i, j))
        scratch_shapes = [pltpu.VMEM((tm, tn), jnp.float32)]
        dims = ("parallel", "parallel", "arbitrary")
        acc_bytes = tm * tn * 4

    # Double-buffered bf16 inputs + double-buffered output + accumulator,
    # x1.5 headroom, capped at 48 MiB (safe even on v7x's 64 MiB VMEM).
    need = 2 * (tm * tk + tk * tn) * 2 + 2 * tm * tn * out_bytes + acc_bytes
    vmem_limit = int(min(max(int(need * 1.5), 16 * 1024 * 1024),
                         48 * 1024 * 1024))

    out = pl.pallas_call(
        kernel,
        out_shape=jax.ShapeDtypeStruct((M, Ne), out_dtype),
        grid_spec=pltpu.PrefetchScalarGridSpec(
            num_scalar_prefetch=0,
            grid=grid,
            in_specs=in_specs,
            out_specs=out_specs,
            scratch_shapes=scratch_shapes,
        ),
        compiler_params=pltpu.CompilerParams(
            dimension_semantics=dims,
            vmem_limit_bytes=vmem_limit,
        ),
        cost_estimate=cost,
    )(a, b)

    if Ne != N:
        out = out[:, :N]
    return out


def pallas_matvec(a, w_row, negative_slope=None, out_dtype=jnp.float32,
                  tm_max=128):
    """a:[M,K] @ w_row:[K] -> [M,1] via VPU multiply + lane reduction."""
    M, K = a.shape
    a = a.astype(jnp.bfloat16)
    w = w_row.astype(jnp.bfloat16).reshape(1, K)

    tm, gm = _pick_m_tile(M, tm_max)

    cost = pl.CostEstimate(
        flops=2 * M * K,
        transcendentals=0,
        bytes_accessed=M * K * 2 + K * 2 * gm
        + M * jnp.dtype(out_dtype).itemsize,
    )
    # Double-buffered bf16 A block + weight row + f32 temporaries headroom.
    need = 2 * tm * K * 2 + 2 * K * 2 + 3 * tm * K * 4
    vmem_limit = int(min(max(int(need * 1.5), 16 * 1024 * 1024),
                         48 * 1024 * 1024))

    return pl.pallas_call(
        functools.partial(_matvec_kernel, negative_slope=negative_slope),
        out_shape=jax.ShapeDtypeStruct((M, 1), out_dtype),
        grid_spec=pltpu.PrefetchScalarGridSpec(
            num_scalar_prefetch=0,
            grid=(gm,),
            in_specs=[pl.BlockSpec((tm, K), lambda i: (i, 0)),
                      pl.BlockSpec((1, K), lambda i: (0, 0))],
            out_specs=pl.BlockSpec((tm, 1), lambda i: (i, 0)),
        ),
        compiler_params=pltpu.CompilerParams(
            dimension_semantics=("parallel",),
            vmem_limit_bytes=vmem_limit,
        ),
        cost_estimate=cost,
    )(a, w)


# -----------------------------------------------------------------------------
# NHWC im2col glue (plain JAX) — matches PyTorch Conv2d(k=4, s=2, p=2, bias=False)
# -----------------------------------------------------------------------------
def im2col_nhwc(x, k=4, s=2, p=2):
    """x: [N,H,W,C] -> patches [N*OH*OW, k*k*C] (feature order kh, kw, C)."""
    N, H, W, C = x.shape
    xp = jnp.pad(x, ((0, 0), (p, p), (p, p), (0, 0)))
    OH = (H + 2 * p - k) // s + 1
    OW = (W + 2 * p - k) // s + 1
    cols = []
    for i in range(k):          # kernel row (kh)
        for j in range(k):      # kernel col (kw)
            cols.append(xp[:, i:i + s * OH:s, j:j + s * OW:s, :])  # [N,OH,OW,C]
    patches = jnp.stack(cols, axis=3)                    # [N,OH,OW,k*k,C]
    patches = patches.reshape(N * OH * OW, k * k * C)    # lane-dense, C fastest
    return patches, OH, OW


def conv_layer_nhwc(x, w, negative_slope, out_dtype):
    """x: [N,H,W,Cin] (bf16), w: [Cout,Cin,4,4] (PyTorch layout) -> NHWC out."""
    N = x.shape[0]
    Cout = w.shape[0]
    patches, OH, OW = im2col_nhwc(x, k=4, s=2, p=2)
    # Weight rows ordered (kh, kw, Cin) to match the patch feature order.
    wm = jnp.transpose(w, (2, 3, 1, 0)).reshape(-1, Cout).astype(jnp.bfloat16)
    if Cout == 1:
        y = pallas_matvec(patches, wm[:, 0], negative_slope=negative_slope,
                          out_dtype=out_dtype)
    else:
        y = pallas_matmul(patches, wm, negative_slope=negative_slope,
                          out_dtype=out_dtype)
    return y.reshape(N, OH, OW, Cout)


def boundary_ent_discriminator(x_nchw, weights):
    """x_nchw: [N,3,H,W] f32 -> [N,1,H',W'] f32 (matches the PyTorch module)."""
    # NCHW -> NHWC once; cast to bf16 once, BEFORE im2col, so patch matrices
    # are materialized in bf16 (half the HBM traffic of f32).
    x = jnp.transpose(x_nchw, (0, 2, 3, 1)).astype(jnp.bfloat16)
    n_layers = len(weights)
    for idx, w in enumerate(weights):
        last = idx == n_layers - 1
        slope = None if last else 0.2              # conv5 has no activation
        out_dtype = jnp.float32 if last else jnp.bfloat16
        x = conv_layer_nhwc(x, w, slope, out_dtype)
    return jnp.transpose(x, (0, 3, 1, 2))          # back to NCHW, once


# -----------------------------------------------------------------------------
# Deterministic parameter init (normal(0, 0.02), bias=False) and demo run
# -----------------------------------------------------------------------------
def init_weights(key):
    filter_num_list = [64, 128, 256, 512, 1]
    in_ch = [3, 64, 128, 256, 512]
    weights = []
    for cin, cout in zip(in_ch, filter_num_list):
        key, sub = jax.random.split(key)
        w = 0.02 * jax.random.normal(sub, (cout, cin, 4, 4), dtype=jnp.float32)
        weights.append(w)
    return weights


if __name__ == "__main__":
    key = jax.random.PRNGKey(0)
    key, xkey = jax.random.split(key)
    # Input: NCHW, 3 channels, small spatial size (matches the module spec).
    x = jax.random.normal(xkey, (2, 3, 16, 16), dtype=jnp.float32)
    weights = init_weights(key)

    fwd = jax.jit(boundary_ent_discriminator)
    out = fwd(x, weights)
    out = jax.block_until_ready(out)
    assert out.shape == (2, 1, 2, 2), out.shape
    assert bool(jnp.all(jnp.isfinite(out)))
    print("KERNEL_OK")
</pallas_src>

<mosaic_0001>
module attributes {stable_mosaic.version = 11 : i64} {
  func.func @_mm_single_kernel(%arg0: i32, %arg1: i32, %arg2: memref<162x48xbf16, #tpu.memory_space<vmem>>, %arg3: memref<48x64xbf16, #tpu.memory_space<vmem>>, %arg4: memref<162x64xbf16, #tpu.memory_space<vmem>>) attributes {dimension_semantics = [#tpu.dimension_semantics<parallel>, #tpu.dimension_semantics<parallel>], iteration_bounds = array<i64: 1, 1>, scalar_prefetch = 0 : i64, scratch_operands = 0 : i64, tpu.core_type = #tpu.core_type<tc>, window_params = [{transform_indices = @transform_0, window_bounds = array<i64: 162, 48>}, {transform_indices = @transform_1, window_bounds = array<i64: 48, 64>}, {transform_indices = @transform_2, window_bounds = array<i64: 162, 64>}]} {
    %c0 = arith.constant 0 : index
    %c0_0 = arith.constant 0 : index
    %0 = vector.load %arg2[%c0, %c0_0] : memref<162x48xbf16, #tpu.memory_space<vmem>>, vector<162x48xbf16>
    %c0_1 = arith.constant 0 : index
    %c0_2 = arith.constant 0 : index
    %1 = vector.load %arg3[%c0_1, %c0_2] : memref<48x64xbf16, #tpu.memory_space<vmem>>, vector<48x64xbf16>
    %cst = arith.constant dense<0.000000e+00> : vector<162x64xf32>
    %2 = tpu.matmul %0, %1, %cst {dimension_numbers = #tpu.dot_dimension_numbers<[1], [0], [0], [1], [0, 0, 1, 1], [], []>} : vector<162x48xbf16>, vector<48x64xbf16>, vector<162x64xf32> -> vector<162x64xf32>
    %cst_3 = arith.constant 0.000000e+00 : f32
    %3 = vector.broadcast %cst_3 : f32 to vector<162x64xf32>
    %4 = arith.cmpf oge, %2, %3 : vector<162x64xf32>
    %cst_4 = arith.constant 2.000000e-01 : f32
    %5 = vector.broadcast %cst_4 : f32 to vector<162x64xf32>
    %6 = arith.mulf %5, %2 : vector<162x64xf32>
    %7 = arith.select %4, %2, %6 : vector<162x64xi1>, vector<162x64xf32>
    %8 = arith.truncf %7 : vector<162x64xf32> to vector<162x64xbf16>
    %c0_5 = arith.constant 0 : index
    %c0_6 = arith.constant 0 : index
    %9 = vector.load %arg4[%c0_5, %c0_6] : memref<162x64xbf16, #tpu.memory_space<vmem>>, vector<162x64xbf16>
    tpu.vector_store %arg4[%c0_5, %c0_6], %8 {strides = array<i32>} : memref<162x64xbf16, #tpu.memory_space<vmem>>, vector<162x64xbf16>,
    return
  }
  func.func @transform_0(%arg0: i32, %arg1: i32) -> (i32, i32) {
    %c0_i32 = arith.constant 0 : i32
    %c0_i32_0 = arith.constant 0 : i32
    return %arg0, %c0_i32 : i32, i32
  }
  func.func @transform_1(%arg0: i32, %arg1: i32) -> (i32, i32) {
    %c0_i32 = arith.constant 0 : i32
    %c0_i32_0 = arith.constant 0 : i32
    return %c0_i32, %arg1 : i32, i32
  }
  func.func @transform_2(%arg0: i32, %arg1: i32) -> (i32, i32) {
    %c0_i32 = arith.constant 0 : i32
    return %arg0, %arg1 : i32, i32
  }
}

module attributes {stable_mosaic.version = 11 : i64} {
  func.func @_mm_single_kernel(%arg0: i32, %arg1: i32, %arg2: memref<50x1024xbf16, #tpu.memory_space<vmem>>, %arg3: memref<1024x128xbf16, #tpu.memory_space<vmem>>, %arg4: memref<50x128xbf16, #tpu.memory_space<vmem>>) attributes {dimension_semantics = [#tpu.dimension_semantics<parallel>, #tpu.dimension_semantics<parallel>], iteration_bounds = array<i64: 1, 1>, scalar_prefetch = 0 : i64, scratch_operands = 0 : i64, tpu.core_type = #tpu.core_type<tc>, window_params = [{transform_indices = @transform_0, window_bounds = array<i64: 50, 1024>}, {transform_indices = @transform_1, window_bounds = array<i64: 1024, 128>}, {transform_indices = @transform_2, window_bounds = array<i64: 50, 128>}]} {
    %c0 = arith.constant 0 : index
    %c0_0 = arith.constant 0 : index
    %0 = vector.load %arg2[%c0, %c0_0] : memref<50x1024xbf16, #tpu.memory_space<vmem>>, vector<50x1024xbf16>
    %c0_1 = arith.constant 0 : index
    %c0_2 = arith.constant 0 : index
    %1 = vector.load %arg3[%c0_1, %c0_2] : memref<1024x128xbf16, #tpu.memory_space<vmem>>, vector<1024x128xbf16>
    %cst = arith.constant dense<0.000000e+00> : vector<50x128xf32>
    %2 = tpu.matmul %0, %1, %cst {dimension_numbers = #tpu.dot_dimension_numbers<[1], [0], [0], [1], [0, 0, 1, 1], [], []>} : vector<50x1024xbf16>, vector<1024x128xbf16>, vector<50x128xf32> -> vector<50x128xf32>
    %cst_3 = arith.constant 0.000000e+00 : f32
    %3 = vector.broadcast %cst_3 : f32 to vector<50x128xf32>
    %4 = arith.cmpf oge, %2, %3 : vector<50x128xf32>
    %cst_4 = arith.constant 2.000000e-01 : f32
    %5 = vector.broadcast %cst_4 : f32 to vector<50x128xf32>
    %6 = arith.mulf %5, %2 : vector<50x128xf32>
    %7 = arith.select %4, %2, %6 : vector<50x128xi1>, vector<50x128xf32>
    %8 = arith.truncf %7 : vector<50x128xf32> to vector<50x128xbf16>
    %c0_5 = arith.constant 0 : index
    %c0_6 = arith.constant 0 : index
    %9 = vector.load %arg4[%c0_5, %c0_6] : memref<50x128xbf16, #tpu.memory_space<vmem>>, vector<50x128xbf16>
    tpu.vector_store %arg4[%c0_5, %c0_6], %8 {strides = array<i32>} : memref<50x128xbf16, #tpu.memory_space<vmem>>, vector<50x128xbf16>,
    return
  }
  func.func @transform_0(%arg0: i32, %arg1: i32) -> (i32, i32) {
    %c0_i32 = arith.constant 0 : i32
    %c0_i32_0 = arith.constant 0 : i32
    return %arg0, %c0_i32 : i32, i32
  }
  func.func @transform_1(%arg0: i32, %arg1: i32) -> (i32, i32) {
    %c0_i32 = arith.constant 0 : i32
    %c0_i32_0 = arith.constant 0 : i32
    return %c0_i32, %arg1 : i32, i32
  }
  func.func @transform_2(%arg0: i32, %arg1: i32) -> (i32, i32) {
    %c0_i32 = arith.constant 0 : i32
    return %arg0, %arg1 : i32, i32
  }
}

module attributes {stable_mosaic.version = 11 : i64} {
  func.func @_mm_single_kernel(%arg0: i32, %arg1: i32, %arg2: memref<18x2048xbf16, #tpu.memory_space<vmem>>, %arg3: memref<2048x128xbf16, #tpu.memory_space<vmem>>, %arg4: memref<18x128xbf16, #tpu.memory_space<vmem>>) attributes {dimension_semantics = [#tpu.dimension_semantics<parallel>, #tpu.dimension_semantics<parallel>], iteration_bounds = array<i64: 1, 2>, scalar_prefetch = 0 : i64, scratch_operands = 0 : i64, tpu.core_type = #tpu.core_type<tc>, window_params = [{transform_indices = @transform_0, window_bounds = array<i64: 18, 2048>}, {transform_indices = @transform_1, window_bounds = array<i64: 2048, 128>}, {transform_indices = @transform_2, window_bounds = array<i64: 18, 128>}]} {
    %c0 = arith.constant 0 : index
    %c0_0 = arith.constant 0 : index
    %0 = vector.load %arg2[%c0, %c0_0] : memref<18x2048xbf16, #tpu.memory_space<vmem>>, vector<18x2048xbf16>
    %c0_1 = arith.constant 0 : index
    %c0_2 = arith.constant 0 : index
    %1 = vector.load %arg3[%c0_1, %c0_2] : memref<2048x128xbf16, #tpu.memory_space<vmem>>, vector<2048x128xbf16>
    %cst = arith.constant dense<0.000000e+00> : vector<18x128xf32>
    %2 = tpu.matmul %0, %1, %cst {dimension_numbers = #tpu.dot_dimension_numbers<[1], [0], [0], [1], [0, 0, 1, 1], [], []>} : vector<18x2048xbf16>, vector<2048x128xbf16>, vector<18x128xf32> -> vector<18x128xf32>
    %cst_3 = arith.constant 0.000000e+00 : f32
    %3 = vector.broadcast %cst_3 : f32 to vector<18x128xf32>
    %4 = arith.cmpf oge, %2, %3 : vector<18x128xf32>
    %cst_4 = arith.constant 2.000000e-01 : f32
    %5 = vector.broadcast %cst_4 : f32 to vector<18x128xf32>
    %6 = arith.mulf %5, %2 : vector<18x128xf32>
    %7 = arith.select %4, %2, %6 : vector<18x128xi1>, vector<18x128xf32>
    %8 = arith.truncf %7 : vector<18x128xf32> to vector<18x128xbf16>
    %c0_5 = arith.constant 0 : index
    %c0_6 = arith.constant 0 : index
    %9 = vector.load %arg4[%c0_5, %c0_6] : memref<18x128xbf16, #tpu.memory_space<vmem>>, vector<18x128xbf16>
    tpu.vector_store %arg4[%c0_5, %c0_6], %8 {strides = array<i32>} : memref<18x128xbf16, #tpu.memory_space<vmem>>, vector<18x128xbf16>,
    return
  }
  func.func @transform_0(%arg0: i32, %arg1: i32) -> (i32, i32) {
    %c0_i32 = arith.constant 0 : i32
    %c0_i32_0 = arith.constant 0 : i32
    return %arg0, %c0_i32 : i32, i32
  }
  func.func @transform_1(%arg0: i32, %arg1: i32) -> (i32, i32) {
    %c0_i32 = arith.constant 0 : i32
    %c0_i32_0 = arith.constant 0 : i32
    return %c0_i32, %arg1 : i32, i32
  }
  func.func @transform_2(%arg0: i32, %arg1: i32) -> (i32, i32) {
    %c0_i32 = arith.constant 0 : i32
    return %arg0, %arg1 : i32, i32
  }
}

module attributes {stable_mosaic.version = 11 : i64} {
  func.func @_mm_acc_kernel(%arg0: i32, %arg1: i32, %arg2: i32, %arg3: memref<8x2048xbf16, #tpu.memory_space<vmem>>, %arg4: memref<2048x256xbf16, #tpu.memory_space<vmem>>, %arg5: memref<8x256xbf16, #tpu.memory_space<vmem>>, %arg6: memref<8x256xf32, #tpu.memory_space<vmem>>) attributes {dimension_semantics = [#tpu.dimension_semantics<parallel>, #tpu.dimension_semantics<parallel>, #tpu.dimension_semantics<arbitrary>], iteration_bounds = array<i64: 1, 2, 2>, scalar_prefetch = 0 : i64, scratch_operands = 1 : i64, tpu.core_type = #tpu.core_type<tc>, window_params = [{transform_indices = @transform_0, window_bounds = array<i64: 8, 2048>}, {transform_indices = @transform_1, window_bounds = array<i64: 2048, 256>}, {transform_indices = @transform_2, window_bounds = array<i64: 8, 256>}]} {
    %c0_i32 = arith.constant 0 : i32
    %0 = arith.cmpi eq, %arg2, %c0_i32 : i32
    %1 = arith.extui %0 : i1 to i32
    %c0_i32_0 = arith.constant 0 : i32
    %2 = arith.cmpi ne, %1, %c0_i32_0 : i32
    scf.if %2 {
      %cst_9 = arith.constant 0.000000e+00 : f32
      %12 = vector.broadcast %cst_9 : f32 to vector<8x256xf32>
      %c0_10 = arith.constant 0 : index
      %c0_11 = arith.constant 0 : index
      %13 = vector.load %arg6[%c0_10, %c0_11] : memref<8x256xf32, #tpu.memory_space<vmem>>, vector<8x256xf32>
      tpu.vector_store %arg6[%c0_10, %c0_11], %12 {strides = array<i32>} : memref<8x256xf32, #tpu.memory_space<vmem>>, vector<8x256xf32>,
    } else {
    }
    %c0 = arith.constant 0 : index
    %c0_1 = arith.constant 0 : index
    %3 = vector.load %arg6[%c0, %c0_1] : memref<8x256xf32, #tpu.memory_space<vmem>>, vector<8x256xf32>
    %c0_2 = arith.constant 0 : index
    %c0_3 = arith.constant 0 : index
    %4 = vector.load %arg3[%c0_2, %c0_3] : memref<8x2048xbf16, #tpu.memory_space<vmem>>, vector<8x2048xbf16>
    %c0_4 = arith.constant 0 : index
    %c0_5 = arith.constant 0 : index
    %5 = vector.load %arg4[%c0_4, %c0_5] : memref<2048x256xbf16, #tpu.memory_space<vmem>>, vector<2048x256xbf16>
    %cst = arith.constant dense<0.000000e+00> : vector<8x256xf32>
    %6 = tpu.matmul %4, %5, %cst {dimension_numbers = #tpu.dot_dimension_numbers<[1], [0], [0], [1], [0, 0, 1, 1], [], []>} : vector<8x2048xbf16>, vector<2048x256xbf16>, vector<8x256xf32> -> vector<8x256xf32>
    %7 = arith.addf %3, %6 : vector<8x256xf32>
    %c0_6 = arith.constant 0 : index
    %c0_7 = arith.constant 0 : index
    %8 = vector.load %arg6[%c0_6, %c0_7] : memref<8x256xf32, #tpu.memory_space<vmem>>, vector<8x256xf32>
    tpu.vector_store %arg6[%c0_6, %c0_7], %7 {strides = array<i32>} : memref<8x256xf32, #tpu.memory_space<vmem>>, vector<8x256xf32>,
    %c1_i32 = arith.constant 1 : i32
    %9 = arith.cmpi eq, %arg2, %c1_i32 : i32
    %10 = arith.extui %9 : i1 to i32
    %c0_i32_8 = arith.constant 0 : i32
    %11 = arith.cmpi ne, %10, %c0_i32_8 : i32
    scf.if %11 {
      %c0_9 = arith.constant 0 : index
      %c0_10 = arith.constant 0 : index
      %12 = vector.load %arg6[%c0_9, %c0_10] : memref<8x256xf32, #tpu.memory_space<vmem>>, vector<8x256xf32>
      %cst_11 = arith.constant 0.000000e+00 : f32
      %13 = vector.broadcast %cst_11 : f32 to vector<8x256xf32>
      %14 = arith.cmpf oge, %12, %13 : vector<8x256xf32>
      %cst_12 = arith.constant 2.000000e-01 : f32
      %15 = vector.broadcast %cst_12 : f32 to vector<8x256xf32>
      %16 = arith.mulf %15, %12 : vector<8x256xf32>
      %17 = arith.select %14, %12, %16 : vector<8x256xi1>, vector<8x256xf32>
      %18 = arith.truncf %17 : vector<8x256xf32> to vector<8x256xbf16>
      %c0_13 = arith.constant 0 : index
      %c0_14 = arith.constant 0 : index
      %19 = vector.load %arg5[%c0_13, %c0_14] : memref<8x256xbf16, #tpu.memory_space<vmem>>, vector<8x256xbf16>
      tpu.vector_store %arg5[%c0_13, %c0_14], %18 {strides = array<i32>} : memref<8x256xbf16, #tpu.memory_space<vmem>>, vector<8x256xbf16>,
    } else {
    }
    return
  }
  func.func @transform_0(%arg0: i32, %arg1: i32, %arg2: i32) -> (i32, i32) {
    %c0_i32 = arith.constant 0 : i32
    return %arg0, %arg2 : i32, i32
  }
  func.func @transform_1(%arg0: i32, %arg1: i32, %arg2: i32) -> (i32, i32) {
    %c0_i32 = arith.constant 0 : i32
    return %arg2, %arg1 : i32, i32
  }
  func.func @transform_2(%arg0: i32, %arg1: i32, %arg2: i32) -> (i32, i32) {
    %c0_i32 = arith.constant 0 : i32
    return %arg0, %arg1 : i32, i32
  }
}

module attributes {stable_mosaic.version = 11 : i64} {
  func.func @_matvec_kernel(%arg0: i32, %arg1: memref<8x8192xbf16, #tpu.memory_space<vmem>>, %arg2: memref<1x8192xbf16, #tpu.memory_space<vmem>>, %arg3: memref<8x1xf32, #tpu.memory_space<vmem>>) attributes {dimension_semantics = [#tpu.dimension_semantics<parallel>], iteration_bounds = array<i64: 1>, scalar_prefetch = 0 : i64, scratch_operands = 0 : i64, tpu.core_type = #tpu.core_type<tc>, window_params = [{transform_indices = @transform_0, window_bounds = array<i64: 8, 8192>}, {pipeline_mode = #tpu.pipeline_mode<synchronous>, transform_indices = @transform_1, window_bounds = array<i64: 1, 8192>}, {transform_indices = @transform_2, window_bounds = array<i64: 8, 1>}]} {
    %c0 = arith.constant 0 : index
    %c0_0 = arith.constant 0 : index
    %0 = vector.load %arg1[%c0, %c0_0] : memref<8x8192xbf16, #tpu.memory_space<vmem>>, vector<8x8192xbf16>
    %1 = arith.extf %0 : vector<8x8192xbf16> to vector<8x8192xf32>
    %c0_1 = arith.constant 0 : index
    %c0_2 = arith.constant 0 : index
    %2 = vector.load %arg2[%c0_1, %c0_2] : memref<1x8192xbf16, #tpu.memory_space<vmem>>, vector<1x8192xbf16>
    %3 = arith.extf %2 : vector<1x8192xbf16> to vector<1x8192xf32>
    %4 = vector.broadcast %3 : vector<1x8192xf32> to vector<8x8192xf32>
    %5 = arith.mulf %1, %4 : vector<8x8192xf32>
    %cst = arith.constant dense<0.000000e+00> : vector<8xf32>
    %6 = vector.multi_reduction <add>, %5, %cst [1] : vector<8x8192xf32> to vector<8xf32>
    %7 = vector.shape_cast %6 : vector<8xf32> to vector<8x1xf32>
    %c0_3 = arith.constant 0 : index
    %c0_4 = arith.constant 0 : index
    %8 = vector.load %arg3[%c0_3, %c0_4] : memref<8x1xf32, #tpu.memory_space<vmem>>, vector<8x1xf32>
    tpu.vector_store %arg3[%c0_3, %c0_4], %7 {strides = array<i32>} : memref<8x1xf32, #tpu.memory_space<vmem>>, vector<8x1xf32>,
    return
  }
  func.func @transform_0(%arg0: i32) -> (i32, i32) {
    %c0_i32 = arith.constant 0 : i32
    %c0_i32_0 = arith.constant 0 : i32
    return %arg0, %c0_i32 : i32, i32
  }
  func.func @transform_1(%arg0: i32) -> (i32, i32) {
    %c0_i32 = arith.constant 0 : i32
    %c0_i32_0 = arith.constant 0 : i32
    %c0_i32_1 = arith.constant 0 : i32
    return %c0_i32, %c0_i32_0 : i32, i32
  }
  func.func @transform_2(%arg0: i32) -> (i32, i32) {
    %c0_i32 = arith.constant 0 : i32
    %c0_i32_0 = arith.constant 0 : i32
    return %arg0, %c0_i32 : i32, i32
  }
}

</mosaic_0001>

<bundles_post_ra>
// kernel: boundary_ent_discriminator.5
= control target key start
LH: loop header
LB: loop body
LE: loop exit
PB: predicated region body
PF: predicated region fallthrough
CT: control target
= control target key end

     0   :  { %v592_v0 = vmov 0.0   ;;  %vm593_vm0 = vmmov 0   ;;  %vm110_vm1 = vcmask 392192   ;;  %vm412_vm4 = vcmask 519168   ;;  %s756_s1 = inlined_call_operand.vmem [shape: bf16[48,64], index: 1, kind: input, shape index: {}]   ;;  %s757_s0 = inlined_call_operand.vmem [shape: bf16[162,48], index: 0, kind: input, shape index: {}]   ;;  %s758_s2 = inlined_call_operand.vmem [shape: bf16[162,64], index: 2, kind: output, shape index: {}]  }
   0x1   :  { %520 = vmatprep.subr.bf16.mxu0 %v592_v0  ;;  %v578_v1 = vld [vmem:[%s756_s1] sm:$0xff]   ;;  %570 = vmatprep.subr.bf16.mxu1 %v592_v0  ;;  %v579_v2 = vld [vmem:[%s756_s1 + $0x8] sm:$0xff]   ;;  %v580_v3 = vld [vmem:[%s756_s1 + $0x10] sm:$0xff]  }
   0x2   :  { %526 = vmatprep.mubr.msk.bf16.mxu0 %vm593_vm0, %v592_v0  ;;  %550 = vmatprep.mubr.msk.bf16.mxu1 %vm593_vm0, %v592_v0  ;;  %v581_v4 = vld [vmem:[%s757_s0] sm:$0xff]   ;;  %v582_v5 = vld [vmem:[%s757_s0 + $0x30] sm:$0xff]   ;;  %v583_v6 = vld [vmem:[%s757_s0 + $0x8] sm:$0xff]  }
   0x3   :  { %521 = vmatpush3.bf16.msra.mxu0 %v578_v1  ;;  %573 = vmatpush3.bf16.msra.mxu1 %v578_v1  ;;  %v584_v7 = vld [vmem:[%s757_s0 + $0x38] sm:$0xff]   ;;  %v585_v8 = vld [vmem:[%s757_s0 + $0x10] sm:$0xff]   ;;  %v586_v9 = vld [vmem:[%s757_s0 + $0x40] sm:$0xff]  }
   0x4   :  { %522 = vmatprep.subr.bf16.mxu0 %v592_v0  ;;  %571 = vmatprep.subr.bf16.mxu1 %v592_v0  ;;  %v587_v10 = vld [vmem:[%s757_s0 + $0x18] sm:$0xff]   ;;  %v588_v11 = vld [vmem:[%s757_s0 + $0x48] sm:$0xff]   ;;  %v589_v12 = vld [vmem:[%s757_s0 + $0x20] sm:$0xff]  }
   0x5   :  { %v590_v13 = vld [vmem:[%s757_s0 + $0x50] ss:$0 sps:$4 sm:$0x11]   ;;  %v591_v14 = vld [vmem:[%s757_s0 + $0x28] sm:$0xff]  }
   0x7   :  { %523 = vmatpush3.bf16.msra.mxu0 %v579_v2  ;;  %574 = vmatpush3.bf16.msra.mxu1 %v579_v2 }
   0x8   :  { %524 = vmatprep.subr.bf16.mxu0 %v592_v0  ;;  %572 = vmatprep.subr.bf16.mxu1 %v592_v0 }
   0xb   :  { %525 = vmatpush3.bf16.msra.mxu0 %v580_v3  ;;  %575 = vmatpush3.bf16.msra.mxu1 %v580_v3 }
   0xe   :  { %527 = vmatmul.mubr.msk.bf16.vlgmr.msra.gmra.mrb[0].mxu0 %vm110_vm1, %v581_v4  ;;  %551 = vmatmul.mubr.msk.bf16.vlgmr.msra.gmra.mrb[0].mxu1 %vm110_vm1, %v582_v5 }
   0xf   :  { %530 = vmatprep.mubr.msk.bf16.mxu0 %vm593_vm0, %v592_v0  ;;  %554 = vmatprep.mubr.msk.bf16.mxu1 %vm593_vm0, %v592_v0 }
  0x16   :  { %531 = vmatmul.mubr.msk.bf16.gmra.mrb[4].mxu0 %vm110_vm1, %v583_v6  ;;  %555 = vmatmul.mubr.msk.bf16.gmra.mrb[4].mxu1 %vm110_vm1, %v584_v7 }
  0x17   :  { %534 = vmatprep.mubr.msk.bf16.mxu0 %vm593_vm0, %v592_v0  ;;  %558 = vmatprep.mubr.msk.bf16.mxu1 %vm593_vm0, %v592_v0 }
  0x1e   :  { %535 = vmatmul.mubr.msk.bf16.gmra.mrb[8].mxu0 %vm110_vm1, %v585_v8  ;;  %559 = vmatmul.mubr.msk.bf16.gmra.mrb[8].mxu1 %vm110_vm1, %v586_v9 }
  0x1f   :  { %538 = vmatprep.mubr.msk.bf16.mxu0 %vm593_vm0, %v592_v0  ;;  %562 = vmatprep.mubr.msk.bf16.mxu1 %vm593_vm0, %v592_v0 }
  0x26   :  { %539 = vmatmul.mubr.msk.bf16.gmra.mrb[12].mxu0 %vm110_vm1, %v587_v10  ;;  %563 = vmatmul.mubr.msk.bf16.gmra.mrb[12].mxu1 %vm110_vm1, %v588_v11 }
  0x27   :  { %542 = vmatprep.mubr.msk.bf16.mxu0 %vm593_vm0, %v592_v0  ;;  %566 = vmatprep.mubr.msk.bf16.mxu1 %vm593_vm0, %v592_v0 }
  0x2e   :  { %543 = vmatmul.mubr.msk.bf16.gmra.mrb[16].mxu0 %vm110_vm1, %v589_v12  ;;  %567 = vmatmul.mubr.msk.bf16.gmra.mrb[16].mxu1 %vm110_vm1, %v590_v13 }
  0x2f   :  { %546 = vmatprep.mubr.msk.bf16.mxu0 %vm593_vm0, %v592_v0 }
  0x36   :  { %547 = vmatmul.mubr.msk.bf16.gmra.mrb[20].mxu0 %vm110_vm1, %v591_v14 }
  0xe1   :  { %v178_v15 = vpop.f32.mrb[0].mxu0  ;;  %v226_v16 = vpop.f32.mrb[0].mxu1 }
  0xe2   :  { %vm264_vm2 = vcmp.ge.f32.partialorder %v178_v15, 0.0  ;;  %v285_v17 = vmul.f32 0.2, %v178_v15  ;;  %v528_v18 = vpop.f32.mrb[1].mxu0  ;;  %vm276_vm3 = vcmp.ge.f32.partialorder %v226_v16, 0.0  ;;  %v552_v19 = vpop.f32.mrb[1].mxu1 }
  0xe3   :  { %v181_v20 = vpop.f32.mrb[2].mxu0  ;;  %v297_v21 = vmul.f32 0.2, %v226_v16  ;;  %v229_v22 = vpop.f32.mrb[2].mxu1 }
  0xe4   :  { %v306_v23 = vsel %vm264_vm2, %v178_v15, %v285_v17  ;;  %vm265_vm5 = vcmp.ge.f32.partialorder %v181_v20, 0.0  ;;  %v286_v24 = vmul.f32 0.2, %v181_v20  ;;  %v529_v25 = vpop.f32.mrb[3].mxu0  ;;  %vm277_vm6 = vcmp.ge.f32.partialorder %v229_v22, 0.0  ;;  %v553_v26 = vpop.f32.mrb[3].mxu1 }
  0xe5   :  { %v485_v27 = vpack.c.bf16 %v306_v23, %v306_v23  ;;  %v318_v28 = vsel %vm276_vm3, %v226_v16, %v297_v21  ;;  %v298_v29 = vmul.f32 0.2, %v229_v22 }
  0xe6   :  { %v307_v30 = vsel %vm265_vm5, %v181_v20, %v286_v24  ;;  %v497_v31 = vpack.c.bf16 %v318_v28, %v318_v28 }
  0xe7   :  { %413 = vst.msk [vmem:[%s758_s2] sm:$0xf] %vm412_vm4, %v485_v27  ;;  %v486_v32 = vpack.c.bf16 %v307_v30, %v307_v30  ;;  %v319_v33 = vsel %vm277_vm6, %v229_v22, %v298_v29 }
  0xe8   :  { %425 = vst.msk [vmem:[%s758_s2 + $0x30] sm:$0xf] %vm412_vm4, %v497_v31  ;;  %v498_v34 = vpack.c.bf16 %v319_v33, %v319_v33 }
  0xe9   :  { %414 = vst.msk [vmem:[%s758_s2 + $0x4] sm:$0xf] %vm412_vm4, %v486_v32  ;;  %v186_v35 = vpop.f32.mrb[4].mxu0  ;;  %v234_v36 = vpop.f32.mrb[4].mxu1 }
  0xea   :  { %vm266_vm7 = vcmp.ge.f32.partialorder %v186_v35, 0.0  ;;  %v287_v37 = vmul.f32 0.2, %v186_v35  ;;  %426 = vst.msk [vmem:[%s758_s2 + $0x34] sm:$0xf] %vm412_vm4, %v498_v34  ;;  %v532_v38 = vpop.f32.mrb[5].mxu0 }
  0xeb   :  { %vm278_vm8 = vcmp.ge.f32.partialorder %v234_v36, 0.0  ;;  %v556_v39 = vpop.f32.mrb[5].mxu1  ;;  %v189_v40 = vpop.f32.mrb[6].mxu0  ;;  %v299_v41 = vmul.f32 0.2, %v234_v36 }
  0xec   :  { %v237_v42 = vpop.f32.mrb[6].mxu1  ;;  %v308_v43 = vsel %vm266_vm7, %v186_v35, %v287_v37  ;;  %vm267_vm9 = vcmp.ge.f32.partialorder %v189_v40, 0.0  ;;  %v288_v44 = vmul.f32 0.2, %v189_v40  ;;  %v533_v45 = vpop.f32.mrb[7].mxu0  ;;  %vm433_vm7 = vcmask 516096  }
  0xed   :  { %vm279_vm10 = vcmp.ge.f32.partialorder %v237_v42, 0.0  ;;  %v557_v46 = vpop.f32.mrb[7].mxu1  ;;  %v487_v47 = vpack.c.bf16 %v308_v43, %v308_v43  ;;  %v320_v48 = vsel %vm278_vm8, %v234_v36, %v299_v41  ;;  %v300_v49 = vmul.f32 0.2, %v237_v42 }
  0xee   :  { %v309_v50 = vsel %vm267_vm9, %v189_v40, %v288_v44  ;;  %v499_v51 = vpack.c.bf16 %v320_v48, %v320_v48 }
  0xef   :  { %415 = vst.msk [vmem:[%s758_s2 + $0x8] sm:$0xf] %vm412_vm4, %v487_v47  ;;  %v488_v52 = vpack.c.bf16 %v309_v50, %v309_v50  ;;  %v321_v53 = vsel %vm279_vm10, %v237_v42, %v300_v49 }
  0xf0   :  { %427 = vst.msk [vmem:[%s758_s2 + $0x38] sm:$0xf] %vm412_vm4, %v499_v51  ;;  %v500_v54 = vpack.c.bf16 %v321_v53, %v321_v53 }
  0xf1   :  { %416 = vst.msk [vmem:[%s758_s2 + $0xc] sm:$0xf] %vm412_vm4, %v488_v52  ;;  %v194_v55 = vpop.f32.mrb[8].mxu0  ;;  %v242_v56 = vpop.f32.mrb[8].mxu1 }
  0xf2   :  { %vm268_vm11 = vcmp.ge.f32.partialorder %v194_v55, 0.0  ;;  %v289_v57 = vmul.f32 0.2, %v194_v55  ;;  %428 = vst.msk [vmem:[%s758_s2 + $0x3c] sm:$0xf] %vm412_vm4, %v500_v54  ;;  %v536_v58 = vpop.f32.mrb[9].mxu0 }
  0xf3   :  { %vm280_vm12 = vcmp.ge.f32.partialorder %v242_v56, 0.0  ;;  %v560_v59 = vpop.f32.mrb[9].mxu1  ;;  %v197_v60 = vpop.f32.mrb[10].mxu0  ;;  %v301_v61 = vmul.f32 0.2, %v242_v56 }
  0xf4   :  { %v245_v62 = vpop.f32.mrb[10].mxu1  ;;  %v310_v63 = vsel %vm268_vm11, %v194_v55, %v289_v57  ;;  %vm269_vm13 = vcmp.ge.f32.partialorder %v197_v60, 0.0  ;;  %v290_v0 = vmul.f32 0.2, %v197_v60  ;;  %v537_v1 = vpop.f32.mrb[11].mxu0 }
  0xf5   :  { %vm281_vm14 = vcmp.ge.f32.partialorder %v245_v62, 0.0  ;;  %v561_v2 = vpop.f32.mrb[11].mxu1  ;;  %v489_v3 = vpack.c.bf16 %v310_v63, %v310_v63  ;;  %v322_v4 = vsel %vm280_vm12, %v242_v56, %v301_v61  ;;  %v302_v5 = vmul.f32 0.2, %v245_v62 }
  0xf6   :  { %v311_v6 = vsel %vm269_vm13, %v197_v60, %v290_v0  ;;  %v501_v7 = vpack.c.bf16 %v322_v4, %v322_v4 }
  0xf7   :  { %417 = vst.msk [vmem:[%s758_s2 + $0x10] sm:$0xf] %vm412_vm4, %v489_v3  ;;  %v490_v8 = vpack.c.bf16 %v311_v6, %v311_v6  ;;  %v323_v9 = vsel %vm281_vm14, %v245_v62, %v302_v5 }
  0xf8   :  { %429 = vst.msk [vmem:[%s758_s2 + $0x40] sm:$0xf] %vm412_vm4, %v501_v7  ;;  %v502_v10 = vpack.c.bf16 %v323_v9, %v323_v9 }
  0xf9   :  { %418 = vst.msk [vmem:[%s758_s2 + $0x14] sm:$0xf] %vm412_vm4, %v490_v8  ;;  %v202_v11 = vpop.f32.mrb[12].mxu0  ;;  %v250_v12 = vpop.f32.mrb[12].mxu1 }
  0xfa   :  { %vm270_vm15 = vcmp.ge.f32.partialorder %v202_v11, 0.0  ;;  %v291_v13 = vmul.f32 0.2, %v202_v11  ;;  %430 = vst.msk [vmem:[%s758_s2 + $0x44] sm:$0xf] %vm412_vm4, %v502_v10  ;;  %v540_v14 = vpop.f32.mrb[13].mxu0 }
  0xfb   :  { %vm282_vm0 = vcmp.ge.f32.partialorder %v250_v12, 0.0  ;;  %v564_v15 = vpop.f32.mrb[13].mxu1  ;;  %v205_v16 = vpop.f32.mrb[14].mxu0  ;;  %v303_v17 = vmul.f32 0.2, %v250_v12 }
  0xfc   :  { %v253_v18 = vpop.f32.mrb[14].mxu1  ;;  %v312_v19 = vsel %vm270_vm15, %v202_v11, %v291_v13  ;;  %vm271_vm1 = vcmp.ge.f32.partialorder %v205_v16, 0.0  ;;  %v292_v20 = vmul.f32 0.2, %v205_v16  ;;  %v541_v21 = vpop.f32.mrb[15].mxu0 }
  0xfd   :  { %vm283_vm2 = vcmp.ge.f32.partialorder %v253_v18, 0.0  ;;  %v565_v22 = vpop.f32.mrb[15].mxu1  ;;  %v491_v23 = vpack.c.bf16 %v312_v19, %v312_v19  ;;  %v324_v24 = vsel %vm282_vm0, %v250_v12, %v303_v17  ;;  %v304_v25 = vmul.f32 0.2, %v253_v18 }
  0xfe   :  { %v313_v26 = vsel %vm271_vm1, %v205_v16, %v292_v20  ;;  %v503_v27 = vpack.c.bf16 %v324_v24, %v324_v24 }
  0xff   :  { %419 = vst.msk [vmem:[%s758_s2 + $0x18] sm:$0xf] %vm412_vm4, %v491_v23  ;;  %v492_v28 = vpack.c.bf16 %v313_v26, %v313_v26  ;;  %v325_v29 = vsel %vm283_vm2, %v253_v18, %v304_v25 }
 0x100   :  { %431 = vst.msk [vmem:[%s758_s2 + $0x48] sm:$0xf] %vm412_vm4, %v503_v27  ;;  %v504_v30 = vpack.c.bf16 %v325_v29, %v325_v29 }
 0x101   :  { %420 = vst.msk [vmem:[%s758_s2 + $0x1c] sm:$0xf] %vm412_vm4, %v492_v28  ;;  %v210_v31 = vpop.f32.mrb[16].mxu0  ;;  %v258_v32 = vpop.f32.mrb[16].mxu1 }
 0x102   :  { %vm272_vm3 = vcmp.ge.f32.partialorder %v210_v31, 0.0  ;;  %v293_v33 = vmul.f32 0.2, %v210_v31  ;;  %432 = vst.msk [vmem:[%s758_s2 + $0x4c] sm:$0xf] %vm412_vm4, %v504_v30  ;;  %v544_v34 = vpop.f32.mrb[17].mxu0 }
 0x103   :  { %vm284_vm5 = vcmp.ge.f32.partialorder %v258_v32, 0.0  ;;  %v568_v35 = vpop.f32.mrb[17].mxu1  ;;  %v213_v36 = vpop.f32.mrb[18].mxu0  ;;  %v305_v37 = vmul.f32 0.2, %v258_v32 }
 0x104   :  { %v261_v38 = vpop.f32.mrb[18].mxu1  ;;  %v314_v39 = vsel %vm272_vm3, %v210_v31, %v293_v33  ;;  %vm273_vm6 = vcmp.ge.f32.partialorder %v213_v36, 0.0  ;;  %v294_v40 = vmul.f32 0.2, %v213_v36  ;;  %v545_v41 = vpop.f32.mrb[19].mxu0 }
 0x105   :  { %v569_v42 = vpop.f32.mrb[19].mxu1  ;;  %v493_v43 = vpack.c.bf16 %v314_v39, %v314_v39  ;;  %v326_v44 = vsel %vm284_vm5, %v258_v32, %v305_v37 }
 0x106   :  { %v315_v45 = vsel %vm273_vm6, %v213_v36, %v294_v40  ;;  %v505_v46 = vpack.c.bf16 %v326_v44, %v326_v44 }
 0x107   :  { %421 = vst.msk [vmem:[%s758_s2 + $0x20] sm:$0xf] %vm412_vm4, %v493_v43  ;;  %v494_v47 = vpack.c.bf16 %v315_v45, %v315_v45 }
 0x108   :  { %434 = vst.msk [vmem:[%s758_s2 + $0x50] sm:$0x1] %vm433_vm7, %v505_v46 }
 0x109   :  { %422 = vst.msk [vmem:[%s758_s2 + $0x24] sm:$0xf] %vm412_vm4, %v494_v47  ;;  %v218_v48 = vpop.f32.mrb[20].mxu0 }
 0x10a   :  { %vm274_vm8 = vcmp.ge.f32.partialorder %v218_v48, 0.0  ;;  %v295_v49 = vmul.f32 0.2, %v218_v48  ;;  %v548_v50 = vpop.f32.mrb[21].mxu0 }
 0x10b   :  { %v221_v51 = vpop.f32.mrb[22].mxu0 }
 0x10c   :  { %v316_v52 = vsel %vm274_vm8, %v218_v48, %v295_v49  ;;  %vm275_vm9 = vcmp.ge.f32.partialorder %v221_v51, 0.0  ;;  %v296_v53 = vmul.f32 0.2, %v221_v51  ;;  %v549_v54 = vpop.f32.mrb[23].mxu0 }
 0x10d   :  { %v495_v55 = vpack.c.bf16 %v316_v52, %v316_v52 }
 0x10e   :  { %v317_v56 = vsel %vm275_vm9, %v221_v51, %v296_v53 }
 0x10f   :  { %423 = vst.msk [vmem:[%s758_s2 + $0x28] sm:$0xf] %vm412_vm4, %v495_v55  ;;  %v496_v57 = vpack.c.bf16 %v317_v56, %v317_v56 }
 0x111   :  { %424 = vst.msk [vmem:[%s758_s2 + $0x2c] sm:$0xf] %vm412_vm4, %v496_v57 }

// kernel: boundary_ent_discriminator.6
= control target key start
LH: loop header
LB: loop body
LE: loop exit
PB: predicated region body
PF: predicated region fallthrough
CT: control target
= control target key end

     0   :  { %s1691_s1 = inlined_call_operand.vmem [shape: bf16[1024,128], index: 1, kind: input, shape index: {}]   ;;  %s1692_s0 = inlined_call_operand.vmem [shape: bf16[50,1024], index: 0, kind: input, shape index: {}]   ;;  %s1693_s2 = inlined_call_operand.vmem [shape: bf16[50,128], index: 2, kind: output, shape index: {}]  }
   0x1   :  { %v1304_v0 = vld [vmem:[%s1691_s1 + $0x40] sm:$0xff]   ;;  %v1308_v4 = vld [vmem:[%s1691_s1 + $0x48] sm:$0xff]   ;;  %v1312_v8 = vld [vmem:[%s1691_s1 + $0x50] sm:$0xff]  }
   0x2   :  { %v1305_v1 = vld [vmem:[%s1691_s1 + $0xc0] sm:$0xff]   ;;  %1144 = vmatprep.subr.bf16.mxu0 %v1304_v0  ;;  %v1309_v5 = vld [vmem:[%s1691_s1 + $0xc8] sm:$0xff]   ;;  %v1313_v9 = vld [vmem:[%s1691_s1 + $0xd0] sm:$0xff]  }
   0x3   :  { %v1306_v2 = vld [vmem:[%s1691_s1] sm:$0xff]   ;;  %1184 = vmatprep.subr.bf16.mxu1 %v1305_v1  ;;  %v1310_v6 = vld [vmem:[%s1691_s1 + $0x8] sm:$0xff]   ;;  %v1314_v10 = vld [vmem:[%s1691_s1 + $0x10] sm:$0xff]  }
   0x4   :  { %v1307_v3 = vld [vmem:[%s1691_s1 + $0x80] sm:$0xff]   ;;  %1145 = vmatpush3.bf16.msra.mxu0 %v1306_v2  ;;  %v1311_v7 = vld [vmem:[%s1691_s1 + $0x88] sm:$0xff]   ;;  %v1315_v11 = vld [vmem:[%s1691_s1 + $0x90] sm:$0xff]  }
   0x5   :  { %1185 = vmatpush3.bf16.msra.mxu1 %v1307_v3  ;;  %1146 = vmatprep.subr.bf16.mxu0 %v1308_v4  ;;  %v1316_v12 = vld [vmem:[%s1691_s1 + $0x58] sm:$0xff]   ;;  %v1320_v16 = vld [vmem:[%s1691_s1 + $0x60] sm:$0xff]   ;;  %v1324_v20 = vld [vmem:[%s1691_s1 + $0x68] sm:$0xff]  }
   0x6   :  { %1186 = vmatprep.subr.bf16.mxu1 %v1309_v5  ;;  %v1317_v13 = vld [vmem:[%s1691_s1 + $0xd8] sm:$0xff]   ;;  %v1321_v17 = vld [vmem:[%s1691_s1 + $0xe0] sm:$0xff]   ;;  %v1325_v21 = vld [vmem:[%s1691_s1 + $0xe8] sm:$0xff]  }
   0x7   :  { %v1318_v14 = vld [vmem:[%s1691_s1 + $0x18] sm:$0xff]   ;;  %v1322_v18 = vld [vmem:[%s1691_s1 + $0x20] sm:$0xff]   ;;  %v1326_v22 = vld [vmem:[%s1691_s1 + $0x28] sm:$0xff]  }
   0x8   :  { %1147 = vmatpush3.bf16.msra.mxu0 %v1310_v6  ;;  %v1319_v15 = vld [vmem:[%s1691_s1 + $0x98] sm:$0xff]   ;;  %v1323_v19 = vld [vmem:[%s1691_s1 + $0xa0] sm:$0xff]   ;;  %v1327_v23 = vld [vmem:[%s1691_s1 + $0xa8] sm:$0xff]  }
   0x9   :  { %1187 = vmatpush3.bf16.msra.mxu1 %v1311_v7  ;;  %1148 = vmatprep.subr.bf16.mxu0 %v1312_v8  ;;  %v1328_v24 = vld [vmem:[%s1691_s1 + $0x70] sm:$0xff]   ;;  %v1332_v28 = vld [vmem:[%s1691_s1 + $0x78] sm:$0xff]   ;;  %v12_v32 = vld [vmem:[%s1692_s0] sm:$0xff] }
   0xa   :  { %1188 = vmatprep.subr.bf16.mxu1 %v1313_v9  ;;  %v1329_v25 = vld [vmem:[%s1691_s1 + $0xf0] sm:$0xff]   ;;  %v1333_v29 = vld [vmem:[%s1691_s1 + $0xf8] sm:$0xff]   ;;  %v16_v33 = vld [vmem:[%s1692_s0 + $0x20] sm:$0xff] }
   0xb   :  { %v1330_v26 = vld [vmem:[%s1691_s1 + $0x30] sm:$0xff]   ;;  %v1334_v30 = vld [vmem:[%s1691_s1 + $0x38] sm:$0xff]   ;;  %v13_v34 = vld [vmem:[%s1692_s0 + $0x8] sm:$0xff]  ;;  %v1017_v35 = vcombine.low %v12_v32, %v16_v33  ;;  %v1018_v36 = vcombine.high %v12_v32, %v16_v33 }
   0xc   :  { %1149 = vmatpush3.bf16.msra.mxu0 %v1314_v10  ;;  %v1331_v27 = vld [vmem:[%s1691_s1 + $0xb0] sm:$0xff]   ;;  %v1335_v31 = vld [vmem:[%s1691_s1 + $0xb8] sm:$0xff]   ;;  %v17_v37 = vld [vmem:[%s1692_s0 + $0x28] sm:$0xff] }
   0xd   :  { %1189 = vmatpush3.bf16.msra.mxu1 %v1315_v11  ;;  %1150 = vmatprep.subr.bf16.mxu0 %v1316_v12  ;;  %v1019_v38 = vcombine.low %v13_v34, %v17_v37  ;;  %v1020_v39 = vcombine.high %v13_v34, %v17_v37  ;;  %v1336_v40 = vld [vmem:[%s1691_s1 + $0x140] sm:$0xff]   ;;  %v1340_v44 = vld [vmem:[%s1691_s1 + $0x148] sm:$0xff]   ;;  %v1344_v56 = vld [vmem:[%s1691_s1 + $0x150] sm:$0xff]  }
   0xe   :  { %1190 = vmatprep.subr.bf16.mxu1 %v1317_v13  ;;  %732 = vmatprep.mubr.bf16.mxu0 %v1018_v36  ;;  %v1337_v41 = vld [vmem:[%s1691_s1 + $0x1c0] sm:$0xff]   ;;  %v1341_v45 = vld [vmem:[%s1691_s1 + $0x1c8] sm:$0xff]   ;;  %v1345_v57 = vld [vmem:[%s1691_s1 + $0x1d0] sm:$0xff]  }
   0xf   :  { %796 = vmatprep.mubr.bf16.mxu1 %v1020_v39  ;;  %v1338_v42 = vld [vmem:[%s1691_s1 + $0x100] sm:$0xff]   ;;  %v1342_v46 = vld [vmem:[%s1691_s1 + $0x108] sm:$0xff]   ;;  %v1346_v58 = vld [vmem:[%s1691_s1 + $0x110] sm:$0xff]  }
  0x10   :  { %1151 = vmatpush3.bf16.msra.mxu0 %v1318_v14  ;;  %v1339_v43 = vld [vmem:[%s1691_s1 + $0x180] sm:$0xff]   ;;  %v1343_v47 = vld [vmem:[%s1691_s1 + $0x188] sm:$0xff]   ;;  %v1347_v59 = vld [vmem:[%s1691_s1 + $0x190] sm:$0xff]  }
  0x11   :  { %1191 = vmatpush3.bf16.msra.mxu1 %v1319_v15  ;;  %1152 = vmatprep.subr.bf16.mxu0 %v1320_v16  ;;  %v20_v48 = vld [vmem:[%s1692_s0 + $0x40] sm:$0xff]  ;;  %v21_v51 = vld [vmem:[%s1692_s0 + $0x48] sm:$0xff]  ;;  %v1348_v60 = vld [vmem:[%s1691_s1 + $0x158] sm:$0xff]  }
  0x12   :  { %1192 = vmatprep.subr.bf16.mxu1 %v1321_v17  ;;  %v24_v49 = vld [vmem:[%s1692_s0 + $0x60] sm:$0xff]  ;;  %v25_v52 = vld [vmem:[%s1692_s0 + $0x68] sm:$0xff]  ;;  %v1349_v61 = vld [vmem:[%s1691_s1 + $0x1d8] sm:$0xff]  }
  0x13   :  { %v1026_v50 = vcombine.high %v20_v48, %v24_v49  ;;  %v1025_v53 = vcombine.low %v20_v48, %v24_v49  ;;  %v1028_v54 = vcombine.high %v21_v51, %v25_v52  ;;  %v1027_v55 = vcombine.low %v21_v51, %v25_v52  ;;  %v1350_v62 = vld [vmem:[%s1691_s1 + $0x118] sm:$0xff]   ;;  %v28_v0 = vld [vmem:[%s1692_s0 + $0x80] sm:$0xff]  ;;  %v29_v2 = vld [vmem:[%s1692_s0 + $0x88] sm:$0xff] }
  0x14   :  { %1153 = vmatpush3.bf16.msra.mxu0 %v1322_v18  ;;  %v1351_v63 = vld [vmem:[%s1691_s1 + $0x198] sm:$0xff]   ;;  %v32_v1 = vld [vmem:[%s1692_s0 + $0xa0] sm:$0xff]  ;;  %v33_v3 = vld [vmem:[%s1692_s0 + $0xa8] sm:$0xff] }
  0x15   :  { %1193 = vmatpush3.bf16.msra.mxu1 %v1323_v19  ;;  %1154 = vmatprep.subr.bf16.mxu0 %v1324_v20  ;;  %v1034_v4 = vcombine.high %v28_v0, %v32_v1  ;;  %v1036_v5 = vcombine.high %v29_v2, %v33_v3  ;;  %v1033_v6 = vcombine.low %v28_v0, %v32_v1  ;;  %v1352_v8 = vld [vmem:[%s1691_s1 + $0x160] sm:$0xff]   ;;  %v1356_v12 = vld [vmem:[%s1691_s1 + $0x168] sm:$0xff]   ;;  %v15_v32 = vld [vmem:[%s1692_s0 + $0x18] sm:$0xff] }
  0x16   :  { %1194 = vmatprep.subr.bf16.mxu1 %v1325_v21  ;;  %v1035_v7 = vcombine.low %v29_v2, %v33_v3  ;;  %v1353_v9 = vld [vmem:[%s1691_s1 + $0x1e0] sm:$0xff]   ;;  %v1357_v13 = vld [vmem:[%s1691_s1 + $0x1e8] sm:$0xff]   ;;  %v1364_v21 = vld [vmem:[%s1691_s1 + $0x170] sm:$0xff]  }
  0x17   :  { %v1354_v10 = vld [vmem:[%s1691_s1 + $0x120] sm:$0xff]   ;;  %v1358_v14 = vld [vmem:[%s1691_s1 + $0x128] sm:$0xff]   ;;  %v19_v33 = vld [vmem:[%s1692_s0 + $0x38] sm:$0xff] }
  0x18   :  { %1155 = vmatpush3.bf16.msra.mxu0 %v1326_v22  ;;  %v1355_v11 = vld [vmem:[%s1691_s1 + $0x1a0] sm:$0xff]   ;;  %v1359_v15 = vld [vmem:[%s1691_s1 + $0x1a8] sm:$0xff]   ;;  %v1023_v36 = vcombine.low %v15_v32, %v19_v33  ;;  %v22_v37 = vld [vmem:[%s1692_s0 + $0x50] sm:$0xff] }
  0x19   :  { %1195 = vmatpush3.bf16.msra.mxu1 %v1327_v23  ;;  %1156 = vmatprep.subr.bf16.mxu0 %v1328_v24  ;;  %v36_v16 = vld [vmem:[%s1692_s0 + $0xc0] sm:$0x11]  ;;  %v37_v17 = vld [vmem:[%s1692_s0 + $0xc8] sm:$0x11]  ;;  %v1365_v23 = vld [vmem:[%s1691_s1 + $0x1f0] sm:$0xff]  }
  0x1a   :  { %1196 = vmatprep.subr.bf16.mxu1 %v1329_v25  ;;  %v1042_v18 = vcombine.high %v36_v16, %v36_v16  ;;  %v1044_v19 = vcombine.high %v37_v17, %v37_v17  ;;  %v1041_v20 = vcombine.low %v36_v16, %v36_v16  ;;  %v1043_v22 = vcombine.low %v37_v17, %v37_v17  ;;  %v1366_v24 = vld [vmem:[%s1691_s1 + $0x130] sm:$0xff]   ;;  %v23_v39 = vld [vmem:[%s1692_s0 + $0x58] sm:$0xff] }
  0x1b   :  { %v1367_v25 = vld [vmem:[%s1691_s1 + $0x1b0] sm:$0xff]  }
  0x1c   :  { %1157 = vmatpush3.bf16.msra.mxu0 %v1330_v26  ;;  %v1368_v26 = vld [vmem:[%s1691_s1 + $0x178] sm:$0xff]   ;;  %v38_v52 = vld [vmem:[%s1692_s0 + $0xd0] sm:$0x11] }
  0x1d   :  { %1197 = vmatpush3.bf16.msra.mxu1 %v1331_v27  ;;  %1158 = vmatprep.subr.bf16.mxu0 %v1332_v28  ;;  %v1369_v27 = vld [vmem:[%s1691_s1 + $0x1f8] sm:$0xff]  }
  0x1e   :  { %1198 = vmatprep.subr.bf16.mxu1 %v1333_v29  ;;  %v1370_v28 = vld [vmem:[%s1691_s1 + $0x138] sm:$0xff]  }
  0x1f   :  { %v1371_v29 = vld [vmem:[%s1691_s1 + $0x1b8] sm:$0xff]  }
  0x20   :  { %1159 = vmatpush3.bf16.msra.mxu0 %v1334_v30  ;;  %v14_v30 = vld [vmem:[%s1692_s0 + $0x10] sm:$0xff] }
  0x21   :  { %1199 = vmatpush3.bf16.msra.mxu1 %v1335_v31  ;;  %1224 = vmatprep.subr.bf16.mxu0 %v1336_v40  ;;  %v18_v31 = vld [vmem:[%s1692_s0 + $0x30] sm:$0xff]  ;;  %v1024_v40 = vcombine.high %v15_v32, %v19_v33 }
  0x22   :  { %1264 = vmatprep.subr.bf16.mxu1 %v1337_v41  ;;  %v1021_v34 = vcombine.low %v14_v30, %v18_v31 }
  0x23   :  { %733 = vmatmul.mubr.bf16.vlgmr.msra.gmra.mrb[0].mxu0 %v1017_v35  ;;  %v1022_v35 = vcombine.high %v14_v30, %v18_v31 }
  0x24   :  { %797 = vmatmul.mubr.bf16.vlgmr.msra.gmra.mrb[0].mxu1 %v1019_v38  ;;  %1225 = vmatpush3.bf16.msra.mxu0 %v1338_v42  ;;  %v26_v38 = vld [vmem:[%s1692_s0 + $0x70] sm:$0xff]  ;;  %v27_v42 = vld [vmem:[%s1692_s0 + $0x78] sm:$0xff] }
  0x25   :  { %1265 = vmatpush3.bf16.msra.mxu1 %v1339_v43  ;;  %1226 = vmatprep.subr.bf16.mxu0 %v1340_v44  ;;  %v1030_v41 = vcombine.high %v22_v37, %v26_v38  ;;  %v1032_v43 = vcombine.high %v23_v39, %v27_v42  ;;  %v30_v44 = vld [vmem:[%s1692_s0 + $0x90] sm:$0xff]  ;;  %v1029_v48 = vcombine.low %v22_v37, %v26_v38 }
  0x26   :  { %1266 = vmatprep.subr.bf16.mxu1 %v1341_v45  ;;  %740 = vmatprep.mubr.bf16.mxu0 %v1026_v50  ;;  %v34_v45 = vld [vmem:[%s1692_s0 + $0xb0] sm:$0xff]  ;;  %v1031_v49 = vcombine.low %v23_v39, %v27_v42 }
  0x27   :  { %804 = vmatprep.mubr.bf16.mxu1 %v1028_v54  ;;  %v1038_v50 = vcombine.high %v30_v44, %v34_v45  ;;  %v1037_v54 = vcombine.low %v30_v44, %v34_v45 }
  0x28   :  { %1227 = vmatpush3.bf16.msra.mxu0 %v1342_v46  ;;  %v31_v46 = vld [vmem:[%s1692_s0 + $0x98] sm:$0xff] }
  0x29   :  { %1267 = vmatpush3.bf16.msra.mxu1 %v1343_v47  ;;  %1228 = vmatprep.subr.bf16.mxu0 %v1344_v56  ;;  %v35_v47 = vld [vmem:[%s1692_s0 + $0xb8] sm:$0xff]  ;;  %v1046_v56 = vcombine.high %v38_v52, %v38_v52 }
  0x2a   :  { %1268 = vmatprep.subr.bf16.mxu1 %v1345_v57  ;;  %v1040_v51 = vcombine.high %v31_v46, %v35_v47 }
  0x2b   :  { %741 = vmatmul.mubr.bf16.gmra.mrb[4].mxu0 %v1025_v53  ;;  %v39_v53 = vld [vmem:[%s1692_s0 + $0xd8] sm:$0x11] }
  0x2c   :  { %805 = vmatmul.mubr.bf16.gmra.mrb[4].mxu1 %v1027_v55  ;;  %1229 = vmatpush3.bf16.msra.mxu0 %v1346_v58  ;;  %v1039_v55 = vcombine.low %v31_v46, %v35_v47  ;;  %v1048_v57 = vcombine.high %v39_v53, %v39_v53  ;;  %v1045_v58 = vcombine.low %v38_v52, %v38_v52 }
  0x2d   :  { %1269 = vmatpush3.bf16.msra.mxu1 %v1347_v59  ;;  %1230 = vmatprep.subr.bf16.mxu0 %v1348_v60  ;;  %v1047_v59 = vcombine.low %v39_v53, %v39_v53 }
  0x2e   :  { %1270 = vmatprep.subr.bf16.mxu1 %v1349_v61  ;;  %748 = vmatprep.mubr.bf16.mxu0 %v1034_v4 }
  0x2f   :  { %812 = vmatprep.mubr.bf16.mxu1 %v1036_v5 }
  0x30   :  { %1231 = vmatpush3.bf16.msra.mxu0 %v1350_v62 }
  0x31   :  { %1271 = vmatpush3.bf16.msra.mxu1 %v1351_v63  ;;  %1232 = vmatprep.subr.bf16.mxu0 %v1352_v8 }
  0x32   :  { %1272 = vmatprep.subr.bf16.mxu1 %v1353_v9 }
  0x33   :  { %749 = vmatmul.mubr.bf16.gmra.mrb[8].mxu0 %v1033_v6 }
  0x34   :  { %813 = vmatmul.mubr.bf16.gmra.mrb[8].mxu1 %v1035_v7  ;;  %1233 = vmatpush3.bf16.msra.mxu0 %v1354_v10 }
  0x35   :  { %1273 = vmatpush3.bf16.msra.mxu1 %v1355_v11  ;;  %1234 = vmatprep.subr.bf16.mxu0 %v1356_v12 }
  0x36   :  { %1274 = vmatprep.subr.bf16.mxu1 %v1357_v13  ;;  %756 = vmatprep.mubr.bf16.mxu0 %v1042_v18 }
  0x37   :  { %820 = vmatprep.mubr.bf16.mxu1 %v1044_v19 }
  0x38   :  { %1235 = vmatpush3.bf16.msra.mxu0 %v1358_v14 }
  0x39   :  { %1275 = vmatpush3.bf16.msra.mxu1 %v1359_v15  ;;  %1236 = vmatprep.subr.bf16.mxu0 %v1364_v21 }
  0x3a   :  { %1276 = vmatprep.subr.bf16.mxu1 %v1365_v23 }
  0x3b   :  { %757 = vmatmul.mubr.bf16.gmra.mrb[12].mxu0 %v1041_v20 }
  0x3c   :  { %821 = vmatmul.mubr.bf16.gmra.mrb[12].mxu1 %v1043_v22  ;;  %1237 = vmatpush3.bf16.msra.mxu0 %v1366_v24 }
  0x3d   :  { %1277 = vmatpush3.bf16.msra.mxu1 %v1367_v25  ;;  %1238 = vmatprep.subr.bf16.mxu0 %v1368_v26 }
  0x3e   :  { %1278 = vmatprep.subr.bf16.mxu1 %v1369_v27  ;;  %860 = vmatprep.mubr.bf16.mxu0 %v1022_v35 }
  0x3f   :  { %924 = vmatprep.mubr.bf16.mxu1 %v1024_v40 }
  0x40   :  { %1239 = vmatpush3.bf16.msra.mxu0 %v1370_v28 }
  0x41   :  { %1279 = vmatpush3.bf16.msra.mxu1 %v1371_v29 }
  0x43   :  { %861 = vmatmul.mubr.bf16.vlgmr.msra.gmra.mrb[16].mxu0 %v1021_v34 }
  0x44   :  { %925 = vmatmul.mubr.bf16.vlgmr.msra.gmra.mrb[16].mxu1 %v1023_v36  ;;  %868 = vmatprep.mubr.bf16.mxu0 %v1030_v41 }
  0x45   :  { %932 = vmatprep.mubr.bf16.mxu1 %v1032_v43 }
  0x4b   :  { %869 = vmatmul.mubr.bf16.gmra.mrb[20].mxu0 %v1029_v48 }
  0x4c   :  { %933 = vmatmul.mubr.bf16.gmra.mrb[20].mxu1 %v1031_v49  ;;  %876 = vmatprep.mubr.bf16.mxu0 %v1038_v50 }
  0x4d   :  { %940 = vmatprep.mubr.bf16.mxu1 %v1040_v51 }
  0x53   :  { %877 = vmatmul.mubr.bf16.gmra.mrb[24].mxu0 %v1037_v54 }
  0x54   :  { %941 = vmatmul.mubr.bf16.gmra.mrb[24].mxu1 %v1039_v55  ;;  %884 = vmatprep.mubr.bf16.mxu0 %v1046_v56 }
  0x55   :  { %948 = vmatprep.mubr.bf16.mxu1 %v1048_v57 }
  0x5b   :  { %885 = vmatmul.mubr.bf16.gmra.mrb[28].mxu0 %v1045_v58 }
  0x5c   :  { %949 = vmatmul.mubr.bf16.gmra.mrb[28].mxu1 %v1047_v59 }
  0xf6   :  { %v1160_v60 = vpop.f32.mrb[0].mxu0 }
  0xf7   :  { %v1200_v61 = vpop.f32.mrb[0].mxu1  ;;  %v1161_v62 = vpop.f32.mrb[1].mxu0 }
  0xf8   :  { %v1162_v63 = vadd.f32 %v1161_v62, %v1160_v60  ;;  %v1201_v0 = vpop.f32.mrb[1].mxu1  ;;  %v1163_v1 = vpop.f32.mrb[2].mxu0 }
  0xf9   :  { %v1202_v2 = vadd.f32 %v1201_v0, %v1200_v61  ;;  %v1203_v3 = vpop.f32.mrb[2].mxu1  ;;  %v1164_v4 = vpop.f32.mrb[3].mxu0 }
  0xfa   :  { %v1165_v5 = vadd.f32 %v1164_v4, %v1163_v1  ;;  %v1204_v6 = vpop.f32.mrb[3].mxu1 }
  0xfb   :  { %v799_v7 = vadd.f32 %v1202_v2, %v1162_v63  ;;  %v1205_v8 = vadd.f32 %v1204_v6, %v1203_v3 }
  0xfd   :  { %v802_v9 = vadd.f32 %v1205_v8, %v1165_v5 }
  0xfe   :  { %v1166_v10 = vpop.f32.mrb[4].mxu0 }
  0xff   :  { %v1206_v11 = vpop.f32.mrb[4].mxu1  ;;  %v1167_v12 = vpop.f32.mrb[5].mxu0 }
 0x100   :  { %v1168_v13 = vadd.f32 %v1167_v12, %v1166_v10  ;;  %v1207_v14 = vpop.f32.mrb[5].mxu1  ;;  %v1169_v15 = vpop.f32.mrb[6].mxu0 }
 0x101   :  { %v1208_v16 = vadd.f32 %v1207_v14, %v1206_v11  ;;  %v1209_v17 = vpop.f32.mrb[6].mxu1  ;;  %v1170_v18 = vpop.f32.mrb[7].mxu0 }
 0x102   :  { %v1171_v19 = vadd.f32 %v1170_v18, %v1169_v15  ;;  %v1210_v20 = vpop.f32.mrb[7].mxu1 }
 0x103   :  { %v807_v21 = vadd.f32 %v1208_v16, %v1168_v13  ;;  %v1211_v22 = vadd.f32 %v1210_v20, %v1209_v17 }
 0x105   :  { %v1667_v23 = vadd.f32 %v1211_v22, %v1171_v19 }
 0x106   :  { %v1172_v24 = vpop.f32.mrb[8].mxu0 }
 0x107   :  { %v1212_v25 = vpop.f32.mrb[8].mxu1  ;;  %v1173_v26 = vpop.f32.mrb[9].mxu0 }
 0x108   :  { %v1213_v27 = vpop.f32.mrb[9].mxu1  ;;  %v1174_v28 = vadd.f32 %v1173_v26, %v1172_v24  ;;  %v1175_v30 = vpop.f32.mrb[10].mxu0 }
 0x109   :  { %v1214_v29 = vadd.f32 %v1213_v27, %v1212_v25  ;;  %v1215_v31 = vpop.f32.mrb[10].mxu1  ;;  %v1176_v32 = vpop.f32.mrb[11].mxu0 }
 0x10a   :  { %v1216_v33 = vpop.f32.mrb[11].mxu1  ;;  %v1177_v35 = vadd.f32 %v1176_v32, %v1175_v30 }
 0x10b   :  { %v1669_v34 = vadd.f32 %v1214_v29, %v1174_v28  ;;  %v1217_v36 = vadd.f32 %v1216_v33, %v1215_v31 }
 0x10d   :  { %v1671_v37 = vadd.f32 %v1217_v36, %v1177_v35 }
 0x10e   :  { %v1178_v38 = vpop.f32.mrb[12].mxu0 }
 0x10f   :  { %v1218_v39 = vpop.f32.mrb[12].mxu1  ;;  %v1179_v40 = vpop.f32.mrb[13].mxu0 }
 0x110   :  { %v1219_v41 = vpop.f32.mrb[13].mxu1  ;;  %v1180_v42 = vadd.f32 %v1179_v40, %v1178_v38  ;;  %v1181_v44 = vpop.f32.mrb[14].mxu0 }
 0x111   :  { %v1220_v43 = vadd.f32 %v1219_v41, %v1218_v39  ;;  %v1221_v45 = vpop.f32.mrb[14].mxu1  ;;  %v1182_v46 = vpop.f32.mrb[15].mxu0 }
 0x112   :  { %v1222_v47 = vpop.f32.mrb[15].mxu1 }
 0x113   :  { %v1673_v48 = vadd.f32 %v1220_v43, %v1180_v42 }
 0x116   :  { %v1240_v49 = vpop.f32.mrb[16].mxu0 }
 0x117   :  { %v1280_v50 = vpop.f32.mrb[16].mxu1  ;;  %v1241_v51 = vpop.f32.mrb[17].mxu0 }
 0x118   :  { %v1242_v52 = vadd.f32 %v1241_v51, %v1240_v49  ;;  %v1281_v53 = vpop.f32.mrb[17].mxu1  ;;  %v1243_v54 = vpop.f32.mrb[18].mxu0 }
 0x119   :  { %v1282_v55 = vadd.f32 %v1281_v53, %v1280_v50  ;;  %v1283_v56 = vpop.f32.mrb[18].mxu1  ;;  %v1244_v57 = vpop.f32.mrb[19].mxu0 }
 0x11a   :  { %v863_v58 = vadd.f32 %v1242_v52, %v799_v7  ;;  %v1245_v59 = vadd.f32 %v1244_v57, %v1243_v54  ;;  %v1284_v60 = vpop.f32.mrb[19].mxu1 }
 0x11b   :  { %v1285_v61 = vadd.f32 %v1284_v60, %v1283_v56 }
 0x11c   :  { %v927_v62 = vadd.f32 %v1282_v55, %v863_v58  ;;  %v866_v63 = vadd.f32 %v1245_v59, %v802_v9 }
 0x11e   :  { %v963_v0 = vmul.f32 0.2, %v927_v62  ;;  %v930_v1 = vadd.f32 %v1285_v61, %v866_v63  ;;  %v1246_v2 = vpop.f32.mrb[20].mxu0  ;;  %vm956_vm0 = vcmp.ge.f32.partialorder %v927_v62, 0.0 }
 0x11f   :  { %v1286_v3 = vpop.f32.mrb[20].mxu1  ;;  %v1247_v4 = vpop.f32.mrb[21].mxu0 }
 0x120   :  { %vm957_vm1 = vcmp.ge.f32.partialorder %v930_v1, 0.0  ;;  %v964_v5 = vmul.f32 0.2, %v930_v1  ;;  %v1248_v6 = vadd.f32 %v1247_v4, %v1246_v2  ;;  %v1287_v8 = vpop.f32.mrb[21].mxu1  ;;  %v1249_v10 = vpop.f32.mrb[22].mxu0  ;;  %v970_v7 = vsel %vm956_vm0, %v927_v62, %v963_v0 }
 0x121   :  { %v1288_v11 = vadd.f32 %v1287_v8, %v1286_v3  ;;  %v1289_v12 = vpop.f32.mrb[22].mxu1  ;;  %v1250_v13 = vpop.f32.mrb[23].mxu0 }
 0x122   :  { %v971_v14 = vsel %vm957_vm1, %v930_v1, %v964_v5  ;;  %v871_v15 = vadd.f32 %v1248_v6, %v807_v21  ;;  %v1251_v16 = vadd.f32 %v1250_v13, %v1249_v10  ;;  %v1290_v17 = vpop.f32.mrb[23].mxu1 }
 0x123   :  { %v1130_v9 = vpack.c.bf16 %v971_v14, %v970_v7  ;;  %v1291_v18 = vadd.f32 %v1290_v17, %v1289_v12 }
 0x124   :  { %v935_v19 = vadd.f32 %v1288_v11, %v871_v15  ;;  %v874_v20 = vadd.f32 %v1251_v16, %v1667_v23 }
 0x125   :  { %1131 = vst [vmem:[%s1693_s2] sm:$0xff] %v1130_v9  }
 0x126   :  { %v965_v22 = vmul.f32 0.2, %v935_v19  ;;  %v938_v24 = vadd.f32 %v1291_v18, %v874_v20  ;;  %v1252_v25 = vpop.f32.mrb[24].mxu0  ;;  %vm958_vm2 = vcmp.ge.f32.partialorder %v935_v19, 0.0 }
 0x127   :  { %v1292_v26 = vpop.f32.mrb[24].mxu1  ;;  %v1253_v27 = vpop.f32.mrb[25].mxu0 }
 0x128   :  { %vm959_vm3 = vcmp.ge.f32.partialorder %v938_v24, 0.0  ;;  %v966_v28 = vmul.f32 0.2, %v938_v24  ;;  %v1254_v21 = vadd.f32 %v1253_v27, %v1252_v25  ;;  %v1293_v29 = vpop.f32.mrb[25].mxu1  ;;  %v1255_v30 = vpop.f32.mrb[26].mxu0  ;;  %v972_v35 = vsel %vm958_vm2, %v935_v19, %v965_v22 }
 0x129   :  { %v1294_v31 = vadd.f32 %v1293_v29, %v1292_v26  ;;  %v1295_v32 = vpop.f32.mrb[26].mxu1  ;;  %v1256_v33 = vpop.f32.mrb[27].mxu0 }
 0x12a   :  { %v973_v23 = vsel %vm959_vm3, %v938_v24, %v966_v28  ;;  %v879_v36 = vadd.f32 %v1254_v21, %v1669_v34  ;;  %v1257_v38 = vadd.f32 %v1256_v33, %v1255_v30  ;;  %v1296_v39 = vpop.f32.mrb[27].mxu1 }
 0x12b   :  { %v1135_v40 = vpack.c.bf16 %v973_v23, %v972_v35  ;;  %v1297_v41 = vadd.f32 %v1296_v39, %v1295_v32 }
 0x12c   :  { %v943_v42 = vadd.f32 %v1294_v31, %v879_v36  ;;  %v882_v43 = vadd.f32 %v1257_v38, %v1671_v37 }
 0x12d   :  { %1142 = vst [vmem:[%s1693_s2 + $0x8] sm:$0xff] %v1135_v40  }
 0x12e   :  { %v967_v44 = vmul.f32 0.2, %v943_v42  ;;  %v946_v45 = vadd.f32 %v1297_v41, %v882_v43  ;;  %v1258_v46 = vpop.f32.mrb[28].mxu0  ;;  %vm960_vm4 = vcmp.ge.f32.partialorder %v943_v42, 0.0 }
 0x12f   :  { %v1298_v47 = vpop.f32.mrb[28].mxu1  ;;  %v1259_v49 = vpop.f32.mrb[29].mxu0 }
 0x130   :  { %vm961_vm5 = vcmp.ge.f32.partialorder %v946_v45, 0.0  ;;  %v968_v50 = vmul.f32 0.2, %v946_v45  ;;  %v1260_v34 = vadd.f32 %v1259_v49, %v1258_v46  ;;  %v1299_v51 = vpop.f32.mrb[29].mxu1  ;;  %v1261_v52 = vpop.f32.mrb[30].mxu0  ;;  %v974_v56 = vsel %vm960_vm4, %v943_v42, %v967_v44 }
 0x131   :  { %v1300_v53 = vadd.f32 %v1299_v51, %v1298_v47  ;;  %v1301_v54 = vpop.f32.mrb[30].mxu1  ;;  %v1262_v55 = vpop.f32.mrb[31].mxu0 }
 0x132   :  { %v975_v37 = vsel %vm961_vm5, %v946_v45, %v968_v50  ;;  %v887_v57 = vadd.f32 %v1260_v34, %v1673_v48  ;;  %v1302_v58 = vpop.f32.mrb[31].mxu1 }
 0x133   :  { %v1140_v59 = vpack.c.bf16 %v975_v37, %v974_v56 }
 0x134   :  { %v951_v60 = vadd.f32 %v1300_v53, %v887_v57 }
 0x135   :  { %1143 = vst [vmem:[%s1693_s2 + $0x10] sm:$0xff] %v1140_v59  }
 0x136   :  { %vm962_vm6 = vcmp.ge.f32.partialorder %v951_v60, 0.0  ;;  %v969_v61 = vmul.f32 0.2, %v951_v60 }
 0x138   :  { %v976_v62 = vsel %vm962_vm6, %v951_v60, %v969_v61 }
 0x139   :  { %v1126_v63 = vpack.c.bf16 %v976_v62, %v976_v62 }
 0x13b   :  { %1012 = vst [vmem:[%s1693_s2 + $0x18] sm:$0x1] %v1126_v63 }

// kernel: boundary_ent_discriminator.7
= control target key start
LH: loop header
LB: loop body
LE: loop exit
PB: predicated region body
PF: predicated region fallthrough
CT: control target
= control target key end

     0   :  { %s3621_s9 = smov 0   ;;  %s3623_s10 = smov 0   ;;  %s4439_s0 = inlined_call_operand.vmem [shape: bf16[18,2048], index: 0, kind: input, shape index: {}]   ;;  %s4440_s1 = inlined_call_operand.vmem [shape: bf16[2048,256], index: 1, kind: input, shape index: {}]   ;;  %s4441_s2 = inlined_call_operand.vmem [shape: bf16[18,256], index: 2, kind: output, shape index: {}]  }
   0x1   :  { %s3625_s11 = smov 0   ;;  %s3627_s12 = smov 0  }
   0x2   :  { %s3629_s13 = smov 0  }
   0x3 LB: > { %s21_s14 = sadd.s32 1, %s3600_s12  ;;  %s2974_s15 = sadd.s32 4294967295, %s3604_s13   ;;  %s3604_s13 = sphi %s3629_s13, %s12_s13   ;;  %s3600_s12 = sphi %s3627_s12, %s4446_s12   ;;  %s3596_s11 = sphi %s3625_s11, %s4445_s11   ;;  %s3592_s10 = sphi %s3623_s10, %s4444_s10   ;;  %s3588_s9 = sphi %s3621_s9, %s4443_s9  }
   0x4   : > { %p22_p0 = scmp.ge.s32.totalorder %s21_s14, 2  ;;  %p64_p1 = scmp.ne.s32.totalorder %s3592_s10, %s3588_s9 }
   0x5   : > { %p65_p2 = scmp.eq.s32.totalorder %s3604_s13, 0  ;;  %p96_p4 = scmp.eq.s32.totalorder %s2974_s15, 1 }
   0x6   : > { %s4448_s14 = smov (%p22_p0, %s21_s14), 0  ;;  %s57_s17 = sadd.s32 1, %s3592_s10 }
   0x7   : > { %p66_p3 = por %p65_p2, %p64_p1  ;;  %s54_s16 = ssub.s32 %s3600_s12, %s4448_s14 }
   0x8   : > { %p55_p5 = scmp.eq.s32.totalorder %s54_s16, 0  ;;  %p3656_p6 = por %p96_p4, %p64_p1 }
   0x9   : > { %p2978_p7 = scmp.ge.s32.totalorder %s3604_s13, 2 }
   0xa   : > { %s3661_s19 = scalar_select %p55_p5, %s3592_s10, %s57_s17  }
   0xb   : > { %128 = sbr.rel (%p2978_p7) target bundleno = 192 (0xc0), region = 20 }
  0x12   : > { %131 = sbr.rel (!%p66_p3) target bundleno = 192 (0xc0), region = 24  ;;  %s133_s20 = sand.u32 (%p66_p3), 1, %s3592_s10  }
  0x13   : > { %s2980_s21 = sshll.u32 (%p66_p3), %s3600_s12, 2  ;;  %s2979_s22 = sshll.u32 (%p66_p3), %s133_s20, 10 }
  0x14   : > { %s3669_s25 = scalar_lea.vmem (%p66_p3), %s4440_s1, %s2980_s21  ;;  %s3673_s26 = scalar_lea.vmem (%p66_p3), [#allocation2], %s2979_s22 }
  0x15   : > { %v153_v0 = vld [vmem:[%s3669_s25] sm:$0xf] (%p66_p3)  ;;  %v155_v1 = vld [vmem:[%s3669_s25 + $0x8] sm:$0xf] (%p66_p3)  ;;  %v157_v2 = vld [vmem:[%s3669_s25 + $0x10] sm:$0xf] (%p66_p3) }
  0x16   : > { %154 = vst [vmem:[%s3673_s26] sm:$0xf] (%p66_p3), %v153_v0  ;;  %156 = vst [vmem:[%s3673_s26 + $0x4] sm:$0xf] (%p66_p3), %v155_v1  ;;  %v159_v3 = vld [vmem:[%s3669_s25 + $0x18] sm:$0xf] (%p66_p3) }
  0x17   : > { %v161_v4 = vld [vmem:[%s3669_s25 + $0x20] sm:$0xf] (%p66_p3)  ;;  %158 = vst [vmem:[%s3673_s26 + $0x8] sm:$0xf] (%p66_p3), %v157_v2  ;;  %160 = vst [vmem:[%s3673_s26 + $0xc] sm:$0xf] (%p66_p3), %v159_v3 }
  0x18   : > { %162 = vst [vmem:[%s3673_s26 + $0x10] sm:$0xf] (%p66_p3), %v161_v4  ;;  %v163_v5 = vld [vmem:[%s3669_s25 + $0x28] sm:$0xf] (%p66_p3)  ;;  %v165_v6 = vld [vmem:[%s3669_s25 + $0x30] sm:$0xf] (%p66_p3) }
  0x19   : > { %v167_v7 = vld [vmem:[%s3669_s25 + $0x38] sm:$0xf]  ;;  %164 = vst [vmem:[%s3673_s26 + $0x14] sm:$0xf] %v163_v5  ;;  %166 = vst [vmem:[%s3673_s26 + $0x18] sm:$0xf] %v165_v6 }
  0x1a   : > { %168 = vst [vmem:[%s3673_s26 + $0x1c] sm:$0xf] %v167_v7  ;;  %v169_v8 = vld [vmem:[%s3669_s25 + $0x40] sm:$0xf]  ;;  %v171_v9 = vld [vmem:[%s3669_s25 + $0x48] sm:$0xf] }
  0x1b   : > { %v173_v10 = vld [vmem:[%s3669_s25 + $0x50] sm:$0xf]  ;;  %170 = vst [vmem:[%s3673_s26 + $0x20] sm:$0xf] %v169_v8  ;;  %172 = vst [vmem:[%s3673_s26 + $0x24] sm:$0xf] %v171_v9 }
  0x1c   : > { %174 = vst [vmem:[%s3673_s26 + $0x28] sm:$0xf] %v173_v10  ;;  %v175_v11 = vld [vmem:[%s3669_s25 + $0x58] sm:$0xf]  ;;  %v177_v12 = vld [vmem:[%s3669_s25 + $0x60] sm:$0xf] }
  0x1d   : > { %v179_v13 = vld [vmem:[%s3669_s25 + $0x68] sm:$0xf]  ;;  %176 = vst [vmem:[%s3673_s26 + $0x2c] sm:$0xf] %v175_v11  ;;  %178 = vst [vmem:[%s3673_s26 + $0x30] sm:$0xf] %v177_v12 }
  0x1e   : > { %180 = vst [vmem:[%s3673_s26 + $0x34] sm:$0xf] %v179_v13  ;;  %v181_v14 = vld [vmem:[%s3669_s25 + $0x70] sm:$0xf]  ;;  %v183_v15 = vld [vmem:[%s3669_s25 + $0x78] sm:$0xf] }
  0x1f   : > { %v185_v16 = vld [vmem:[%s3669_s25 + $0x80] sm:$0xf]  ;;  %182 = vst [vmem:[%s3673_s26 + $0x38] sm:$0xf] %v181_v14  ;;  %184 = vst [vmem:[%s3673_s26 + $0x3c] sm:$0xf] %v183_v15 }
  0x20   : > { %186 = vst [vmem:[%s3673_s26 + $0x40] sm:$0xf] %v185_v16  ;;  %v187_v17 = vld [vmem:[%s3669_s25 + $0x88] sm:$0xf]  ;;  %v189_v18 = vld [vmem:[%s3669_s25 + $0x90] sm:$0xf] }
  0x21   : > { %v191_v19 = vld [vmem:[%s3669_s25 + $0x98] sm:$0xf]  ;;  %188 = vst [vmem:[%s3673_s26 + $0x44] sm:$0xf] %v187_v17  ;;  %190 = vst [vmem:[%s3673_s26 + $0x48] sm:$0xf] %v189_v18 }
  0x22   : > { %192 = vst [vmem:[%s3673_s26 + $0x4c] sm:$0xf] %v191_v19  ;;  %v193_v20 = vld [vmem:[%s3669_s25 + $0xa0] sm:$0xf]  ;;  %v195_v21 = vld [vmem:[%s3669_s25 + $0xa8] sm:$0xf] }
  0x23   : > { %v197_v22 = vld [vmem:[%s3669_s25 + $0xb0] sm:$0xf]  ;;  %194 = vst [vmem:[%s3673_s26 + $0x50] sm:$0xf] %v193_v20  ;;  %196 = vst [vmem:[%s3673_s26 + $0x54] sm:$0xf] %v195_v21 }
  0x24   : > { %198 = vst [vmem:[%s3673_s26 + $0x58] sm:$0xf] %v197_v22  ;;  %v199_v23 = vld [vmem:[%s3669_s25 + $0xb8] sm:$0xf]  ;;  %v201_v24 = vld [vmem:[%s3669_s25 + $0xc0] sm:$0xf] }
  0x25   : > { %v203_v25 = vld [vmem:[%s3669_s25 + $0xc8] sm:$0xf]  ;;  %200 = vst [vmem:[%s3673_s26 + $0x5c] sm:$0xf] %v199_v23  ;;  %202 = vst [vmem:[%s3673_s26 + $0x60] sm:$0xf] %v201_v24 }
  0x26   : > { %204 = vst [vmem:[%s3673_s26 + $0x64] sm:$0xf] %v203_v25  ;;  %v205_v26 = vld [vmem:[%s3669_s25 + $0xd0] sm:$0xf]  ;;  %v207_v27 = vld [vmem:[%s3669_s25 + $0xd8] sm:$0xf] }
  0x27   : > { %v209_v28 = vld [vmem:[%s3669_s25 + $0xe0] sm:$0xf]  ;;  %206 = vst [vmem:[%s3673_s26 + $0x68] sm:$0xf] %v205_v26  ;;  %208 = vst [vmem:[%s3673_s26 + $0x6c] sm:$0xf] %v207_v27 }
  0x28   : > { %210 = vst [vmem:[%s3673_s26 + $0x70] sm:$0xf] %v209_v28  ;;  %v211_v29 = vld [vmem:[%s3669_s25 + $0xe8] sm:$0xf]  ;;  %v213_v30 = vld [vmem:[%s3669_s25 + $0xf0] sm:$0xf] }
  0x29   : > { %v215_v31 = vld [vmem:[%s3669_s25 + $0xf8] sm:$0xf]  ;;  %212 = vst [vmem:[%s3673_s26 + $0x74] sm:$0xf] %v211_v29  ;;  %214 = vst [vmem:[%s3673_s26 + $0x78] sm:$0xf] %v213_v30 }
  0x2a   : > { %216 = vst [vmem:[%s3673_s26 + $0x7c] sm:$0xf] %v215_v31  ;;  %v217_v32 = vld [vmem:[%s3669_s25 + $0x100] sm:$0xf]  ;;  %v219_v33 = vld [vmem:[%s3669_s25 + $0x108] sm:$0xf] }
  0x2b   : > { %v221_v34 = vld [vmem:[%s3669_s25 + $0x110] sm:$0xf]  ;;  %218 = vst [vmem:[%s3673_s26 + $0x80] sm:$0xf] %v217_v32  ;;  %220 = vst [vmem:[%s3673_s26 + $0x84] sm:$0xf] %v219_v33 }
  0x2c   : > { %222 = vst [vmem:[%s3673_s26 + $0x88] sm:$0xf] %v221_v34  ;;  %v223_v35 = vld [vmem:[%s3669_s25 + $0x118] sm:$0xf]  ;;  %v225_v36 = vld [vmem:[%s3669_s25 + $0x120] sm:$0xf] }
  0x2d   : > { %v227_v37 = vld [vmem:[%s3669_s25 + $0x128] sm:$0xf]  ;;  %224 = vst [vmem:[%s3673_s26 + $0x8c] sm:$0xf] %v223_v35  ;;  %226 = vst [vmem:[%s3673_s26 + $0x90] sm:$0xf] %v225_v36 }
  0x2e   : > { %228 = vst [vmem:[%s3673_s26 + $0x94] sm:$0xf] %v227_v37  ;;  %v229_v38 = vld [vmem:[%s3669_s25 + $0x130] sm:$0xf]  ;;  %v231_v39 = vld [vmem:[%s3669_s25 + $0x138] sm:$0xf] }
  0x2f   : > { %v233_v40 = vld [vmem:[%s3669_s25 + $0x140] sm:$0xf]  ;;  %230 = vst [vmem:[%s3673_s26 + $0x98] sm:$0xf] %v229_v38  ;;  %232 = vst [vmem:[%s3673_s26 + $0x9c] sm:$0xf] %v231_v39 }
  0x30   : > { %234 = vst [vmem:[%s3673_s26 + $0xa0] sm:$0xf] %v233_v40  ;;  %v235_v41 = vld [vmem:[%s3669_s25 + $0x148] sm:$0xf]  ;;  %v237_v42 = vld [vmem:[%s3669_s25 + $0x150] sm:$0xf] }
  0x31   : > { %v239_v43 = vld [vmem:[%s3669_s25 + $0x158] sm:$0xf]  ;;  %236 = vst [vmem:[%s3673_s26 + $0xa4] sm:$0xf] %v235_v41  ;;  %238 = vst [vmem:[%s3673_s26 + $0xa8] sm:$0xf] %v237_v42 }
  0x32   : > { %240 = vst [vmem:[%s3673_s26 + $0xac] sm:$0xf] %v239_v43  ;;  %v241_v44 = vld [vmem:[%s3669_s25 + $0x160] sm:$0xf]  ;;  %v243_v45 = vld [vmem:[%s3669_s25 + $0x168] sm:$0xf] }
  0x33   : > { %v245_v46 = vld [vmem:[%s3669_s25 + $0x170] sm:$0xf]  ;;  %242 = vst [vmem:[%s3673_s26 + $0xb0] sm:$0xf] %v241_v44  ;;  %244 = vst [vmem:[%s3673_s26 + $0xb4] sm:$0xf] %v243_v45 }
  0x34   : > { %246 = vst [vmem:[%s3673_s26 + $0xb8] sm:$0xf] %v245_v46  ;;  %v247_v47 = vld [vmem:[%s3669_s25 + $0x178] sm:$0xf]  ;;  %v249_v48 = vld [vmem:[%s3669_s25 + $0x180] sm:$0xf] }
  0x35   : > { %v251_v49 = vld [vmem:[%s3669_s25 + $0x188] sm:$0xf]  ;;  %248 = vst [vmem:[%s3673_s26 + $0xbc] sm:$0xf] %v247_v47  ;;  %250 = vst [vmem:[%s3673_s26 + $0xc0] sm:$0xf] %v249_v48 }
  0x36   : > { %252 = vst [vmem:[%s3673_s26 + $0xc4] sm:$0xf] %v251_v49  ;;  %v253_v50 = vld [vmem:[%s3669_s25 + $0x190] sm:$0xf]  ;;  %v255_v51 = vld [vmem:[%s3669_s25 + $0x198] sm:$0xf] }
  0x37   : > { %v257_v52 = vld [vmem:[%s3669_s25 + $0x1a0] sm:$0xf]  ;;  %254 = vst [vmem:[%s3673_s26 + $0xc8] sm:$0xf] %v253_v50  ;;  %256 = vst [vmem:[%s3673_s26 + $0xcc] sm:$0xf] %v255_v51 }
  0x38   : > { %258 = vst [vmem:[%s3673_s26 + $0xd0] sm:$0xf] %v257_v52  ;;  %v259_v53 = vld [vmem:[%s3669_s25 + $0x1a8] sm:$0xf]  ;;  %v261_v54 = vld [vmem:[%s3669_s25 + $0x1b0] sm:$0xf] }
  0x39   : > { %v263_v55 = vld [vmem:[%s3669_s25 + $0x1b8] sm:$0xf]  ;;  %260 = vst [vmem:[%s3673_s26 + $0xd4] sm:$0xf] %v259_v53  ;;  %262 = vst [vmem:[%s3673_s26 + $0xd8] sm:$0xf] %v261_v54 }
  0x3a   : > { %264 = vst [vmem:[%s3673_s26 + $0xdc] sm:$0xf] %v263_v55  ;;  %v265_v56 = vld [vmem:[%s3669_s25 + $0x1c0] sm:$0xf]  ;;  %v267_v57 = vld [vmem:[%s3669_s25 + $0x1c8] sm:$0xf] }
  0x3b   : > { %v269_v58 = vld [vmem:[%s3669_s25 + $0x1d0] sm:$0xf]  ;;  %266 = vst [vmem:[%s3673_s26 + $0xe0] sm:$0xf] %v265_v56  ;;  %268 = vst [vmem:[%s3673_s26 + $0xe4] sm:$0xf] %v267_v57 }
  0x3c   : > { %270 = vst [vmem:[%s3673_s26 + $0xe8] sm:$0xf] %v269_v58  ;;  %v271_v59 = vld [vmem:[%s3669_s25 + $0x1d8] sm:$0xf]  ;;  %v273_v60 = vld [vmem:[%s3669_s25 + $0x1e0] sm:$0xf] }
  0x3d   : > { %v275_v61 = vld [vmem:[%s3669_s25 + $0x1e8] sm:$0xf]  ;;  %272 = vst [vmem:[%s3673_s26 + $0xec] sm:$0xf] %v271_v59  ;;  %274 = vst [vmem:[%s3673_s26 + $0xf0] sm:$0xf] %v273_v60 }
  0x3e   : > { %276 = vst [vmem:[%s3673_s26 + $0xf4] sm:$0xf] %v275_v61  ;;  %v277_v62 = vld [vmem:[%s3669_s25 + $0x1f0] sm:$0xf]  ;;  %v279_v63 = vld [vmem:[%s3669_s25 + $0x1f8] sm:$0xf] }
  0x3f   : > { %v281_v0 = vld [vmem:[%s3669_s25 + $0x200] sm:$0xf]  ;;  %278 = vst [vmem:[%s3673_s26 + $0xf8] sm:$0xf] %v277_v62  ;;  %280 = vst [vmem:[%s3673_s26 + $0xfc] sm:$0xf] %v279_v63 }
  0x40   : > { %282 = vst [vmem:[%s3673_s26 + $0x100] sm:$0xf] %v281_v0  ;;  %v283_v1 = vld [vmem:[%s3669_s25 + $0x208] sm:$0xf]  ;;  %v285_v2 = vld [vmem:[%s3669_s25 + $0x210] sm:$0xf] }
  0x41   : > { %v287_v3 = vld [vmem:[%s3669_s25 + $0x218] sm:$0xf]  ;;  %284 = vst [vmem:[%s3673_s26 + $0x104] sm:$0xf] %v283_v1  ;;  %286 = vst [vmem:[%s3673_s26 + $0x108] sm:$0xf] %v285_v2 }
  0x42   : > { %288 = vst [vmem:[%s3673_s26 + $0x10c] sm:$0xf] %v287_v3  ;;  %v289_v4 = vld [vmem:[%s3669_s25 + $0x220] sm:$0xf]  ;;  %v291_v5 = vld [vmem:[%s3669_s25 + $0x228] sm:$0xf] }
  0x43   : > { %v293_v6 = vld [vmem:[%s3669_s25 + $0x230] sm:$0xf]  ;;  %290 = vst [vmem:[%s3673_s26 + $0x110] sm:$0xf] %v289_v4  ;;  %292 = vst [vmem:[%s3673_s26 + $0x114] sm:$0xf] %v291_v5 }
  0x44   : > { %294 = vst [vmem:[%s3673_s26 + $0x118] sm:$0xf] %v293_v6  ;;  %v295_v7 = vld [vmem:[%s3669_s25 + $0x238] sm:$0xf]  ;;  %v297_v8 = vld [vmem:[%s3669_s25 + $0x240] sm:$0xf] }
  0x45   : > { %v299_v9 = vld [vmem:[%s3669_s25 + $0x248] sm:$0xf]  ;;  %296 = vst [vmem:[%s3673_s26 + $0x11c] sm:$0xf] %v295_v7  ;;  %298 = vst [vmem:[%s3673_s26 + $0x120] sm:$0xf] %v297_v8 }
  0x46   : > { %300 = vst [vmem:[%s3673_s26 + $0x124] sm:$0xf] %v299_v9  ;;  %v301_v10 = vld [vmem:[%s3669_s25 + $0x250] sm:$0xf]  ;;  %v303_v11 = vld [vmem:[%s3669_s25 + $0x258] sm:$0xf] }
  0x47   : > { %v305_v12 = vld [vmem:[%s3669_s25 + $0x260] sm:$0xf]  ;;  %302 = vst [vmem:[%s3673_s26 + $0x128] sm:$0xf] %v301_v10  ;;  %304 = vst [vmem:[%s3673_s26 + $0x12c] sm:$0xf] %v303_v11 }
  0x48   : > { %306 = vst [vmem:[%s3673_s26 + $0x130] sm:$0xf] %v305_v12  ;;  %v307_v13 = vld [vmem:[%s3669_s25 + $0x268] sm:$0xf]  ;;  %v309_v14 = vld [vmem:[%s3669_s25 + $0x270] sm:$0xf] }
  0x49   : > { %v311_v15 = vld [vmem:[%s3669_s25 + $0x278] sm:$0xf]  ;;  %308 = vst [vmem:[%s3673_s26 + $0x134] sm:$0xf] %v307_v13  ;;  %310 = vst [vmem:[%s3673_s26 + $0x138] sm:$0xf] %v309_v14 }
  0x4a   : > { %312 = vst [vmem:[%s3673_s26 + $0x13c] sm:$0xf] %v311_v15  ;;  %v313_v16 = vld [vmem:[%s3669_s25 + $0x280] sm:$0xf]  ;;  %v315_v17 = vld [vmem:[%s3669_s25 + $0x288] sm:$0xf] }
  0x4b   : > { %v317_v18 = vld [vmem:[%s3669_s25 + $0x290] sm:$0xf]  ;;  %314 = vst [vmem:[%s3673_s26 + $0x140] sm:$0xf] %v313_v16  ;;  %316 = vst [vmem:[%s3673_s26 + $0x144] sm:$0xf] %v315_v17 }
  0x4c   : > { %318 = vst [vmem:[%s3673_s26 + $0x148] sm:$0xf] %v317_v18  ;;  %v319_v19 = vld [vmem:[%s3669_s25 + $0x298] sm:$0xf]  ;;  %v321_v20 = vld [vmem:[%s3669_s25 + $0x2a0] sm:$0xf] }
  0x4d   : > { %v323_v21 = vld [vmem:[%s3669_s25 + $0x2a8] sm:$0xf]  ;;  %320 = vst [vmem:[%s3673_s26 + $0x14c] sm:$0xf] %v319_v19  ;;  %322 = vst [vmem:[%s3673_s26 + $0x150] sm:$0xf] %v321_v20 }
  0x4e   : > { %324 = vst [vmem:[%s3673_s26 + $0x154] sm:$0xf] %v323_v21  ;;  %v325_v22 = vld [vmem:[%s3669_s25 + $0x2b0] sm:$0xf]  ;;  %v327_v23 = vld [vmem:[%s3669_s25 + $0x2b8] sm:$0xf] }
  0x4f   : > { %v329_v24 = vld [vmem:[%s3669_s25 + $0x2c0] sm:$0xf]  ;;  %326 = vst [vmem:[%s3673_s26 + $0x158] sm:$0xf] %v325_v22  ;;  %328 = vst [vmem:[%s3673_s26 + $0x15c] sm:$0xf] %v327_v23 }
  0x50   : > { %330 = vst [vmem:[%s3673_s26 + $0x160] sm:$0xf] %v329_v24  ;;  %v331_v25 = vld [vmem:[%s3669_s25 + $0x2c8] sm:$0xf]  ;;  %v333_v26 = vld [vmem:[%s3669_s25 + $0x2d0] sm:$0xf] }
  0x51   : > { %v335_v27 = vld [vmem:[%s3669_s25 + $0x2d8] sm:$0xf]  ;;  %332 = vst [vmem:[%s3673_s26 + $0x164] sm:$0xf] %v331_v25  ;;  %334 = vst [vmem:[%s3673_s26 + $0x168] sm:$0xf] %v333_v26 }
  0x52   : > { %336 = vst [vmem:[%s3673_s26 + $0x16c] sm:$0xf] %v335_v27  ;;  %v337_v28 = vld [vmem:[%s3669_s25 + $0x2e0] sm:$0xf]  ;;  %v339_v29 = vld [vmem:[%s3669_s25 + $0x2e8] sm:$0xf] }
  0x53   : > { %v341_v30 = vld [vmem:[%s3669_s25 + $0x2f0] sm:$0xf]  ;;  %338 = vst [vmem:[%s3673_s26 + $0x170] sm:$0xf] %v337_v28  ;;  %340 = vst [vmem:[%s3673_s26 + $0x174] sm:$0xf] %v339_v29 }
  0x54   : > { %342 = vst [vmem:[%s3673_s26 + $0x178] sm:$0xf] %v341_v30  ;;  %v343_v31 = vld [vmem:[%s3669_s25 + $0x2f8] sm:$0xf]  ;;  %v345_v32 = vld [vmem:[%s3669_s25 + $0x300] sm:$0xf] }
  0x55   : > { %v347_v33 = vld [vmem:[%s3669_s25 + $0x308] sm:$0xf]  ;;  %344 = vst [vmem:[%s3673_s26 + $0x17c] sm:$0xf] %v343_v31  ;;  %346 = vst [vmem:[%s3673_s26 + $0x180] sm:$0xf] %v345_v32 }
  0x56   : > { %348 = vst [vmem:[%s3673_s26 + $0x184] sm:$0xf] %v347_v33  ;;  %v349_v34 = vld [vmem:[%s3669_s25 + $0x310] sm:$0xf]  ;;  %v351_v35 = vld [vmem:[%s3669_s25 + $0x318] sm:$0xf] }
  0x57   : > { %v353_v36 = vld [vmem:[%s3669_s25 + $0x320] sm:$0xf]  ;;  %350 = vst [vmem:[%s3673_s26 + $0x188] sm:$0xf] %v349_v34  ;;  %352 = vst [vmem:[%s3673_s26 + $0x18c] sm:$0xf] %v351_v35 }
  0x58   : > { %354 = vst [vmem:[%s3673_s26 + $0x190] sm:$0xf] %v353_v36  ;;  %v355_v37 = vld [vmem:[%s3669_s25 + $0x328] sm:$0xf]  ;;  %v357_v38 = vld [vmem:[%s3669_s25 + $0x330] sm:$0xf] }
  0x59   : > { %v359_v39 = vld [vmem:[%s3669_s25 + $0x338] sm:$0xf]  ;;  %356 = vst [vmem:[%s3673_s26 + $0x194] sm:$0xf] %v355_v37  ;;  %358 = vst [vmem:[%s3673_s26 + $0x198] sm:$0xf] %v357_v38 }
  0x5a   : > { %360 = vst [vmem:[%s3673_s26 + $0x19c] sm:$0xf] %v359_v39  ;;  %v361_v40 = vld [vmem:[%s3669_s25 + $0x340] sm:$0xf]  ;;  %v363_v41 = vld [vmem:[%s3669_s25 + $0x348] sm:$0xf] }
  0x5b   : > { %v365_v42 = vld [vmem:[%s3669_s25 + $0x350] sm:$0xf]  ;;  %362 = vst [vmem:[%s3673_s26 + $0x1a0] sm:$0xf] %v361_v40  ;;  %364 = vst [vmem:[%s3673_s26 + $0x1a4] sm:$0xf] %v363_v41 }
  0x5c   : > { %366 = vst [vmem:[%s3673_s26 + $0x1a8] sm:$0xf] %v365_v42  ;;  %v367_v43 = vld [vmem:[%s3669_s25 + $0x358] sm:$0xf]  ;;  %v369_v44 = vld [vmem:[%s3669_s25 + $0x360] sm:$0xf] }
  0x5d   : > { %v371_v45 = vld [vmem:[%s3669_s25 + $0x368] sm:$0xf]  ;;  %368 = vst [vmem:[%s3673_s26 + $0x1ac] sm:$0xf] %v367_v43  ;;  %370 = vst [vmem:[%s3673_s26 + $0x1b0] sm:$0xf] %v369_v44 }
  0x5e   : > { %372 = vst [vmem:[%s3673_s26 + $0x1b4] sm:$0xf] %v371_v45  ;;  %v373_v46 = vld [vmem:[%s3669_s25 + $0x370] sm:$0xf]  ;;  %v375_v47 = vld [vmem:[%s3669_s25 + $0x378] sm:$0xf] }
  0x5f   : > { %v377_v48 = vld [vmem:[%s3669_s25 + $0x380] sm:$0xf]  ;;  %374 = vst [vmem:[%s3673_s26 + $0x1b8] sm:$0xf] %v373_v46  ;;  %376 = vst [vmem:[%s3673_s26 + $0x1bc] sm:$0xf] %v375_v47 }
  0x60   : > { %378 = vst [vmem:[%s3673_s26 + $0x1c0] sm:$0xf] %v377_v48  ;;  %v379_v49 = vld [vmem:[%s3669_s25 + $0x388] sm:$0xf]  ;;  %v381_v50 = vld [vmem:[%s3669_s25 + $0x390] sm:$0xf] }
  0x61   : > { %v383_v51 = vld [vmem:[%s3669_s25 + $0x398] sm:$0xf]  ;;  %380 = vst [vmem:[%s3673_s26 + $0x1c4] sm:$0xf] %v379_v49  ;;  %382 = vst [vmem:[%s3673_s26 + $0x1c8] sm:$0xf] %v381_v50 }
  0x62   : > { %384 = vst [vmem:[%s3673_s26 + $0x1cc] sm:$0xf] %v383_v51  ;;  %v385_v52 = vld [vmem:[%s3669_s25 + $0x3a0] sm:$0xf]  ;;  %v387_v53 = vld [vmem:[%s3669_s25 + $0x3a8] sm:$0xf] }
  0x63   : > { %v389_v54 = vld [vmem:[%s3669_s25 + $0x3b0] sm:$0xf]  ;;  %386 = vst [vmem:[%s3673_s26 + $0x1d0] sm:$0xf] %v385_v52  ;;  %388 = vst [vmem:[%s3673_s26 + $0x1d4] sm:$0xf] %v387_v53 }
  0x64   : > { %390 = vst [vmem:[%s3673_s26 + $0x1d8] sm:$0xf] %v389_v54  ;;  %v391_v55 = vld [vmem:[%s3669_s25 + $0x3b8] sm:$0xf]  ;;  %v393_v56 = vld [vmem:[%s3669_s25 + $0x3c0] sm:$0xf] }
  0x65   : > { %v395_v57 = vld [vmem:[%s3669_s25 + $0x3c8] sm:$0xf]  ;;  %392 = vst [vmem:[%s3673_s26 + $0x1dc] sm:$0xf] %v391_v55  ;;  %394 = vst [vmem:[%s3673_s26 + $0x1e0] sm:$0xf] %v393_v56 }
  0x66   : > { %396 = vst [vmem:[%s3673_s26 + $0x1e4] sm:$0xf] %v395_v57  ;;  %v397_v58 = vld [vmem:[%s3669_s25 + $0x3d0] sm:$0xf]  ;;  %v399_v59 = vld [vmem:[%s3669_s25 + $0x3d8] sm:$0xf] }
  0x67   : > { %v401_v60 = vld [vmem:[%s3669_s25 + $0x3e0] sm:$0xf]  ;;  %398 = vst [vmem:[%s3673_s26 + $0x1e8] sm:$0xf] %v397_v58  ;;  %400 = vst [vmem:[%s3673_s26 + $0x1ec] sm:$0xf] %v399_v59 }
  0x68   : > { %402 = vst [vmem:[%s3673_s26 + $0x1f0] sm:$0xf] %v401_v60  ;;  %v403_v61 = vld [vmem:[%s3669_s25 + $0x3e8] sm:$0xf]  ;;  %v405_v62 = vld [vmem:[%s3669_s25 + $0x3f0] sm:$0xf] }
  0x69   : > { %v407_v63 = vld [vmem:[%s3669_s25 + $0x3f8] sm:$0xf]  ;;  %404 = vst [vmem:[%s3673_s26 + $0x1f4] sm:$0xf] %v403_v61  ;;  %406 = vst [vmem:[%s3673_s26 + $0x1f8] sm:$0xf] %v405_v62 }
  0x6a   : > { %408 = vst [vmem:[%s3673_s26 + $0x1fc] sm:$0xf] %v407_v63  ;;  %v409_v0 = vld [vmem:[%s3669_s25 + $0x400] sm:$0xf]  ;;  %v411_v1 = vld [vmem:[%s3669_s25 + $0x408] sm:$0xf] }
  0x6b   : > { %v413_v2 = vld [vmem:[%s3669_s25 + $0x410] sm:$0xf]  ;;  %410 = vst [vmem:[%s3673_s26 + $0x200] sm:$0xf] %v409_v0  ;;  %412 = vst [vmem:[%s3673_s26 + $0x204] sm:$0xf] %v411_v1 }
  0x6c   : > { %414 = vst [vmem:[%s3673_s26 + $0x208] sm:$0xf] %v413_v2  ;;  %v415_v3 = vld [vmem:[%s3669_s25 + $0x418] sm:$0xf]  ;;  %v417_v4 = vld [vmem:[%s3669_s25 + $0x420] sm:$0xf] }
  0x6d   : > { %v419_v5 = vld [vmem:[%s3669_s25 + $0x428] sm:$0xf]  ;;  %416 = vst [vmem:[%s3673_s26 + $0x20c] sm:$0xf] %v415_v3  ;;  %418 = vst [vmem:[%s3673_s26 + $0x210] sm:$0xf] %v417_v4 }
  0x6e   : > { %420 = vst [vmem:[%s3673_s26 + $0x214] sm:$0xf] %v419_v5  ;;  %v421_v6 = vld [vmem:[%s3669_s25 + $0x430] sm:$0xf]  ;;  %v423_v7 = vld [vmem:[%s3669_s25 + $0x438] sm:$0xf] }
  0x6f   : > { %v425_v8 = vld [vmem:[%s3669_s25 + $0x440] sm:$0xf]  ;;  %422 = vst [vmem:[%s3673_s26 + $0x218] sm:$0xf] %v421_v6  ;;  %424 = vst [vmem:[%s3673_s26 + $0x21c] sm:$0xf] %v423_v7 }
  0x70   : > { %426 = vst [vmem:[%s3673_s26 + $0x220] sm:$0xf] %v425_v8  ;;  %v427_v9 = vld [vmem:[%s3669_s25 + $0x448] sm:$0xf]  ;;  %v429_v10 = vld [vmem:[%s3669_s25 + $0x450] sm:$0xf] }
  0x71   : > { %v431_v11 = vld [vmem:[%s3669_s25 + $0x458] sm:$0xf]  ;;  %428 = vst [vmem:[%s3673_s26 + $0x224] sm:$0xf] %v427_v9  ;;  %430 = vst [vmem:[%s3673_s26 + $0x228] sm:$0xf] %v429_v10 }
  0x72   : > { %432 = vst [vmem:[%s3673_s26 + $0x22c] sm:$0xf] %v431_v11  ;;  %v433_v12 = vld [vmem:[%s3669_s25 + $0x460] sm:$0xf]  ;;  %v435_v13 = vld [vmem:[%s3669_s25 + $0x468] sm:$0xf] }
  0x73   : > { %v437_v14 = vld [vmem:[%s3669_s25 + $0x470] sm:$0xf]  ;;  %434 = vst [vmem:[%s3673_s26 + $0x230] sm:$0xf] %v433_v12  ;;  %436 = vst [vmem:[%s3673_s26 + $0x234] sm:$0xf] %v435_v13 }
  0x74   : > { %438 = vst [vmem:[%s3673_s26 + $0x238] sm:$0xf] %v437_v14  ;;  %v439_v15 = vld [vmem:[%s3669_s25 + $0x478] sm:$0xf]  ;;  %v441_v16 = vld [vmem:[%s3669_s25 + $0x480] sm:$0xf] }
  0x75   : > { %v443_v17 = vld [vmem:[%s3669_s25 + $0x488] sm:$0xf]  ;;  %440 = vst [vmem:[%s3673_s26 + $0x23c] sm:$0xf] %v439_v15  ;;  %442 = vst [vmem:[%s3673_s26 + $0x240] sm:$0xf] %v441_v16 }
  0x76   : > { %444 = vst [vmem:[%s3673_s26 + $0x244] sm:$0xf] %v443_v17  ;;  %v445_v18 = vld [vmem:[%s3669_s25 + $0x490] sm:$0xf]  ;;  %v447_v19 = vld [vmem:[%s3669_s25 + $0x498] sm:$0xf] }
  0x77   : > { %v449_v20 = vld [vmem:[%s3669_s25 + $0x4a0] sm:$0xf]  ;;  %446 = vst [vmem:[%s3673_s26 + $0x248] sm:$0xf] %v445_v18  ;;  %448 = vst [vmem:[%s3673_s26 + $0x24c] sm:$0xf] %v447_v19 }
  0x78   : > { %450 = vst [vmem:[%s3673_s26 + $0x250] sm:$0xf] %v449_v20  ;;  %v451_v21 = vld [vmem:[%s3669_s25 + $0x4a8] sm:$0xf]  ;;  %v453_v22 = vld [vmem:[%s3669_s25 + $0x4b0] sm:$0xf] }
  0x79   : > { %v455_v23 = vld [vmem:[%s3669_s25 + $0x4b8] sm:$0xf]  ;;  %452 = vst [vmem:[%s3673_s26 + $0x254] sm:$0xf] %v451_v21  ;;  %454 = vst [vmem:[%s3673_s26 + $0x258] sm:$0xf] %v453_v22 }
  0x7a   : > { %456 = vst [vmem:[%s3673_s26 + $0x25c] sm:$0xf] %v455_v23  ;;  %v457_v24 = vld [vmem:[%s3669_s25 + $0x4c0] sm:$0xf]  ;;  %v459_v25 = vld [vmem:[%s3669_s25 + $0x4c8] sm:$0xf] }
  0x7b   : > { %v461_v26 = vld [vmem:[%s3669_s25 + $0x4d0] sm:$0xf]  ;;  %458 = vst [vmem:[%s3673_s26 + $0x260] sm:$0xf] %v457_v24  ;;  %460 = vst [vmem:[%s3673_s26 + $0x264] sm:$0xf] %v459_v25 }
  0x7c   : > { %462 = vst [vmem:[%s3673_s26 + $0x268] sm:$0xf] %v461_v26  ;;  %v463_v27 = vld [vmem:[%s3669_s25 + $0x4d8] sm:$0xf]  ;;  %v465_v28 = vld [vmem:[%s3669_s25 + $0x4e0] sm:$0xf] }
  0x7d   : > { %v467_v29 = vld [vmem:[%s3669_s25 + $0x4e8] sm:$0xf]  ;;  %464 = vst [vmem:[%s3673_s26 + $0x26c] sm:$0xf] %v463_v27  ;;  %466 = vst [vmem:[%s3673_s26 + $0x270] sm:$0xf] %v465_v28 }
  0x7e   : > { %468 = vst [vmem:[%s3673_s26 + $0x274] sm:$0xf] %v467_v29  ;;  %v469_v30 = vld [vmem:[%s3669_s25 + $0x4f0] sm:$0xf]  ;;  %v471_v31 = vld [vmem:[%s3669_s25 + $0x4f8] sm:$0xf] }
  0x7f   : > { %v473_v32 = vld [vmem:[%s3669_s25 + $0x500] sm:$0xf]  ;;  %470 = vst [vmem:[%s3673_s26 + $0x278] sm:$0xf] %v469_v30  ;;  %472 = vst [vmem:[%s3673_s26 + $0x27c] sm:$0xf] %v471_v31 }
  0x80   : > { %474 = vst [vmem:[%s3673_s26 + $0x280] sm:$0xf] %v473_v32  ;;  %v475_v33 = vld [vmem:[%s3669_s25 + $0x508] sm:$0xf]  ;;  %v477_v34 = vld [vmem:[%s3669_s25 + $0x510] sm:$0xf] }
  0x81   : > { %v479_v35 = vld [vmem:[%s3669_s25 + $0x518] sm:$0xf]  ;;  %476 = vst [vmem:[%s3673_s26 + $0x284] sm:$0xf] %v475_v33  ;;  %478 = vst [vmem:[%s3673_s26 + $0x288] sm:$0xf] %v477_v34 }
  0x82   : > { %480 = vst [vmem:[%s3673_s26 + $0x28c] sm:$0xf] %v479_v35  ;;  %v481_v36 = vld [vmem:[%s3669_s25 + $0x520] sm:$0xf]  ;;  %v483_v37 = vld [vmem:[%s3669_s25 + $0x528] sm:$0xf] }
  0x83   : > { %v485_v38 = vld [vmem:[%s3669_s25 + $0x530] sm:$0xf]  ;;  %482 = vst [vmem:[%s3673_s26 + $0x290] sm:$0xf] %v481_v36  ;;  %484 = vst [vmem:[%s3673_s26 + $0x294] sm:$0xf] %v483_v37 }
  0x84   : > { %486 = vst [vmem:[%s3673_s26 + $0x298] sm:$0xf] %v485_v38  ;;  %v487_v39 = vld [vmem:[%s3669_s25 + $0x538] sm:$0xf]  ;;  %v489_v40 = vld [vmem:[%s3669_s25 + $0x540] sm:$0xf] }
  0x85   : > { %v491_v41 = vld [vmem:[%s3669_s25 + $0x548] sm:$0xf]  ;;  %488 = vst [vmem:[%s3673_s26 + $0x29c] sm:$0xf] %v487_v39  ;;  %490 = vst [vmem:[%s3673_s26 + $0x2a0] sm:$0xf] %v489_v40 }
  0x86   : > { %492 = vst [vmem:[%s3673_s26 + $0x2a4] sm:$0xf] %v491_v41  ;;  %v493_v42 = vld [vmem:[%s3669_s25 + $0x550] sm:$0xf]  ;;  %v495_v43 = vld [vmem:[%s3669_s25 + $0x558] sm:$0xf] }
  0x87   : > { %v497_v44 = vld [vmem:[%s3669_s25 + $0x560] sm:$0xf]  ;;  %494 = vst [vmem:[%s3673_s26 + $0x2a8] sm:$0xf] %v493_v42  ;;  %496 = vst [vmem:[%s3673_s26 + $0x2ac] sm:$0xf] %v495_v43 }
  0x88   : > { %498 = vst [vmem:[%s3673_s26 + $0x2b0] sm:$0xf] %v497_v44  ;;  %v499_v45 = vld [vmem:[%s3669_s25 + $0x568] sm:$0xf]  ;;  %v501_v46 = vld [vmem:[%s3669_s25 + $0x570] sm:$0xf] }
  0x89   : > { %v503_v47 = vld [vmem:[%s3669_s25 + $0x578] sm:$0xf]  ;;  %500 = vst [vmem:[%s3673_s26 + $0x2b4] sm:$0xf] %v499_v45  ;;  %502 = vst [vmem:[%s3673_s26 + $0x2b8] sm:$0xf] %v501_v46 }
  0x8a   : > { %504 = vst [vmem:[%s3673_s26 + $0x2bc] sm:$0xf] %v503_v47  ;;  %v505_v48 = vld [vmem:[%s3669_s25 + $0x580] sm:$0xf]  ;;  %v507_v49 = vld [vmem:[%s3669_s25 + $0x588] sm:$0xf] }
  0x8b   : > { %v509_v50 = vld [vmem:[%s3669_s25 + $0x590] sm:$0xf]  ;;  %506 = vst [vmem:[%s3673_s26 + $0x2c0] sm:$0xf] %v505_v48  ;;  %508 = vst [vmem:[%s3673_s26 + $0x2c4] sm:$0xf] %v507_v49 }
  0x8c   : > { %510 = vst [vmem:[%s3673_s26 + $0x2c8] sm:$0xf] %v509_v50  ;;  %v511_v51 = vld [vmem:[%s3669_s25 + $0x598] sm:$0xf]  ;;  %v513_v52 = vld [vmem:[%s3669_s25 + $0x5a0] sm:$0xf] }
  0x8d   : > { %v515_v53 = vld [vmem:[%s3669_s25 + $0x5a8] sm:$0xf]  ;;  %512 = vst [vmem:[%s3673_s26 + $0x2cc] sm:$0xf] %v511_v51  ;;  %514 = vst [vmem:[%s3673_s26 + $0x2d0] sm:$0xf] %v513_v52 }
  0x8e   : > { %516 = vst [vmem:[%s3673_s26 + $0x2d4] sm:$0xf] %v515_v53  ;;  %v517_v54 = vld [vmem:[%s3669_s25 + $0x5b0] sm:$0xf]  ;;  %v519_v55 = vld [vmem:[%s3669_s25 + $0x5b8] sm:$0xf] }
  0x8f   : > { %v521_v56 = vld [vmem:[%s3669_s25 + $0x5c0] sm:$0xf]  ;;  %518 = vst [vmem:[%s3673_s26 + $0x2d8] sm:$0xf] %v517_v54  ;;  %520 = vst [vmem:[%s3673_s26 + $0x2dc] sm:$0xf] %v519_v55 }
  0x90   : > { %522 = vst [vmem:[%s3673_s26 + $0x2e0] sm:$0xf] %v521_v56  ;;  %v523_v57 = vld [vmem:[%s3669_s25 + $0x5c8] sm:$0xf]  ;;  %v525_v58 = vld [vmem:[%s3669_s25 + $0x5d0] sm:$0xf] }
  0x91   : > { %v527_v59 = vld [vmem:[%s3669_s25 + $0x5d8] sm:$0xf]  ;;  %524 = vst [vmem:[%s3673_s26 + $0x2e4] sm:$0xf] %v523_v57  ;;  %526 = vst [vmem:[%s3673_s26 + $0x2e8] sm:$0xf] %v525_v58 }
  0x92   : > { %528 = vst [vmem:[%s3673_s26 + $0x2ec] sm:$0xf] %v527_v59  ;;  %v529_v60 = vld [vmem:[%s3669_s25 + $0x5e0] sm:$0xf]  ;;  %v531_v61 = vld [vmem:[%s3669_s25 + $0x5e8] sm:$0xf] }
  0x93   : > { %v533_v62 = vld [vmem:[%s3669_s25 + $0x5f0] sm:$0xf]  ;;  %530 = vst [vmem:[%s3673_s26 + $0x2f0] sm:$0xf] %v529_v60  ;;  %532 = vst [vmem:[%s3673_s26 + $0x2f4] sm:$0xf] %v531_v61 }
  0x94   : > { %534 = vst [vmem:[%s3673_s26 + $0x2f8] sm:$0xf] %v533_v62  ;;  %v535_v63 = vld [vmem:[%s3669_s25 + $0x5f8] sm:$0xf]  ;;  %v537_v0 = vld [vmem:[%s3669_s25 + $0x600] sm:$0xf] }
  0x95   : > { %v539_v1 = vld [vmem:[%s3669_s25 + $0x608] sm:$0xf]  ;;  %536 = vst [vmem:[%s3673_s26 + $0x2fc] sm:$0xf] %v535_v63  ;;  %538 = vst [vmem:[%s3673_s26 + $0x300] sm:$0xf] %v537_v0 }
  0x96   : > { %540 = vst [vmem:[%s3673_s26 + $0x304] sm:$0xf] %v539_v1  ;;  %v541_v2 = vld [vmem:[%s3669_s25 + $0x610] sm:$0xf]  ;;  %v543_v3 = vld [vmem:[%s3669_s25 + $0x618] sm:$0xf] }
  0x97   : > { %v545_v4 = vld [vmem:[%s3669_s25 + $0x620] sm:$0xf]  ;;  %542 = vst [vmem:[%s3673_s26 + $0x308] sm:$0xf] %v541_v2  ;;  %544 = vst [vmem:[%s3673_s26 + $0x30c] sm:$0xf] %v543_v3 }
  0x98   : > { %546 = vst [vmem:[%s3673_s26 + $0x310] sm:$0xf] %v545_v4  ;;  %v547_v5 = vld [vmem:[%s3669_s25 + $0x628] sm:$0xf]  ;;  %v549_v6 = vld [vmem:[%s3669_s25 + $0x630] sm:$0xf] }
  0x99   : > { %v551_v7 = vld [vmem:[%s3669_s25 + $0x638] sm:$0xf]  ;;  %548 = vst [vmem:[%s3673_s26 + $0x314] sm:$0xf] %v547_v5  ;;  %550 = vst [vmem:[%s3673_s26 + $0x318] sm:$0xf] %v549_v6 }
  0x9a   : > { %552 = vst [vmem:[%s3673_s26 + $0x31c] sm:$0xf] %v551_v7  ;;  %v553_v8 = vld [vmem:[%s3669_s25 + $0x640] sm:$0xf]  ;;  %v555_v9 = vld [vmem:[%s3669_s25 + $0x648] sm:$0xf] }
  0x9b   : > { %v557_v10 = vld [vmem:[%s3669_s25 + $0x650] sm:$0xf]  ;;  %554 = vst [vmem:[%s3673_s26 + $0x320] sm:$0xf] %v553_v8  ;;  %556 = vst [vmem:[%s3673_s26 + $0x324] sm:$0xf] %v555_v9 }
  0x9c   : > { %558 = vst [vmem:[%s3673_s26 + $0x328] sm:$0xf] %v557_v10  ;;  %v559_v11 = vld [vmem:[%s3669_s25 + $0x658] sm:$0xf]  ;;  %v561_v12 = vld [vmem:[%s3669_s25 + $0x660] sm:$0xf] }
  0x9d   : > { %v563_v13 = vld [vmem:[%s3669_s25 + $0x668] sm:$0xf]  ;;  %560 = vst [vmem:[%s3673_s26 + $0x32c] sm:$0xf] %v559_v11  ;;  %562 = vst [vmem:[%s3673_s26 + $0x330] sm:$0xf] %v561_v12 }
  0x9e   : > { %564 = vst [vmem:[%s3673_s26 + $0x334] sm:$0xf] %v563_v13  ;;  %v565_v14 = vld [vmem:[%s3669_s25 + $0x670] sm:$0xf]  ;;  %v567_v15 = vld [vmem:[%s3669_s25 + $0x678] sm:$0xf] }
  0x9f   : > { %v569_v16 = vld [vmem:[%s3669_s25 + $0x680] sm:$0xf]  ;;  %566 = vst [vmem:[%s3673_s26 + $0x338] sm:$0xf] %v565_v14  ;;  %568 = vst [vmem:[%s3673_s26 + $0x33c] sm:$0xf] %v567_v15 }
  0xa0   : > { %570 = vst [vmem:[%s3673_s26 + $0x340] sm:$0xf] %v569_v16  ;;  %v571_v17 = vld [vmem:[%s3669_s25 + $0x688] sm:$0xf]  ;;  %v573_v18 = vld [vmem:[%s3669_s25 + $0x690] sm:$0xf] }
  0xa1   : > { %v575_v19 = vld [vmem:[%s3669_s25 + $0x698] sm:$0xf]  ;;  %572 = vst [vmem:[%s3673_s26 + $0x344] sm:$0xf] %v571_v17  ;;  %574 = vst [vmem:[%s3673_s26 + $0x348] sm:$0xf] %v573_v18 }
  0xa2   : > { %576 = vst [vmem:[%s3673_s26 + $0x34c] sm:$0xf] %v575_v19  ;;  %v577_v20 = vld [vmem:[%s3669_s25 + $0x6a0] sm:$0xf]  ;;  %v579_v21 = vld [vmem:[%s3669_s25 + $0x6a8] sm:$0xf] }
  0xa3   : > { %v581_v22 = vld [vmem:[%s3669_s25 + $0x6b0] sm:$0xf]  ;;  %578 = vst [vmem:[%s3673_s26 + $0x350] sm:$0xf] %v577_v20  ;;  %580 = vst [vmem:[%s3673_s26 + $0x354] sm:$0xf] %v579_v21 }
  0xa4   : > { %582 = vst [vmem:[%s3673_s26 + $0x358] sm:$0xf] %v581_v22  ;;  %v583_v23 = vld [vmem:[%s3669_s25 + $0x6b8] sm:$0xf]  ;;  %v585_v24 = vld [vmem:[%s3669_s25 + $0x6c0] sm:$0xf] }
  0xa5   : > { %v587_v25 = vld [vmem:[%s3669_s25 + $0x6c8] sm:$0xf]  ;;  %584 = vst [vmem:[%s3673_s26 + $0x35c] sm:$0xf] %v583_v23  ;;  %586 = vst [vmem:[%s3673_s26 + $0x360] sm:$0xf] %v585_v24 }
  0xa6   : > { %588 = vst [vmem:[%s3673_s26 + $0x364] sm:$0xf] %v587_v25  ;;  %v589_v26 = vld [vmem:[%s3669_s25 + $0x6d0] sm:$0xf]  ;;  %v591_v27 = vld [vmem:[%s3669_s25 + $0x6d8] sm:$0xf] }
  0xa7   : > { %v593_v28 = vld [vmem:[%s3669_s25 + $0x6e0] sm:$0xf]  ;;  %590 = vst [vmem:[%s3673_s26 + $0x368] sm:$0xf] %v589_v26  ;;  %592 = vst [vmem:[%s3673_s26 + $0x36c] sm:$0xf] %v591_v27 }
  0xa8   : > { %594 = vst [vmem:[%s3673_s26 + $0x370] sm:$0xf] %v593_v28  ;;  %v595_v29 = vld [vmem:[%s3669_s25 + $0x6e8] sm:$0xf]  ;;  %v597_v30 = vld [vmem:[%s3669_s25 + $0x6f0] sm:$0xf] }
  0xa9   : > { %v599_v31 = vld [vmem:[%s3669_s25 + $0x6f8] sm:$0xf]  ;;  %596 = vst [vmem:[%s3673_s26 + $0x374] sm:$0xf] %v595_v29  ;;  %598 = vst [vmem:[%s3673_s26 + $0x378] sm:$0xf] %v597_v30 }
  0xaa   : > { %600 = vst [vmem:[%s3673_s26 + $0x37c] sm:$0xf] %v599_v31  ;;  %v601_v32 = vld [vmem:[%s3669_s25 + $0x700] sm:$0xf]  ;;  %v603_v33 = vld [vmem:[%s3669_s25 + $0x708] sm:$0xf] }
  0xab   : > { %v605_v34 = vld [vmem:[%s3669_s25 + $0x710] sm:$0xf]  ;;  %602 = vst [vmem:[%s3673_s26 + $0x380] sm:$0xf] %v601_v32  ;;  %604 = vst [vmem:[%s3673_s26 + $0x384] sm:$0xf] %v603_v33 }
  0xac   : > { %606 = vst [vmem:[%s3673_s26 + $0x388] sm:$0xf] %v605_v34  ;;  %v607_v35 = vld [vmem:[%s3669_s25 + $0x718] sm:$0xf]  ;;  %v609_v36 = vld [vmem:[%s3669_s25 + $0x720] sm:$0xf] }
  0xad   : > { %v611_v37 = vld [vmem:[%s3669_s25 + $0x728] sm:$0xf]  ;;  %608 = vst [vmem:[%s3673_s26 + $0x38c] sm:$0xf] %v607_v35  ;;  %610 = vst [vmem:[%s3673_s26 + $0x390] sm:$0xf] %v609_v36 }
  0xae   : > { %612 = vst [vmem:[%s3673_s26 + $0x394] sm:$0xf] %v611_v37  ;;  %v613_v38 = vld [vmem:[%s3669_s25 + $0x730] sm:$0xf]  ;;  %v615_v39 = vld [vmem:[%s3669_s25 + $0x738] sm:$0xf] }
  0xaf   : > { %v617_v40 = vld [vmem:[%s3669_s25 + $0x740] sm:$0xf]  ;;  %614 = vst [vmem:[%s3673_s26 + $0x398] sm:$0xf] %v613_v38  ;;  %616 = vst [vmem:[%s3673_s26 + $0x39c] sm:$0xf] %v615_v39 }
  0xb0   : > { %618 = vst [vmem:[%s3673_s26 + $0x3a0] sm:$0xf] %v617_v40  ;;  %v619_v41 = vld [vmem:[%s3669_s25 + $0x748] sm:$0xf]  ;;  %v621_v42 = vld [vmem:[%s3669_s25 + $0x750] sm:$0xf] }
  0xb1   : > { %v623_v43 = vld [vmem:[%s3669_s25 + $0x758] sm:$0xf]  ;;  %620 = vst [vmem:[%s3673_s26 + $0x3a4] sm:$0xf] %v619_v41  ;;  %622 = vst [vmem:[%s3673_s26 + $0x3a8] sm:$0xf] %v621_v42 }
  0xb2   : > { %624 = vst [vmem:[%s3673_s26 + $0x3ac] sm:$0xf] %v623_v43  ;;  %v625_v44 = vld [vmem:[%s3669_s25 + $0x760] sm:$0xf]  ;;  %v627_v45 = vld [vmem:[%s3669_s25 + $0x768] sm:$0xf] }
  0xb3   : > { %v629_v46 = vld [vmem:[%s3669_s25 + $0x770] sm:$0xf]  ;;  %626 = vst [vmem:[%s3673_s26 + $0x3b0] sm:$0xf] %v625_v44  ;;  %628 = vst [vmem:[%s3673_s26 + $0x3b4] sm:$0xf] %v627_v45 }
  0xb4   : > { %630 = vst [vmem:[%s3673_s26 + $0x3b8] sm:$0xf] %v629_v46  ;;  %v631_v47 = vld [vmem:[%s3669_s25 + $0x778] sm:$0xf]  ;;  %v633_v48 = vld [vmem:[%s3669_s25 + $0x780] sm:$0xf] }
  0xb5   : > { %v635_v49 = vld [vmem:[%s3669_s25 + $0x788] sm:$0xf]  ;;  %632 = vst [vmem:[%s3673_s26 + $0x3bc] sm:$0xf] %v631_v47  ;;  %634 = vst [vmem:[%s3673_s26 + $0x3c0] sm:$0xf] %v633_v48 }
  0xb6   : > { %636 = vst [vmem:[%s3673_s26 + $0x3c4] sm:$0xf] %v635_v49  ;;  %v637_v50 = vld [vmem:[%s3669_s25 + $0x790] sm:$0xf]  ;;  %v639_v51 = vld [vmem:[%s3669_s25 + $0x798] sm:$0xf] }
  0xb7   : > { %v641_v52 = vld [vmem:[%s3669_s25 + $0x7a0] sm:$0xf]  ;;  %638 = vst [vmem:[%s3673_s26 + $0x3c8] sm:$0xf] %v637_v50  ;;  %640 = vst [vmem:[%s3673_s26 + $0x3cc] sm:$0xf] %v639_v51 }
  0xb8   : > { %642 = vst [vmem:[%s3673_s26 + $0x3d0] sm:$0xf] %v641_v52  ;;  %v643_v53 = vld [vmem:[%s3669_s25 + $0x7a8] sm:$0xf]  ;;  %v645_v54 = vld [vmem:[%s3669_s25 + $0x7b0] sm:$0xf] }
  0xb9   : > { %v647_v55 = vld [vmem:[%s3669_s25 + $0x7b8] sm:$0xf]  ;;  %644 = vst [vmem:[%s3673_s26 + $0x3d4] sm:$0xf] %v643_v53  ;;  %646 = vst [vmem:[%s3673_s26 + $0x3d8] sm:$0xf] %v645_v54 }
  0xba   : > { %648 = vst [vmem:[%s3673_s26 + $0x3dc] sm:$0xf] %v647_v55  ;;  %v649_v56 = vld [vmem:[%s3669_s25 + $0x7c0] sm:$0xf]  ;;  %v651_v57 = vld [vmem:[%s3669_s25 + $0x7c8] sm:$0xf] }
  0xbb   : > { %v653_v58 = vld [vmem:[%s3669_s25 + $0x7d0] sm:$0xf]  ;;  %650 = vst [vmem:[%s3673_s26 + $0x3e0] sm:$0xf] %v649_v56  ;;  %652 = vst [vmem:[%s3673_s26 + $0x3e4] sm:$0xf] %v651_v57 }
  0xbc   : > { %654 = vst [vmem:[%s3673_s26 + $0x3e8] sm:$0xf] %v653_v58  ;;  %v655_v59 = vld [vmem:[%s3669_s25 + $0x7d8] sm:$0xf]  ;;  %v657_v60 = vld [vmem:[%s3669_s25 + $0x7e0] sm:$0xf] }
  0xbd   : > { %v659_v61 = vld [vmem:[%s3669_s25 + $0x7e8] sm:$0xf]  ;;  %656 = vst [vmem:[%s3673_s26 + $0x3ec] sm:$0xf] %v655_v59  ;;  %658 = vst [vmem:[%s3673_s26 + $0x3f0] sm:$0xf] %v657_v60 }
  0xbe   : > { %660 = vst [vmem:[%s3673_s26 + $0x3f4] sm:$0xf] %v659_v61  ;;  %v661_v62 = vld [vmem:[%s3669_s25 + $0x7f0] sm:$0xf]  ;;  %v663_v63 = vld [vmem:[%s3669_s25 + $0x7f8] sm:$0xf] }
  0xbf   : > { %662 = vst [vmem:[%s3673_s26 + $0x3f8] sm:$0xf] %v661_v62  ;;  %664 = vst [vmem:[%s3673_s26 + $0x3fc] sm:$0xf] %v663_v63 }
  0xc0 PF: > { %p2981_p8 = scmp.ge.s32.totalorder %s3604_s13, 1  ;;  %p1198_p9 = scmp.lt.s32.totalorder %s3604_s13, 3 }
  0xc2   : > { %p1199_p10 = pnand %p2981_p8, %p1198_p9 }
  0xc3   : > { %s1205_s27 = sand.u32 (!%p1199_p10), 1, %s3588_s9   ;;  %v4191_v0 = vld [vmem:[%s4439_s0] sm:$0xff] (!%p1199_p10)  ;;  %v4201_v2 = vld [vmem:[%s4439_s0 + $0x8] sm:$0xff] (!%p1199_p10)  ;;  %v4266_v49 = vld [vmem:[%s4439_s0 + $0x10] sm:$0xff] (!%p1199_p10) }
  0xc4   : > { %1202 = sbr.rel (%p1199_p10) target bundleno = 569 (0x239), region = 65  ;;  %v4196_v1 = vld [vmem:[%s4439_s0 + $0x40] sm:$0xff] (!%p1199_p10)  ;;  %s2982_s6 = sshll.u32 (!%p1199_p10), %s1205_s27, 10  ;;  %v4210_v4 = vld [vmem:[%s4439_s0 + $0x48] sm:$0xff] (!%p1199_p10)  ;;  %v4271_v50 = vld [vmem:[%s4439_s0 + $0x50] sm:$0xff] (!%p1199_p10) }
  0xc5   : > { %v2984_v3 = vcombine.high (!%p1199_p10), %v4191_v0, %v4196_v1  ;;  %v2986_v5 = vcombine.high (!%p1199_p10), %v4201_v2, %v4210_v4  ;;  %s4214_s15 = scalar_lea.vmem (!%p1199_p10), [#allocation2], %s2982_s6  ;;  %v1256_v35 = vld [vmem:[%s4439_s0 + $0x80] sm:$0x11] (!%p1199_p10)  ;;  %v1257_v37 = vld [vmem:[%s4439_s0 + $0x88] sm:$0x11] (!%p1199_p10)  ;;  %v2983_v40 = vcombine.low (!%p1199_p10), %v4191_v0, %v4196_v1  ;;  %v2985_v41 = vcombine.low (!%p1199_p10), %v4201_v2, %v4210_v4  ;;  %s3381_s21 = smul.u32 (!%p1199_p10), 12, %s1205_s27 }
  0xc6   : > { %v3422_v6 = vld [vmem:[%s4214_s15 + $0x40] sm:$0xff] (!%p1199_p10)   ;;  %v3426_v10 = vld [vmem:[%s4214_s15 + $0x48] sm:$0xff] (!%p1199_p10)   ;;  %v3430_v14 = vld [vmem:[%s4214_s15 + $0x50] sm:$0xff] (!%p1199_p10)   ;;  %v3000_v44 = vcombine.high (!%p1199_p10), %v1256_v35, %v1256_v35  ;;  %v3002_v46 = vcombine.high (!%p1199_p10), %v1257_v37, %v1257_v37  ;;  %v2999_v54 = vcombine.low (!%p1199_p10), %v1256_v35, %v1256_v35  ;;  %v3001_v56 = vcombine.low (!%p1199_p10), %v1257_v37, %v1257_v37 }
  0xc7   : > { %2456 = vmatprep.mubr.bf16.mxu0 (!%p1199_p10), %v2984_v3  ;;  %v3423_v7 = vld [vmem:[%s4214_s15 + $0xc0] sm:$0xff] (!%p1199_p10)   ;;  %2504 = vmatprep.mubr.bf16.mxu1 (!%p1199_p10), %v2986_v5  ;;  %v3427_v11 = vld [vmem:[%s4214_s15 + $0xc8] sm:$0xff] (!%p1199_p10)   ;;  %v3431_v15 = vld [vmem:[%s4214_s15 + $0xd0] sm:$0xff] (!%p1199_p10)   ;;  %v2988_v58 = vcombine.high (!%p1199_p10), %v4266_v49, %v4271_v50  ;;  %s1230_s9 = scalar_lea.vmem (!%p1199_p10), [#allocation3], %s3381_s21 }
  0xc8   : > { %3157 = vmatprep.subr.bf16.mxu0 (!%p1199_p10), %v3422_v6  ;;  %v3424_v8 = vld [vmem:[%s4214_s15] sm:$0xff] (!%p1199_p10)   ;;  %3185 = vmatprep.subr.bf16.mxu1 (!%p1199_p10), %v3423_v7  ;;  %v3428_v12 = vld [vmem:[%s4214_s15 + $0x8] sm:$0xff] (!%p1199_p10)   ;;  %v3432_v16 = vld [vmem:[%s4214_s15 + $0x10] sm:$0xff] (!%p1199_p10)  }
  0xc9   : > { %v3425_v9 = vld [vmem:[%s4214_s15 + $0x80] sm:$0xff] (!%p1199_p10)   ;;  %3158 = vmatpush3.bf16.msra.mxu0 (!%p1199_p10), %v3424_v8  ;;  %v3429_v13 = vld [vmem:[%s4214_s15 + $0x88] sm:$0xff] (!%p1199_p10)   ;;  %v3433_v17 = vld [vmem:[%s4214_s15 + $0x90] sm:$0xff] (!%p1199_p10)  }
  0xca   : > { %3186 = vmatpush3.bf16.msra.mxu1 (!%p1199_p10), %v3425_v9  ;;  %3159 = vmatprep.subr.bf16.mxu0 (!%p1199_p10), %v3426_v10  ;;  %v3434_v18 = vld [vmem:[%s4214_s15 + $0x58] sm:$0xff] (!%p1199_p10)   ;;  %v3438_v22 = vld [vmem:[%s4214_s15 + $0x60] sm:$0xff] (!%p1199_p10)   ;;  %v3442_v26 = vld [vmem:[%s4214_s15 + $0x68] sm:$0xff] (!%p1199_p10)  }
  0xcb   : > { %3187 = vmatprep.subr.bf16.mxu1 %v3427_v11  ;;  %v3435_v19 = vld [vmem:[%s4214_s15 + $0xd8] sm:$0xff]   ;;  %v3439_v23 = vld [vmem:[%s4214_s15 + $0xe0] sm:$0xff]   ;;  %v3443_v27 = vld [vmem:[%s4214_s15 + $0xe8] sm:$0xff]   ;;  %s3146_s27 = sshll.u32 (%p3656_p6), %s3596_s11, 2 }
  0xcc   : > { %v3436_v20 = vld [vmem:[%s4214_s15 + $0x18] sm:$0xff]   ;;  %v3440_v24 = vld [vmem:[%s4214_s15 + $0x20] sm:$0xff]   ;;  %v3444_v28 = vld [vmem:[%s4214_s15 + $0x28] sm:$0xff]   ;;  %s2844_s24 = scalar_lea.vmem (%p3656_p6), %s4441_s2, %s3146_s27 }
  0xcd   : > { %3160 = vmatpush3.bf16.msra.mxu0 %v3428_v12  ;;  %v3437_v21 = vld [vmem:[%s4214_s15 + $0x98] sm:$0xff]   ;;  %v3441_v25 = vld [vmem:[%s4214_s15 + $0xa0] sm:$0xff]   ;;  %v3445_v29 = vld [vmem:[%s4214_s15 + $0xa8] sm:$0xff]  }
  0xce   : > { %3188 = vmatpush3.bf16.msra.mxu1 %v3429_v13  ;;  %3161 = vmatprep.subr.bf16.mxu0 %v3430_v14  ;;  %v3446_v30 = vld [vmem:[%s4214_s15 + $0x70] sm:$0xff]   ;;  %v3450_v34 = vld [vmem:[%s4214_s15 + $0x78] sm:$0xff]   ;;  %v3454_v42 = vld [vmem:[%s4214_s15 + $0x140] sm:$0xff]  }
  0xcf   : > { %3189 = vmatprep.subr.bf16.mxu1 %v3431_v15  ;;  %v3447_v31 = vld [vmem:[%s4214_s15 + $0xf0] sm:$0xff]   ;;  %v3451_v36 = vld [vmem:[%s4214_s15 + $0xf8] sm:$0xff]   ;;  %v3455_v43 = vld [vmem:[%s4214_s15 + $0x1c0] sm:$0xff]  }
  0xd0   : > { %v3448_v32 = vld [vmem:[%s4214_s15 + $0x30] sm:$0xff]   ;;  %v3452_v38 = vld [vmem:[%s4214_s15 + $0x38] sm:$0xff]   ;;  %v3456_v45 = vld [vmem:[%s4214_s15 + $0x100] sm:$0xff]  }
  0xd1   : > { %3162 = vmatpush3.bf16.msra.mxu0 %v3432_v16  ;;  %v3449_v33 = vld [vmem:[%s4214_s15 + $0xb0] sm:$0xff]   ;;  %v3453_v39 = vld [vmem:[%s4214_s15 + $0xb8] sm:$0xff]   ;;  %v3457_v47 = vld [vmem:[%s4214_s15 + $0x180] sm:$0xff]  }
  0xd2   : > { %3190 = vmatpush3.bf16.msra.mxu1 %v3433_v17  ;;  %3163 = vmatprep.subr.bf16.mxu0 %v3434_v18  ;;  %v3458_v48 = vld [vmem:[%s4214_s15 + $0x148] sm:$0xff]   ;;  %v3462_v55 = vld [vmem:[%s4214_s15 + $0x150] sm:$0xff]   ;;  %v3466_v61 = vld [vmem:[%s4214_s15 + $0x158] sm:$0xff]   ;;  %v2987_v18 = vcombine.low %v4266_v49, %v4271_v50 }
  0xd3   : > { %3191 = vmatprep.subr.bf16.mxu1 %v3435_v19  ;;  %v3459_v51 = vld [vmem:[%s4214_s15 + $0x1c8] sm:$0xff]   ;;  %v3463_v57 = vld [vmem:[%s4214_s15 + $0x1d0] sm:$0xff]   ;;  %v3467_v62 = vld [vmem:[%s4214_s15 + $0x1d8] sm:$0xff]  }
  0xd4   : > { %v3460_v52 = vld [vmem:[%s4214_s15 + $0x108] sm:$0xff]   ;;  %v3464_v59 = vld [vmem:[%s4214_s15 + $0x110] sm:$0xff]   ;;  %v3468_v63 = vld [vmem:[%s4214_s15 + $0x118] sm:$0xff]  }
  0xd5   : > { %3164 = vmatpush3.bf16.msra.mxu0 %v3436_v20  ;;  %v3461_v53 = vld [vmem:[%s4214_s15 + $0x188] sm:$0xff]   ;;  %v3465_v60 = vld [vmem:[%s4214_s15 + $0x190] sm:$0xff]   ;;  %v3469_v0 = vld [vmem:[%s4214_s15 + $0x198] sm:$0xff]  }
  0xd6   : > { %3192 = vmatpush3.bf16.msra.mxu1 %v3437_v21  ;;  %3165 = vmatprep.subr.bf16.mxu0 %v3438_v22  ;;  %v3470_v1 = vld [vmem:[%s4214_s15 + $0x160] sm:$0xff]   ;;  %v3474_v5 = vld [vmem:[%s4214_s15 + $0x168] sm:$0xff]   ;;  %v3482_v9 = vld [vmem:[%s4214_s15 + $0x170] sm:$0xff]  }
  0xd7   : > { %3193 = vmatprep.subr.bf16.mxu1 %v3439_v23  ;;  %v3471_v2 = vld [vmem:[%s4214_s15 + $0x1e0] sm:$0xff]   ;;  %v3475_v6 = vld [vmem:[%s4214_s15 + $0x1e8] sm:$0xff]   ;;  %v3483_v10 = vld [vmem:[%s4214_s15 + $0x1f0] sm:$0xff]  }
  0xd8   : > { %v3472_v3 = vld [vmem:[%s4214_s15 + $0x120] sm:$0xff]   ;;  %v3477_v7 = vld [vmem:[%s4214_s15 + $0x128] sm:$0xff]   ;;  %v3484_v11 = vld [vmem:[%s4214_s15 + $0x130] sm:$0xff]  }
  0xd9   : > { %3166 = vmatpush3.bf16.msra.mxu0 %v3440_v24  ;;  %v3473_v4 = vld [vmem:[%s4214_s15 + $0x1a0] sm:$0xff]   ;;  %v3478_v8 = vld [vmem:[%s4214_s15 + $0x1a8] sm:$0xff]   ;;  %v3485_v12 = vld [vmem:[%s4214_s15 + $0x1b0] sm:$0xff]  }
  0xda   : > { %3194 = vmatpush3.bf16.msra.mxu1 %v3441_v25  ;;  %3167 = vmatprep.subr.bf16.mxu0 %v3442_v26  ;;  %v3486_v13 = vld [vmem:[%s4214_s15 + $0x178] sm:$0xff]   ;;  %v3490_v22 = vld [vmem:[%s4214_s15 + $0x240] sm:$0xff]   ;;  %v3494_v26 = vld [vmem:[%s4214_s15 + $0x248] sm:$0xff]  }
  0xdb   : > { %3195 = vmatprep.subr.bf16.mxu1 %v3443_v27  ;;  %v1243_v14 = vld [vmem:[%s4439_s0 + $0x18] sm:$0xff]  ;;  %v3491_v23 = vld [vmem:[%s4214_s15 + $0x2c0] sm:$0xff]   ;;  %v3495_v27 = vld [vmem:[%s4214_s15 + $0x2c8] sm:$0xff]  }
  0xdc   : > { %v3487_v15 = vld [vmem:[%s4214_s15 + $0x1f8] sm:$0xff]   ;;  %v3492_v24 = vld [vmem:[%s4214_s15 + $0x200] sm:$0xff]   ;;  %v3503_v37 = vld [vmem:[%s4214_s15 + $0x210] sm:$0xff]  }
  0xdd   : > { %3168 = vmatpush3.bf16.msra.mxu0 %v3444_v28  ;;  %v3488_v16 = vld [vmem:[%s4214_s15 + $0x138] sm:$0xff]   ;;  %v3493_v25 = vld [vmem:[%s4214_s15 + $0x280] sm:$0xff]   ;;  %v3496_v28 = vld [vmem:[%s4214_s15 + $0x208] sm:$0xff]  }
  0xde   : > { %3196 = vmatpush3.bf16.msra.mxu1 %v3445_v29  ;;  %3169 = vmatprep.subr.bf16.mxu0 %v3446_v30  ;;  %v3489_v17 = vld [vmem:[%s4214_s15 + $0x1b8] sm:$0xff]   ;;  %v3497_v29 = vld [vmem:[%s4214_s15 + $0x288] sm:$0xff]   ;;  %v1258_v30 = vld [vmem:[%s4439_s0 + $0x90] sm:$0x11] }
  0xdf   : > { %3197 = vmatprep.subr.bf16.mxu1 %v3447_v31  ;;  %v1251_v19 = vld [vmem:[%s4439_s0 + $0x58] sm:$0xff]  ;;  %v3004_v31 = vcombine.high %v1258_v30, %v1258_v30  ;;  %v3515_v49 = vld [vmem:[%s4214_s15 + $0x2e8] sm:$0xff]  }
  0xe0   : > { %v2989_v20 = vcombine.low %v1243_v14, %v1251_v19  ;;  %v2990_v21 = vcombine.high %v1243_v14, %v1251_v19  ;;  %v1259_v35 = vld [vmem:[%s4439_s0 + $0x98] sm:$0x11]  ;;  %v3516_v50 = vld [vmem:[%s4214_s15 + $0x228] sm:$0xff]   ;;  %v3539_v19 = vld [vmem:[%s4214_s15 + $0x310] sm:$0xff]  }
  0xe1   : > { %3170 = vmatpush3.bf16.msra.mxu0 %v3448_v32  ;;  %v3003_v32 = vcombine.low %v1258_v30, %v1258_v30  ;;  %v3550_v30 = vld [vmem:[%s4214_s15 + $0x368] sm:$0xff]  }
  0xe2   : > { %3198 = vmatpush3.bf16.msra.mxu1 %v3449_v33  ;;  %3171 = vmatprep.subr.bf16.mxu0 %v3450_v34  ;;  %v3500_v33 = vld [vmem:[%s4214_s15 + $0x250] sm:$0xff]  }
  0xe3   : > { %3199 = vmatprep.subr.bf16.mxu1 %v3451_v36  ;;  %v3501_v34 = vld [vmem:[%s4214_s15 + $0x2d0] sm:$0xff]   ;;  %v3006_v36 = vcombine.high %v1259_v35, %v1259_v35 }
  0xe5   : > { %3172 = vmatpush3.bf16.msra.mxu0 %v3452_v38  ;;  %v3005_v38 = vcombine.low %v1259_v35, %v1259_v35  ;;  %v3555_v35 = vld [vmem:[%s4214_s15 + $0x3f0] sm:$0xff]  }
  0xe6   : > { %3200 = vmatpush3.bf16.msra.mxu1 %v3453_v39  ;;  %3213 = vmatprep.subr.bf16.mxu0 %v3454_v42  ;;  %v3504_v39 = vld [vmem:[%s4214_s15 + $0x290] sm:$0xff]   ;;  %v3508_v42 = vld [vmem:[%s4214_s15 + $0x218] sm:$0xff]  }
  0xe7   : > { %3241 = vmatprep.subr.bf16.mxu1 %v3455_v43  ;;  %v3509_v43 = vld [vmem:[%s4214_s15 + $0x298] sm:$0xff]  }
  0xe8   : > { %2457 = vmatmul.mubr.bf16.vlgmr.msra.gmra.mrb[0].mxu0 %v2983_v40  ;;  %v3506_v40 = vld [vmem:[%s4214_s15 + $0x258] sm:$0xff]  }
  0xe9   : > { %2505 = vmatmul.mubr.bf16.vlgmr.msra.gmra.mrb[0].mxu1 %v2985_v41  ;;  %3214 = vmatpush3.bf16.msra.mxu0 %v3456_v45  ;;  %v3507_v41 = vld [vmem:[%s4214_s15 + $0x2d8] sm:$0xff]   ;;  %v3511_v45 = vld [vmem:[%s4214_s15 + $0x2e0] sm:$0xff]  }
  0xea   : > { %3242 = vmatpush3.bf16.msra.mxu1 %v3457_v47  ;;  %2464 = vmatprep.mubr.bf16.mxu0 %v3000_v44  ;;  %v3510_v44 = vld [vmem:[%s4214_s15 + $0x260] sm:$0xff]  }
  0xeb   : > { %3215 = vmatprep.subr.bf16.mxu0 %v3458_v48  ;;  %2512 = vmatprep.mubr.bf16.mxu1 %v3002_v46  ;;  %v3512_v46 = vld [vmem:[%s4214_s15 + $0x220] sm:$0xff]   ;;  %v3514_v48 = vld [vmem:[%s4214_s15 + $0x268] sm:$0xff]  }
  0xec   : > { %3243 = vmatprep.subr.bf16.mxu1 %v3459_v51  ;;  %v3513_v47 = vld [vmem:[%s4214_s15 + $0x2a0] sm:$0xff]   ;;  %v3517_v51 = vld [vmem:[%s4214_s15 + $0x2a8] sm:$0xff]  }
  0xed   : > { %3216 = vmatpush3.bf16.msra.mxu0 %v3460_v52  ;;  %v3518_v52 = vld [vmem:[%s4214_s15 + $0x270] sm:$0xff]  }
  0xee   : > { %3244 = vmatpush3.bf16.msra.mxu1 %v3461_v53  ;;  %3217 = vmatprep.subr.bf16.mxu0 %v3462_v55  ;;  %v3519_v53 = vld [vmem:[%s4214_s15 + $0x2f0] sm:$0xff]  }
  0xef   : > { %3245 = vmatprep.subr.bf16.mxu1 %v3463_v57  ;;  %v3521_v55 = vld [vmem:[%s4214_s15 + $0x2b0] sm:$0xff]   ;;  %v3523_v57 = vld [vmem:[%s4214_s15 + $0x2f8] sm:$0xff]  }
  0xf0   : > { %2465 = vmatmul.mubr.bf16.gmra.mrb[4].mxu0 %v2999_v54  ;;  %v3520_v54 = vld [vmem:[%s4214_s15 + $0x230] sm:$0xff]  }
  0xf1   : > { %3218 = vmatpush3.bf16.msra.mxu0 %v3464_v59  ;;  %2513 = vmatmul.mubr.bf16.gmra.mrb[4].mxu1 %v3001_v56  ;;  %v3522_v56 = vld [vmem:[%s4214_s15 + $0x278] sm:$0xff]  }
  0xf2   : > { %3246 = vmatpush3.bf16.msra.mxu1 %v3465_v60  ;;  %2552 = vmatprep.mubr.bf16.mxu0 %v2988_v58  ;;  %v3524_v58 = vld [vmem:[%s4214_s15 + $0x238] sm:$0xff]   ;;  %v1244_v60 = vld [vmem:[%s4439_s0 + $0x20] sm:$0xff] }
  0xf3   : > { %3219 = vmatprep.subr.bf16.mxu0 %v3466_v61  ;;  %3247 = vmatprep.subr.bf16.mxu1 %v3467_v62  ;;  %v3525_v59 = vld [vmem:[%s4214_s15 + $0x2b8] sm:$0xff]   ;;  %v1252_v61 = vld [vmem:[%s4439_s0 + $0x60] sm:$0xff]  ;;  %v1245_v62 = vld [vmem:[%s4439_s0 + $0x28] sm:$0xff] }
  0xf4   : > { %2600 = vmatprep.mubr.bf16.mxu1 %v2990_v21  ;;  %v3540_v21 = vld [vmem:[%s4214_s15 + $0x390] sm:$0xff]  }
  0xf5   : > { %3220 = vmatpush3.bf16.msra.mxu0 %v3468_v63  ;;  %v2991_v63 = vcombine.low %v1244_v60, %v1252_v61 }
  0xf6   : > { %3248 = vmatpush3.bf16.msra.mxu1 %v3469_v0  ;;  %3221 = vmatprep.subr.bf16.mxu0 %v3470_v1  ;;  %v2992_v0 = vcombine.high %v1244_v60, %v1252_v61  ;;  %v1253_v1 = vld [vmem:[%s4439_s0 + $0x68] sm:$0xff] }
  0xf7   : > { %3249 = vmatprep.subr.bf16.mxu1 %v3471_v2  ;;  %v2993_v2 = vcombine.low %v1245_v62, %v1253_v1 }
  0xf9   : > { %3222 = vmatpush3.bf16.msra.mxu0 %v3472_v3  ;;  %v2994_v3 = vcombine.high %v1245_v62, %v1253_v1 }
  0xfa   : > { %3250 = vmatpush3.bf16.msra.mxu1 %v3473_v4  ;;  %3223 = vmatprep.subr.bf16.mxu0 %v3474_v5  ;;  %v3526_v4 = vld [vmem:[%s4214_s15 + $0x340] sm:$0xff]  }
  0xfb   : > { %3251 = vmatprep.subr.bf16.mxu1 %v3475_v6  ;;  %v3527_v5 = vld [vmem:[%s4214_s15 + $0x3c0] sm:$0xff]  }
  0xfc   : > { %v3528_v6 = vld [vmem:[%s4214_s15 + $0x300] sm:$0xff]  }
  0xfd   : > { %3224 = vmatpush3.bf16.msra.mxu0 %v3477_v7  ;;  %v3529_v7 = vld [vmem:[%s4214_s15 + $0x380] sm:$0xff]  }
  0xfe   : > { %3252 = vmatpush3.bf16.msra.mxu1 %v3478_v8  ;;  %3225 = vmatprep.subr.bf16.mxu0 %v3482_v9  ;;  %v3530_v8 = vld [vmem:[%s4214_s15 + $0x348] sm:$0xff]  }
  0xff   : > { %3253 = vmatprep.subr.bf16.mxu1 %v3483_v10  ;;  %v3531_v9 = vld [vmem:[%s4214_s15 + $0x3c8] sm:$0xff]  }
 0x100   : > { %v3532_v10 = vld [vmem:[%s4214_s15 + $0x308] sm:$0xff]  }
 0x101   : > { %3226 = vmatpush3.bf16.msra.mxu0 %v3484_v11  ;;  %v3533_v11 = vld [vmem:[%s4214_s15 + $0x388] sm:$0xff]  }
 0x102   : > { %3254 = vmatpush3.bf16.msra.mxu1 %v3485_v12  ;;  %3227 = vmatprep.subr.bf16.mxu0 %v3486_v13  ;;  %v1260_v12 = vld [vmem:[%s4439_s0 + $0xa0] sm:$0x11] }
 0x103   : > { %3255 = vmatprep.subr.bf16.mxu1 %v3487_v15  ;;  %v3008_v13 = vcombine.high %v1260_v12, %v1260_v12  ;;  %v3007_v14 = vcombine.low %v1260_v12, %v1260_v12  ;;  %v3536_v15 = vld [vmem:[%s4214_s15 + $0x350] sm:$0xff]  }
 0x105   : > { %3228 = vmatpush3.bf16.msra.mxu0 %v3488_v16  ;;  %v3537_v16 = vld [vmem:[%s4214_s15 + $0x3d0] sm:$0xff]  }
 0x106   : > { %3256 = vmatpush3.bf16.msra.mxu1 %v3489_v17  ;;  %3269 = vmatprep.subr.bf16.mxu0 %v3490_v22  ;;  %v1261_v17 = vld [vmem:[%s4439_s0 + $0xa8] sm:$0x11]  ;;  %v3542_v22 = vld [vmem:[%s4214_s15 + $0x358] sm:$0xff]  }
 0x107   : > { %3297 = vmatprep.subr.bf16.mxu1 %v3491_v23  ;;  %v3543_v23 = vld [vmem:[%s4214_s15 + $0x3d8] sm:$0xff]  }
 0x108   : > { %2553 = vmatmul.mubr.bf16.vlgmr.msra.gmra.mrb[8].mxu0 %v2987_v18  ;;  %v3010_v18 = vcombine.high %v1261_v17, %v1261_v17 }
 0x109   : > { %2601 = vmatmul.mubr.bf16.vlgmr.msra.gmra.mrb[8].mxu1 %v2989_v20  ;;  %3270 = vmatpush3.bf16.msra.mxu0 %v3492_v24  ;;  %v3009_v20 = vcombine.low %v1261_v17, %v1261_v17  ;;  %v3544_v24 = vld [vmem:[%s4214_s15 + $0x318] sm:$0xff]  }
 0x10a   : > { %3298 = vmatpush3.bf16.msra.mxu1 %v3493_v25  ;;  %3271 = vmatprep.subr.bf16.mxu0 %v3494_v26  ;;  %v3545_v25 = vld [vmem:[%s4214_s15 + $0x398] sm:$0xff]   ;;  %v3546_v26 = vld [vmem:[%s4214_s15 + $0x360] sm:$0xff]  }
 0x10b   : > { %3299 = vmatprep.subr.bf16.mxu1 %v3495_v27  ;;  %2560 = vmatprep.mubr.bf16.mxu0 %v3004_v31  ;;  %v3547_v27 = vld [vmem:[%s4214_s15 + $0x3e0] sm:$0xff]   ;;  %v3551_v31 = vld [vmem:[%s4214_s15 + $0x3e8] sm:$0xff]  }
 0x10c   : > { %2608 = vmatprep.mubr.bf16.mxu1 %v3006_v36  ;;  %v3556_v36 = vld [vmem:[%s4214_s15 + $0x330] sm:$0xff]  }
 0x10d   : > { %3272 = vmatpush3.bf16.msra.mxu0 %v3496_v28  ;;  %v3548_v28 = vld [vmem:[%s4214_s15 + $0x320] sm:$0xff]  }
 0x10e   : > { %3300 = vmatpush3.bf16.msra.mxu1 %v3497_v29  ;;  %3273 = vmatprep.subr.bf16.mxu0 %v3500_v33  ;;  %v3549_v29 = vld [vmem:[%s4214_s15 + $0x3a0] sm:$0xff]   ;;  %v3553_v33 = vld [vmem:[%s4214_s15 + $0x3a8] sm:$0xff]  }
 0x10f   : > { %3301 = vmatprep.subr.bf16.mxu1 %v3501_v34  ;;  %v3554_v34 = vld [vmem:[%s4214_s15 + $0x370] sm:$0xff]  }
 0x110   : > { %2561 = vmatmul.mubr.bf16.gmra.mrb[12].mxu0 %v3003_v32  ;;  %v3552_v32 = vld [vmem:[%s4214_s15 + $0x328] sm:$0xff]  }
 0x111   : > { %3274 = vmatpush3.bf16.msra.mxu0 %v3503_v37  ;;  %2609 = vmatmul.mubr.bf16.gmra.mrb[12].mxu1 %v3005_v38  ;;  %v3557_v37 = vld [vmem:[%s4214_s15 + $0x3b0] sm:$0xff]   ;;  %v3558_v38 = vld [vmem:[%s4214_s15 + $0x378] sm:$0xff]  }
 0x112   : > { %3302 = vmatpush3.bf16.msra.mxu1 %v3504_v39  ;;  %3275 = vmatprep.subr.bf16.mxu0 %v3506_v40  ;;  %v3559_v39 = vld [vmem:[%s4214_s15 + $0x3f8] sm:$0xff]  }
 0x113   : > { %3303 = vmatprep.subr.bf16.mxu1 %v3507_v41  ;;  %2648 = vmatprep.mubr.bf16.mxu0 %v2992_v0  ;;  %v3560_v40 = vld [vmem:[%s4214_s15 + $0x338] sm:$0xff]  }
 0x114   : > { %2696 = vmatprep.mubr.bf16.mxu1 %v2994_v3  ;;  %v3561_v41 = vld [vmem:[%s4214_s15 + $0x3b8] sm:$0xff]  }
 0x115   : > { %3276 = vmatpush3.bf16.msra.mxu0 %v3508_v42  ;;  %v1246_v42 = vld [vmem:[%s4439_s0 + $0x30] sm:$0xff] }
 0x116   : > { %3304 = vmatpush3.bf16.msra.mxu1 %v3509_v43  ;;  %3277 = vmatprep.subr.bf16.mxu0 %v3510_v44  ;;  %v1254_v43 = vld [vmem:[%s4439_s0 + $0x70] sm:$0xff]  ;;  %v1247_v44 = vld [vmem:[%s4439_s0 + $0x38] sm:$0xff] }
 0x117   : > { %3305 = vmatprep.subr.bf16.mxu1 %v3511_v45  ;;  %v2995_v45 = vcombine.low %v1246_v42, %v1254_v43 }
 0x119   : > { %3278 = vmatpush3.bf16.msra.mxu0 %v3512_v46  ;;  %v2996_v46 = vcombine.high %v1246_v42, %v1254_v43 }
 0x11a   : > { %3306 = vmatpush3.bf16.msra.mxu1 %v3513_v47  ;;  %3279 = vmatprep.subr.bf16.mxu0 %v3514_v48  ;;  %v1255_v47 = vld [vmem:[%s4439_s0 + $0x78] sm:$0xff]  ;;  %v1262_v48 = vld [vmem:[%s4439_s0 + $0xb0] sm:$0x11] }
 0x11b   : > { %3307 = vmatprep.subr.bf16.mxu1 %v3515_v49  ;;  %v1263_v49 = vld [vmem:[%s4439_s0 + $0xb8] sm:$0x11] }
 0x11d   : > { %3280 = vmatpush3.bf16.msra.mxu0 %v3516_v50  ;;  %v2997_v50 = vcombine.low %v1247_v44, %v1255_v47 }
 0x11e   : > { %3308 = vmatpush3.bf16.msra.mxu1 %v3517_v51  ;;  %3281 = vmatprep.subr.bf16.mxu0 %v3518_v52  ;;  %v2998_v51 = vcombine.high %v1247_v44, %v1255_v47  ;;  %v3012_v52 = vcombine.high %v1262_v48, %v1262_v48 }
 0x11f   : > { %3309 = vmatprep.subr.bf16.mxu1 %v3519_v53  ;;  %v3014_v53 = vcombine.high %v1263_v49, %v1263_v49 }
 0x121   : > { %3282 = vmatpush3.bf16.msra.mxu0 %v3520_v54  ;;  %v3011_v54 = vcombine.low %v1262_v48, %v1262_v48 }
 0x122   : > { %3310 = vmatpush3.bf16.msra.mxu1 %v3521_v55  ;;  %3283 = vmatprep.subr.bf16.mxu0 %v3522_v56  ;;  %v3013_v55 = vcombine.low %v1263_v49, %v1263_v49 }
 0x123   : > { %3311 = vmatprep.subr.bf16.mxu1 %v3523_v57 }
 0x125   : > { %3284 = vmatpush3.bf16.msra.mxu0 %v3524_v58 }
 0x126   : > { %3312 = vmatpush3.bf16.msra.mxu1 %v3525_v59  ;;  %3325 = vmatprep.subr.bf16.mxu0 %v3526_v4 }
 0x127   : > { %3353 = vmatprep.subr.bf16.mxu1 %v3527_v5 }
 0x128   : > { %2649 = vmatmul.mubr.bf16.vlgmr.msra.gmra.mrb[16].mxu0 %v2991_v63 }
 0x129   : > { %2697 = vmatmul.mubr.bf16.vlgmr.msra.gmra.mrb[16].mxu1 %v2993_v2  ;;  %3326 = vmatpush3.bf16.msra.mxu0 %v3528_v6 }
 0x12a   : > { %3354 = vmatpush3.bf16.msra.mxu1 %v3529_v7  ;;  %3327 = vmatprep.subr.bf16.mxu0 %v3530_v8 }
 0x12b   : > { %3355 = vmatprep.subr.bf16.mxu1 %v3531_v9  ;;  %2656 = vmatprep.mubr.bf16.mxu0 %v3008_v13 }
 0x12c   : > { %2704 = vmatprep.mubr.bf16.mxu1 %v3010_v18 }
 0x12d   : > { %3328 = vmatpush3.bf16.msra.mxu0 %v3532_v10 }
 0x12e   : > { %3356 = vmatpush3.bf16.msra.mxu1 %v3533_v11  ;;  %3329 = vmatprep.subr.bf16.mxu0 %v3536_v15 }
 0x12f   : > { %3357 = vmatprep.subr.bf16.mxu1 %v3537_v16 }
 0x130   : > { %2657 = vmatmul.mubr.bf16.gmra.mrb[20].mxu0 %v3007_v14 }
 0x131   : > { %3330 = vmatpush3.bf16.msra.mxu0 %v3539_v19  ;;  %2705 = vmatmul.mubr.bf16.gmra.mrb[20].mxu1 %v3009_v20 }
 0x132   : > { %3358 = vmatpush3.bf16.msra.mxu1 %v3540_v21  ;;  %3331 = vmatprep.subr.bf16.mxu0 %v3542_v22 }
 0x133   : > { %3359 = vmatprep.subr.bf16.mxu1 %v3543_v23  ;;  %2744 = vmatprep.mubr.bf16.mxu0 %v2996_v46 }
 0x134   : > { %2792 = vmatprep.mubr.bf16.mxu1 %v2998_v51 }
 0x135   : > { %3332 = vmatpush3.bf16.msra.mxu0 %v3544_v24 }
 0x136   : > { %3360 = vmatpush3.bf16.msra.mxu1 %v3545_v25  ;;  %3333 = vmatprep.subr.bf16.mxu0 %v3546_v26 }
 0x137   : > { %3361 = vmatprep.subr.bf16.mxu1 %v3547_v27 }
 0x139   : > { %3334 = vmatpush3.bf16.msra.mxu0 %v3548_v28 }
 0x13a   : > { %3362 = vmatpush3.bf16.msra.mxu1 %v3549_v29  ;;  %3335 = vmatprep.subr.bf16.mxu0 %v3550_v30 }
 0x13b   : > { %3363 = vmatprep.subr.bf16.mxu1 %v3551_v31 }
 0x13d   : > { %3336 = vmatpush3.bf16.msra.mxu0 %v3552_v32 }
 0x13e   : > { %3364 = vmatpush3.bf16.msra.mxu1 %v3553_v33  ;;  %3337 = vmatprep.subr.bf16.mxu0 %v3554_v34 }
 0x13f   : > { %3365 = vmatprep.subr.bf16.mxu1 %v3555_v35 }
 0x141   : > { %3338 = vmatpush3.bf16.msra.mxu0 %v3556_v36 }
 0x142   : > { %3366 = vmatpush3.bf16.msra.mxu1 %v3557_v37  ;;  %3339 = vmatprep.subr.bf16.mxu0 %v3558_v38 }
 0x143   : > { %3367 = vmatprep.subr.bf16.mxu1 %v3559_v39 }
 0x145   : > { %3340 = vmatpush3.bf16.msra.mxu0 %v3560_v40 }
 0x146   : > { %3368 = vmatpush3.bf16.msra.mxu1 %v3561_v41 }
 0x148   : > { %2745 = vmatmul.mubr.bf16.vlgmr.msra.gmra.mrb[24].mxu0 %v2995_v45 }
 0x149   : > { %2793 = vmatmul.mubr.bf16.vlgmr.msra.gmra.mrb[24].mxu1 %v2997_v50  ;;  %2752 = vmatprep.mubr.bf16.mxu0 %v3012_v52 }
 0x14a   : > { %2800 = vmatprep.mubr.bf16.mxu1 %v3014_v53 }
 0x150   : > { %2753 = vmatmul.mubr.bf16.gmra.mrb[28].mxu0 %v3011_v54 }
 0x151   : > { %2801 = vmatmul.mubr.bf16.gmra.mrb[28].mxu1 %v3013_v55 }
 0x1bb   : > { %v3173_v56 = vpop.f32.mrb[0].mxu0 }
 0x1bc   : > { %v3201_v57 = vpop.f32.mrb[0].mxu1  ;;  %v3174_v58 = vpop.f32.mrb[1].mxu0 }
 0x1bd   : > { %v3175_v59 = vadd.f32 %v3174_v58, %v3173_v56  ;;  %v3202_v60 = vpop.f32.mrb[1].mxu1  ;;  %v3176_v61 = vpop.f32.mrb[2].mxu0 }
 0x1be   : > { %v3203_v62 = vadd.f32 %v3202_v60, %v3201_v57  ;;  %v3204_v63 = vpop.f32.mrb[2].mxu1  ;;  %v3177_v0 = vpop.f32.mrb[3].mxu0 }
 0x1bf   : > { %v3178_v1 = vadd.f32 %v3177_v0, %v3176_v61  ;;  %v3205_v2 = vpop.f32.mrb[3].mxu1 }
 0x1c0   : > { %v2507_v3 = vadd.f32 %v3203_v62, %v3175_v59  ;;  %v3206_v4 = vadd.f32 %v3205_v2, %v3204_v63 }
 0x1c2   : > { %v2510_v5 = vadd.f32 %v3206_v4, %v3178_v1 }
 0x1c3   : > { %v3179_v6 = vpop.f32.mrb[4].mxu0 }
 0x1c4   : > { %v3180_v7 = vpop.f32.mrb[5].mxu0  ;;  %v3207_v8 = vpop.f32.mrb[4].mxu1 }
 0x1c5   : > { %v3181_v9 = vadd.f32 %v3180_v7, %v3179_v6  ;;  %v3182_v10 = vpop.f32.mrb[6].mxu0  ;;  %v3208_v11 = vpop.f32.mrb[5].mxu1 }
 0x1c6   : > { %v3183_v12 = vpop.f32.mrb[7].mxu0  ;;  %v3209_v13 = vadd.f32 %v3208_v11, %v3207_v8  ;;  %v3210_v14 = vpop.f32.mrb[6].mxu1 }
 0x1c7   : > { %v3211_v15 = vpop.f32.mrb[7].mxu1 }
 0x1c8   : > { %v2515_v16 = vadd.f32 %v3209_v13, %v3181_v9 }
 0x1db   : > { %v3229_v17 = vpop.f32.mrb[8].mxu0 }
 0x1dc   : > { %v3257_v18 = vpop.f32.mrb[8].mxu1  ;;  %v3230_v19 = vpop.f32.mrb[9].mxu0 }
 0x1dd   : > { %v3231_v20 = vadd.f32 %v3230_v19, %v3229_v17  ;;  %v3258_v21 = vpop.f32.mrb[9].mxu1  ;;  %v3232_v22 = vpop.f32.mrb[10].mxu0 }
 0x1de   : > { %v3259_v23 = vadd.f32 %v3258_v21, %v3257_v18  ;;  %v3260_v24 = vpop.f32.mrb[10].mxu1  ;;  %v3233_v25 = vpop.f32.mrb[11].mxu0 }
 0x1df   : > { %v2555_v26 = vadd.f32 %v3231_v20, %v2507_v3  ;;  %v3234_v27 = vadd.f32 %v3233_v25, %v3232_v22  ;;  %v3261_v28 = vpop.f32.mrb[11].mxu1 }
 0x1e0   : > { %v3262_v29 = vadd.f32 %v3261_v28, %v3260_v24 }
 0x1e1   : > { %v2603_v30 = vadd.f32 %v3259_v23, %v2555_v26  ;;  %v2558_v31 = vadd.f32 %v3234_v27, %v2510_v5 }
 0x1e3   : > { %v2606_v32 = vadd.f32 %v3262_v29, %v2558_v31  ;;  %v3235_v33 = vpop.f32.mrb[12].mxu0 }
 0x1e4   : > { %v3236_v34 = vpop.f32.mrb[13].mxu0  ;;  %v3263_v37 = vpop.f32.mrb[12].mxu1 }
 0x1e5   : > { %v3237_v35 = vadd.f32 %v3236_v34, %v3235_v33  ;;  %v3238_v36 = vpop.f32.mrb[14].mxu0  ;;  %v3264_v40 = vpop.f32.mrb[13].mxu1 }
 0x1e6   : > { %v3239_v38 = vpop.f32.mrb[15].mxu0  ;;  %v3265_v41 = vadd.f32 %v3264_v40, %v3263_v37  ;;  %v3266_v42 = vpop.f32.mrb[14].mxu1 }
 0x1e7   : > { %v2563_v39 = vadd.f32 %v3237_v35, %v2515_v16  ;;  %v3267_v43 = vpop.f32.mrb[15].mxu1 }
 0x1e9   : > { %v2611_v44 = vadd.f32 %v3265_v41, %v2563_v39 }
 0x1fb   : > { %v3285_v45 = vpop.f32.mrb[16].mxu0 }
 0x1fc   : > { %v3313_v46 = vpop.f32.mrb[16].mxu1  ;;  %v3286_v47 = vpop.f32.mrb[17].mxu0 }
 0x1fd   : > { %v3287_v48 = vadd.f32 %v3286_v47, %v3285_v45  ;;  %v3314_v49 = vpop.f32.mrb[17].mxu1  ;;  %v3288_v50 = vpop.f32.mrb[18].mxu0 }
 0x1fe   : > { %v3315_v51 = vadd.f32 %v3314_v49, %v3313_v46  ;;  %v3316_v52 = vpop.f32.mrb[18].mxu1  ;;  %v3289_v53 = vpop.f32.mrb[19].mxu0 }
 0x1ff   : > { %v2651_v54 = vadd.f32 %v3287_v48, %v2603_v30  ;;  %v3290_v55 = vadd.f32 %v3289_v53, %v3288_v50  ;;  %v3317_v56 = vpop.f32.mrb[19].mxu1 }
 0x200   : > { %v3318_v57 = vadd.f32 %v3317_v56, %v3316_v52 }
 0x201   : > { %v2699_v58 = vadd.f32 %v3315_v51, %v2651_v54  ;;  %v2654_v59 = vadd.f32 %v3290_v55, %v2606_v32 }
 0x203   : > { %v2702_v60 = vadd.f32 %v3318_v57, %v2654_v59  ;;  %v3291_v61 = vpop.f32.mrb[20].mxu0 }
 0x204   : > { %v3292_v62 = vpop.f32.mrb[21].mxu0  ;;  %v3319_v1 = vpop.f32.mrb[20].mxu1 }
 0x205   : > { %v3293_v63 = vadd.f32 %v3292_v62, %v3291_v61  ;;  %v3294_v0 = vpop.f32.mrb[22].mxu0  ;;  %v3320_v4 = vpop.f32.mrb[21].mxu1 }
 0x206   : > { %v3295_v2 = vpop.f32.mrb[23].mxu0  ;;  %v3321_v5 = vadd.f32 %v3320_v4, %v3319_v1  ;;  %v3322_v6 = vpop.f32.mrb[22].mxu1 }
 0x207   : > { %v2659_v3 = vadd.f32 %v3293_v63, %v2611_v44  ;;  %v3323_v7 = vpop.f32.mrb[23].mxu1 }
 0x209   : > { %v2707_v8 = vadd.f32 %v3321_v5, %v2659_v3 }
 0x21b   : > { %v3341_v9 = vpop.f32.mrb[24].mxu0 }
 0x21c   : > { %v3369_v10 = vpop.f32.mrb[24].mxu1  ;;  %v3342_v11 = vpop.f32.mrb[25].mxu0 }
 0x21d   : > { %v3343_v12 = vadd.f32 %v3342_v11, %v3341_v9  ;;  %v3370_v13 = vpop.f32.mrb[25].mxu1  ;;  %v3344_v14 = vpop.f32.mrb[26].mxu0 }
 0x21e   : > { %v3371_v15 = vadd.f32 %v3370_v13, %v3369_v10  ;;  %v3372_v16 = vpop.f32.mrb[26].mxu1  ;;  %v3345_v17 = vpop.f32.mrb[27].mxu0 }
 0x21f   : > { %v2747_v18 = vadd.f32 %v3343_v12, %v2699_v58  ;;  %v3346_v19 = vadd.f32 %v3345_v17, %v3344_v14  ;;  %v3373_v20 = vpop.f32.mrb[27].mxu1 }
 0x220   : > { %v3374_v21 = vadd.f32 %v3373_v20, %v3372_v16 }
 0x221   : > { %v2795_v22 = vadd.f32 %v3371_v15, %v2747_v18  ;;  %v2750_v23 = vadd.f32 %v3346_v19, %v2702_v60 }
 0x223   : > { %v2811_v24 = vmul.f32 0.2, %v2795_v22  ;;  %v2798_v25 = vadd.f32 %v3374_v21, %v2750_v23  ;;  %v3347_v26 = vpop.f32.mrb[28].mxu0  ;;  %vm2808_vm0 = vcmp.ge.f32.partialorder %v2795_v22, 0.0 }
 0x224   : > { %v3375_v27 = vpop.f32.mrb[28].mxu1  ;;  %v3348_v28 = vpop.f32.mrb[29].mxu0 }
 0x225   : > { %vm2809_vm1 = vcmp.ge.f32.partialorder %v2798_v25, 0.0  ;;  %v2812_v29 = vmul.f32 0.2, %v2798_v25  ;;  %v3349_v30 = vadd.f32 %v3348_v28, %v3347_v26  ;;  %v3376_v31 = vpop.f32.mrb[29].mxu1  ;;  %v3350_v32 = vpop.f32.mrb[30].mxu0  ;;  %v2814_v36 = vsel %vm2808_vm0, %v2795_v22, %v2811_v24 }
 0x226   : > { %v3377_v33 = vadd.f32 %v3376_v31, %v3375_v27  ;;  %v3378_v34 = vpop.f32.mrb[30].mxu1  ;;  %v3351_v35 = vpop.f32.mrb[31].mxu0 }
 0x227   : > { %v2815_v37 = vsel %vm2809_vm1, %v2798_v25, %v2812_v29  ;;  %v2755_v38 = vadd.f32 %v3349_v30, %v2707_v8  ;;  %v3379_v39 = vpop.f32.mrb[31].mxu1 }
 0x228   : > { %v3155_v40 = vpack.c.bf16 %v2815_v37, %v2814_v36 }
 0x229   : > { %v2803_v41 = vadd.f32 %v3377_v33, %v2755_v38 }
 0x22a   : > { %3156 = vst [vmem:[%s1230_s9] sm:$0xff] %v3155_v40   ;;  %2839 = sbr.rel (!%p3656_p6) target bundleno = 569 (0x239), region = 73 }
 0x22b   : > { %vm2810_vm2 = vcmp.ge.f32.partialorder %v2803_v41, 0.0  ;;  %v2813_v42 = vmul.f32 0.2, %v2803_v41 }
 0x22d   : > { %v2816_v43 = vsel %vm2810_vm2, %v2803_v41, %v2813_v42 }
 0x22e   : > { %v3151_v44 = vpack.c.bf16 %v2816_v43, %v2816_v43 }
 0x230   : > { %2832 = vst [vmem:[%s1230_s9 + $0x8] sm:$0x1] %v3151_v44 }
 0x231   : > { %v2860_v45 = vld [vmem:[%s1230_s9] sm:$0xf]  ;;  %v2862_v46 = vld [vmem:[%s1230_s9 + $0x4] sm:$0xf] }
 0x232   : > { %2861 = vst [vmem:[%s2844_s24] sm:$0xf] %v2860_v45  ;;  %2863 = vst [vmem:[%s2844_s24 + $0x8] sm:$0xf] %v2862_v46 }
 0x237   : > { %v2864_v47 = vld [vmem:[%s1230_s9 + $0x8] sm:$0xf] }
 0x238   : > { %2865 = vst [vmem:[%s2844_s24 + $0x10] sm:$0xf] %v2864_v47 }
 0x239 PF: > { %s12_s13 = sadd.s32 1, %s3604_s13   ;;  %s4443_s9 = smov %s3592_s10 }
 0x23a   : > { %p9_p11 = scmp.ge.s32.totalorder %s12_s13, 4   ;;  %s4444_s10 = smov %s3661_s19 }
 0x23b   : > { %s4445_s11 = smov %s3600_s12  ;;  %s4446_s12 = smov %s4448_s14 }
 0x23c   :  { %11 = sbr.rel (!%p9_p11) target bundleno = 3 (0x3), region = 148 }

// kernel: boundary_ent_discriminator.8
= control target key start
LH: loop header
LB: loop body
LE: loop exit
PB: predicated region body
PF: predicated region fallthrough
CT: control target
= control target key end

     0   :  { %s4170_s9 = smov 0   ;;  %s4172_s10 = smov 0   ;;  %s5087_s0 = inlined_call_operand.vmem [shape: bf16[8,4096], index: 0, kind: input, shape index: {}]   ;;  %s5088_s1 = inlined_call_operand.vmem [shape: bf16[4096,512], index: 1, kind: input, shape index: {}]   ;;  %s5089_s2 = inlined_call_operand.vmem [shape: bf16[8,512], index: 2, kind: output, shape index: {}]  }
   0x1   :  { %s4174_s11 = smov 0   ;;  %s4176_s12 = smov 0  }
   0x2   :  { %s4178_s13 = smov 0   ;;  %s4180_s14 = smov 0  }
   0x3   :  { %s4182_s15 = smov 0  }
   0x4 LB: > { %s24_s16 = sadd.s32 1, %s4144_s13  ;;  %s27_s17 = sadd.s32 1, %s4148_s14  ;;  %s4152_s15 = sphi %s4182_s15, %s12_s15   ;;  %s4148_s14 = sphi %s4180_s14, %s5095_s14   ;;  %s4144_s13 = sphi %s4178_s13, %s5094_s13   ;;  %s4140_s12 = sphi %s4176_s12, %s5093_s12   ;;  %s4136_s11 = sphi %s4174_s11, %s5092_s11   ;;  %s4132_s10 = sphi %s4172_s10, %s5091_s10   ;;  %s4128_s9 = sphi %s4170_s9, %s5090_s9  }
   0x5   : > { %p25_p0 = scmp.ge.s32.totalorder %s24_s16, 2  ;;  %p75_p1 = scmp.ne.s32.totalorder %s4132_s10, %s4128_s9 }
   0x6   : > { %p76_p2 = scmp.eq.s32.totalorder %s4152_s15, 0  ;;  %s68_s21 = sadd.s32 1, %s4132_s10 }
   0x7   : > { %s5097_s16 = smov (%p25_p0, %s24_s16), 0  ;;  %s5099_s17 = smov (!%p25_p0, %s27_s17), %s4148_s14 }
   0x8   : > { %p77_p3 = por %p76_p2, %p75_p1  ;;  %p29_p4 = scmp.ge.s32.totalorder %s5099_s17, 2 }
   0x9   : > { %s63_s18 = ssub.s32 %s4144_s13, %s5097_s16  ;;  %p3350_p6 = scmp.ge.s32.totalorder %s4152_s15, 4 }
   0xa   : > { %s5101_s17 = smov (%p29_p4, %s5099_s17), 0 }
   0xb   : > { %s64_s19 = ssub.s32 %s4148_s14, %s5101_s17  ;;  %129 = sbr.rel (%p3350_p6) target bundleno = 153 (0x99), region = 16 }
   0xc   : > { %s65_s20 = sor.u32 %s64_s19, %s63_s18 }
   0xd   : > { %p66_p5 = scmp.eq.s32.totalorder %s65_s20, 0 }
   0xf   : > { %s4221_s22 = scalar_select %p66_p5, %s4132_s10, %s68_s21  }
  0x12   : > { %145 = sbr.rel (!%p77_p3) target bundleno = 153 (0x99), region = 24  ;;  %s147_s23 = sand.u32 (%p77_p3), 1, %s4132_s10  }
  0x13   : > { %s3353_s24 = sshll.u32 (%p77_p3), %s4148_s14, 1  ;;  %s3351_s25 = sshll.u32 (%p77_p3), %s147_s23, 11 }
  0x14   : > { %s3639_s26 = sshll.u32 (%p77_p3), %s4144_s13, 10  ;;  %s4235_s4 = scalar_lea.vmem (%p77_p3), [#allocation3], %s3351_s25 }
  0x15   : > { %s153_s27 = sadd.s32 (%p77_p3), %s3639_s26, %s3353_s24 }
  0x16   : > { %s3355_s28 = sshll.u32 (%p77_p3), %s153_s27, 2 }
  0x17   : > { %s4230_s3 = scalar_lea.vmem (%p77_p3), %s5088_s1, %s3355_s28 }
  0x18   : > { %v693_v0 = vld [vmem:[%s4230_s3] sm:$0xff] (%p77_p3)  ;;  %v695_v1 = vld [vmem:[%s4230_s3 + $0x10] sm:$0xff] (%p77_p3) }
  0x19   : > { %v697_v2 = vld [vmem:[%s4230_s3 + $0x20] sm:$0xff]  ;;  %694 = vst [vmem:[%s4235_s4] sm:$0xff] %v693_v0  ;;  %696 = vst [vmem:[%s4235_s4 + $0x8] sm:$0xff] %v695_v1  ;;  %v699_v3 = vld [vmem:[%s4230_s3 + $0x30] sm:$0xff] }
  0x1a   : > { %698 = vst [vmem:[%s4235_s4 + $0x10] sm:$0xff] %v697_v2  ;;  %v701_v4 = vld [vmem:[%s4230_s3 + $0x40] sm:$0xff]  ;;  %v703_v5 = vld [vmem:[%s4230_s3 + $0x50] sm:$0xff]  ;;  %700 = vst [vmem:[%s4235_s4 + $0x18] sm:$0xff] %v699_v3 }
  0x1b   : > { %702 = vst [vmem:[%s4235_s4 + $0x20] sm:$0xff] %v701_v4  ;;  %704 = vst [vmem:[%s4235_s4 + $0x28] sm:$0xff] %v703_v5  ;;  %v705_v6 = vld [vmem:[%s4230_s3 + $0x60] sm:$0xff]  ;;  %v707_v7 = vld [vmem:[%s4230_s3 + $0x70] sm:$0xff] }
  0x1c   : > { %v709_v8 = vld [vmem:[%s4230_s3 + $0x80] sm:$0xff]  ;;  %706 = vst [vmem:[%s4235_s4 + $0x30] sm:$0xff] %v705_v6  ;;  %708 = vst [vmem:[%s4235_s4 + $0x38] sm:$0xff] %v707_v7  ;;  %v711_v9 = vld [vmem:[%s4230_s3 + $0x90] sm:$0xff] }
  0x1d   : > { %710 = vst [vmem:[%s4235_s4 + $0x40] sm:$0xff] %v709_v8  ;;  %v713_v10 = vld [vmem:[%s4230_s3 + $0xa0] sm:$0xff]  ;;  %v715_v11 = vld [vmem:[%s4230_s3 + $0xb0] sm:$0xff]  ;;  %712 = vst [vmem:[%s4235_s4 + $0x48] sm:$0xff] %v711_v9 }
  0x1e   : > { %714 = vst [vmem:[%s4235_s4 + $0x50] sm:$0xff] %v713_v10  ;;  %716 = vst [vmem:[%s4235_s4 + $0x58] sm:$0xff] %v715_v11  ;;  %v717_v12 = vld [vmem:[%s4230_s3 + $0xc0] sm:$0xff]  ;;  %v719_v13 = vld [vmem:[%s4230_s3 + $0xd0] sm:$0xff] }
  0x1f   : > { %v721_v14 = vld [vmem:[%s4230_s3 + $0xe0] sm:$0xff]  ;;  %718 = vst [vmem:[%s4235_s4 + $0x60] sm:$0xff] %v717_v12  ;;  %720 = vst [vmem:[%s4235_s4 + $0x68] sm:$0xff] %v719_v13  ;;  %v723_v15 = vld [vmem:[%s4230_s3 + $0xf0] sm:$0xff] }
  0x20   : > { %722 = vst [vmem:[%s4235_s4 + $0x70] sm:$0xff] %v721_v14  ;;  %v725_v16 = vld [vmem:[%s4230_s3 + $0x100] sm:$0xff]  ;;  %v727_v17 = vld [vmem:[%s4230_s3 + $0x110] sm:$0xff]  ;;  %724 = vst [vmem:[%s4235_s4 + $0x78] sm:$0xff] %v723_v15 }
  0x21   : > { %726 = vst [vmem:[%s4235_s4 + $0x80] sm:$0xff] %v725_v16  ;;  %728 = vst [vmem:[%s4235_s4 + $0x88] sm:$0xff] %v727_v17  ;;  %v729_v18 = vld [vmem:[%s4230_s3 + $0x120] sm:$0xff]  ;;  %v731_v19 = vld [vmem:[%s4230_s3 + $0x130] sm:$0xff] }
  0x22   : > { %v733_v20 = vld [vmem:[%s4230_s3 + $0x140] sm:$0xff]  ;;  %730 = vst [vmem:[%s4235_s4 + $0x90] sm:$0xff] %v729_v18  ;;  %732 = vst [vmem:[%s4235_s4 + $0x98] sm:$0xff] %v731_v19  ;;  %v735_v21 = vld [vmem:[%s4230_s3 + $0x150] sm:$0xff] }
  0x23   : > { %734 = vst [vmem:[%s4235_s4 + $0xa0] sm:$0xff] %v733_v20  ;;  %v737_v22 = vld [vmem:[%s4230_s3 + $0x160] sm:$0xff]  ;;  %v739_v23 = vld [vmem:[%s4230_s3 + $0x170] sm:$0xff]  ;;  %736 = vst [vmem:[%s4235_s4 + $0xa8] sm:$0xff] %v735_v21 }
  0x24   : > { %738 = vst [vmem:[%s4235_s4 + $0xb0] sm:$0xff] %v737_v22  ;;  %740 = vst [vmem:[%s4235_s4 + $0xb8] sm:$0xff] %v739_v23  ;;  %v741_v24 = vld [vmem:[%s4230_s3 + $0x180] sm:$0xff]  ;;  %v743_v25 = vld [vmem:[%s4230_s3 + $0x190] sm:$0xff] }
  0x25   : > { %v745_v26 = vld [vmem:[%s4230_s3 + $0x1a0] sm:$0xff]  ;;  %742 = vst [vmem:[%s4235_s4 + $0xc0] sm:$0xff] %v741_v24  ;;  %744 = vst [vmem:[%s4235_s4 + $0xc8] sm:$0xff] %v743_v25  ;;  %v747_v27 = vld [vmem:[%s4230_s3 + $0x1b0] sm:$0xff] }
  0x26   : > { %746 = vst [vmem:[%s4235_s4 + $0xd0] sm:$0xff] %v745_v26  ;;  %v749_v28 = vld [vmem:[%s4230_s3 + $0x1c0] sm:$0xff]  ;;  %v751_v29 = vld [vmem:[%s4230_s3 + $0x1d0] sm:$0xff]  ;;  %748 = vst [vmem:[%s4235_s4 + $0xd8] sm:$0xff] %v747_v27 }
  0x27   : > { %750 = vst [vmem:[%s4235_s4 + $0xe0] sm:$0xff] %v749_v28  ;;  %752 = vst [vmem:[%s4235_s4 + $0xe8] sm:$0xff] %v751_v29  ;;  %v753_v30 = vld [vmem:[%s4230_s3 + $0x1e0] sm:$0xff]  ;;  %v755_v31 = vld [vmem:[%s4230_s3 + $0x1f0] sm:$0xff] }
  0x28   : > { %v757_v32 = vld [vmem:[%s4230_s3 + $0x200] sm:$0xff]  ;;  %754 = vst [vmem:[%s4235_s4 + $0xf0] sm:$0xff] %v753_v30  ;;  %756 = vst [vmem:[%s4235_s4 + $0xf8] sm:$0xff] %v755_v31  ;;  %v759_v33 = vld [vmem:[%s4230_s3 + $0x210] sm:$0xff] }
  0x29   : > { %758 = vst [vmem:[%s4235_s4 + $0x100] sm:$0xff] %v757_v32  ;;  %v761_v34 = vld [vmem:[%s4230_s3 + $0x220] sm:$0xff]  ;;  %v763_v35 = vld [vmem:[%s4230_s3 + $0x230] sm:$0xff]  ;;  %760 = vst [vmem:[%s4235_s4 + $0x108] sm:$0xff] %v759_v33 }
  0x2a   : > { %762 = vst [vmem:[%s4235_s4 + $0x110] sm:$0xff] %v761_v34  ;;  %764 = vst [vmem:[%s4235_s4 + $0x118] sm:$0xff] %v763_v35  ;;  %v765_v36 = vld [vmem:[%s4230_s3 + $0x240] sm:$0xff]  ;;  %v767_v37 = vld [vmem:[%s4230_s3 + $0x250] sm:$0xff] }
  0x2b   : > { %v769_v38 = vld [vmem:[%s4230_s3 + $0x260] sm:$0xff]  ;;  %766 = vst [vmem:[%s4235_s4 + $0x120] sm:$0xff] %v765_v36  ;;  %768 = vst [vmem:[%s4235_s4 + $0x128] sm:$0xff] %v767_v37  ;;  %v771_v39 = vld [vmem:[%s4230_s3 + $0x270] sm:$0xff] }
  0x2c   : > { %770 = vst [vmem:[%s4235_s4 + $0x130] sm:$0xff] %v769_v38  ;;  %v773_v40 = vld [vmem:[%s4230_s3 + $0x280] sm:$0xff]  ;;  %v775_v41 = vld [vmem:[%s4230_s3 + $0x290] sm:$0xff]  ;;  %772 = vst [vmem:[%s4235_s4 + $0x138] sm:$0xff] %v771_v39 }
  0x2d   : > { %774 = vst [vmem:[%s4235_s4 + $0x140] sm:$0xff] %v773_v40  ;;  %776 = vst [vmem:[%s4235_s4 + $0x148] sm:$0xff] %v775_v41  ;;  %v777_v42 = vld [vmem:[%s4230_s3 + $0x2a0] sm:$0xff]  ;;  %v779_v43 = vld [vmem:[%s4230_s3 + $0x2b0] sm:$0xff] }
  0x2e   : > { %v781_v44 = vld [vmem:[%s4230_s3 + $0x2c0] sm:$0xff]  ;;  %778 = vst [vmem:[%s4235_s4 + $0x150] sm:$0xff] %v777_v42  ;;  %780 = vst [vmem:[%s4235_s4 + $0x158] sm:$0xff] %v779_v43  ;;  %v783_v45 = vld [vmem:[%s4230_s3 + $0x2d0] sm:$0xff] }
  0x2f   : > { %782 = vst [vmem:[%s4235_s4 + $0x160] sm:$0xff] %v781_v44  ;;  %v785_v46 = vld [vmem:[%s4230_s3 + $0x2e0] sm:$0xff]  ;;  %v787_v47 = vld [vmem:[%s4230_s3 + $0x2f0] sm:$0xff]  ;;  %784 = vst [vmem:[%s4235_s4 + $0x168] sm:$0xff] %v783_v45 }
  0x30   : > { %786 = vst [vmem:[%s4235_s4 + $0x170] sm:$0xff] %v785_v46  ;;  %788 = vst [vmem:[%s4235_s4 + $0x178] sm:$0xff] %v787_v47  ;;  %v789_v48 = vld [vmem:[%s4230_s3 + $0x300] sm:$0xff]  ;;  %v791_v49 = vld [vmem:[%s4230_s3 + $0x310] sm:$0xff] }
  0x31   : > { %v793_v50 = vld [vmem:[%s4230_s3 + $0x320] sm:$0xff]  ;;  %790 = vst [vmem:[%s4235_s4 + $0x180] sm:$0xff] %v789_v48  ;;  %792 = vst [vmem:[%s4235_s4 + $0x188] sm:$0xff] %v791_v49  ;;  %v795_v51 = vld [vmem:[%s4230_s3 + $0x330] sm:$0xff] }
  0x32   : > { %794 = vst [vmem:[%s4235_s4 + $0x190] sm:$0xff] %v793_v50  ;;  %v797_v52 = vld [vmem:[%s4230_s3 + $0x340] sm:$0xff]  ;;  %v799_v53 = vld [vmem:[%s4230_s3 + $0x350] sm:$0xff]  ;;  %796 = vst [vmem:[%s4235_s4 + $0x198] sm:$0xff] %v795_v51 }
  0x33   : > { %798 = vst [vmem:[%s4235_s4 + $0x1a0] sm:$0xff] %v797_v52  ;;  %800 = vst [vmem:[%s4235_s4 + $0x1a8] sm:$0xff] %v799_v53  ;;  %v801_v54 = vld [vmem:[%s4230_s3 + $0x360] sm:$0xff]  ;;  %v803_v55 = vld [vmem:[%s4230_s3 + $0x370] sm:$0xff] }
  0x34   : > { %v805_v56 = vld [vmem:[%s4230_s3 + $0x380] sm:$0xff]  ;;  %802 = vst [vmem:[%s4235_s4 + $0x1b0] sm:$0xff] %v801_v54  ;;  %804 = vst [vmem:[%s4235_s4 + $0x1b8] sm:$0xff] %v803_v55  ;;  %v807_v57 = vld [vmem:[%s4230_s3 + $0x390] sm:$0xff] }
  0x35   : > { %806 = vst [vmem:[%s4235_s4 + $0x1c0] sm:$0xff] %v805_v56  ;;  %v809_v58 = vld [vmem:[%s4230_s3 + $0x3a0] sm:$0xff]  ;;  %v811_v59 = vld [vmem:[%s4230_s3 + $0x3b0] sm:$0xff]  ;;  %808 = vst [vmem:[%s4235_s4 + $0x1c8] sm:$0xff] %v807_v57 }
  0x36   : > { %810 = vst [vmem:[%s4235_s4 + $0x1d0] sm:$0xff] %v809_v58  ;;  %812 = vst [vmem:[%s4235_s4 + $0x1d8] sm:$0xff] %v811_v59  ;;  %v813_v60 = vld [vmem:[%s4230_s3 + $0x3c0] sm:$0xff]  ;;  %v815_v61 = vld [vmem:[%s4230_s3 + $0x3d0] sm:$0xff] }
  0x37   : > { %v817_v62 = vld [vmem:[%s4230_s3 + $0x3e0] sm:$0xff]  ;;  %814 = vst [vmem:[%s4235_s4 + $0x1e0] sm:$0xff] %v813_v60  ;;  %816 = vst [vmem:[%s4235_s4 + $0x1e8] sm:$0xff] %v815_v61  ;;  %v819_v63 = vld [vmem:[%s4230_s3 + $0x3f0] sm:$0xff] }
  0x38   : > { %818 = vst [vmem:[%s4235_s4 + $0x1f0] sm:$0xff] %v817_v62  ;;  %v821_v0 = vld [vmem:[%s4230_s3 + $0x400] sm:$0xff]  ;;  %v823_v1 = vld [vmem:[%s4230_s3 + $0x410] sm:$0xff]  ;;  %820 = vst [vmem:[%s4235_s4 + $0x1f8] sm:$0xff] %v819_v63 }
  0x39   : > { %822 = vst [vmem:[%s4235_s4 + $0x200] sm:$0xff] %v821_v0  ;;  %824 = vst [vmem:[%s4235_s4 + $0x208] sm:$0xff] %v823_v1  ;;  %v825_v2 = vld [vmem:[%s4230_s3 + $0x420] sm:$0xff]  ;;  %v827_v3 = vld [vmem:[%s4230_s3 + $0x430] sm:$0xff] }
  0x3a   : > { %v829_v4 = vld [vmem:[%s4230_s3 + $0x440] sm:$0xff]  ;;  %826 = vst [vmem:[%s4235_s4 + $0x210] sm:$0xff] %v825_v2  ;;  %828 = vst [vmem:[%s4235_s4 + $0x218] sm:$0xff] %v827_v3  ;;  %v831_v5 = vld [vmem:[%s4230_s3 + $0x450] sm:$0xff] }
  0x3b   : > { %830 = vst [vmem:[%s4235_s4 + $0x220] sm:$0xff] %v829_v4  ;;  %v833_v6 = vld [vmem:[%s4230_s3 + $0x460] sm:$0xff]  ;;  %v835_v7 = vld [vmem:[%s4230_s3 + $0x470] sm:$0xff]  ;;  %832 = vst [vmem:[%s4235_s4 + $0x228] sm:$0xff] %v831_v5 }
  0x3c   : > { %834 = vst [vmem:[%s4235_s4 + $0x230] sm:$0xff] %v833_v6  ;;  %836 = vst [vmem:[%s4235_s4 + $0x238] sm:$0xff] %v835_v7  ;;  %v837_v8 = vld [vmem:[%s4230_s3 + $0x480] sm:$0xff]  ;;  %v839_v9 = vld [vmem:[%s4230_s3 + $0x490] sm:$0xff] }
  0x3d   : > { %v841_v10 = vld [vmem:[%s4230_s3 + $0x4a0] sm:$0xff]  ;;  %838 = vst [vmem:[%s4235_s4 + $0x240] sm:$0xff] %v837_v8  ;;  %840 = vst [vmem:[%s4235_s4 + $0x248] sm:$0xff] %v839_v9  ;;  %v843_v11 = vld [vmem:[%s4230_s3 + $0x4b0] sm:$0xff] }
  0x3e   : > { %842 = vst [vmem:[%s4235_s4 + $0x250] sm:$0xff] %v841_v10  ;;  %v845_v12 = vld [vmem:[%s4230_s3 + $0x4c0] sm:$0xff]  ;;  %v847_v13 = vld [vmem:[%s4230_s3 + $0x4d0] sm:$0xff]  ;;  %844 = vst [vmem:[%s4235_s4 + $0x258] sm:$0xff] %v843_v11 }
  0x3f   : > { %846 = vst [vmem:[%s4235_s4 + $0x260] sm:$0xff] %v845_v12  ;;  %848 = vst [vmem:[%s4235_s4 + $0x268] sm:$0xff] %v847_v13  ;;  %v849_v14 = vld [vmem:[%s4230_s3 + $0x4e0] sm:$0xff]  ;;  %v851_v15 = vld [vmem:[%s4230_s3 + $0x4f0] sm:$0xff] }
  0x40   : > { %v853_v16 = vld [vmem:[%s4230_s3 + $0x500] sm:$0xff]  ;;  %850 = vst [vmem:[%s4235_s4 + $0x270] sm:$0xff] %v849_v14  ;;  %852 = vst [vmem:[%s4235_s4 + $0x278] sm:$0xff] %v851_v15  ;;  %v855_v17 = vld [vmem:[%s4230_s3 + $0x510] sm:$0xff] }
  0x41   : > { %854 = vst [vmem:[%s4235_s4 + $0x280] sm:$0xff] %v853_v16  ;;  %v857_v18 = vld [vmem:[%s4230_s3 + $0x520] sm:$0xff]  ;;  %v859_v19 = vld [vmem:[%s4230_s3 + $0x530] sm:$0xff]  ;;  %856 = vst [vmem:[%s4235_s4 + $0x288] sm:$0xff] %v855_v17 }
  0x42   : > { %858 = vst [vmem:[%s4235_s4 + $0x290] sm:$0xff] %v857_v18  ;;  %860 = vst [vmem:[%s4235_s4 + $0x298] sm:$0xff] %v859_v19  ;;  %v861_v20 = vld [vmem:[%s4230_s3 + $0x540] sm:$0xff]  ;;  %v863_v21 = vld [vmem:[%s4230_s3 + $0x550] sm:$0xff] }
  0x43   : > { %v865_v22 = vld [vmem:[%s4230_s3 + $0x560] sm:$0xff]  ;;  %862 = vst [vmem:[%s4235_s4 + $0x2a0] sm:$0xff] %v861_v20  ;;  %864 = vst [vmem:[%s4235_s4 + $0x2a8] sm:$0xff] %v863_v21  ;;  %v867_v23 = vld [vmem:[%s4230_s3 + $0x570] sm:$0xff] }
  0x44   : > { %866 = vst [vmem:[%s4235_s4 + $0x2b0] sm:$0xff] %v865_v22  ;;  %v869_v24 = vld [vmem:[%s4230_s3 + $0x580] sm:$0xff]  ;;  %v871_v25 = vld [vmem:[%s4230_s3 + $0x590] sm:$0xff]  ;;  %868 = vst [vmem:[%s4235_s4 + $0x2b8] sm:$0xff] %v867_v23 }
  0x45   : > { %870 = vst [vmem:[%s4235_s4 + $0x2c0] sm:$0xff] %v869_v24  ;;  %872 = vst [vmem:[%s4235_s4 + $0x2c8] sm:$0xff] %v871_v25  ;;  %v873_v26 = vld [vmem:[%s4230_s3 + $0x5a0] sm:$0xff]  ;;  %v875_v27 = vld [vmem:[%s4230_s3 + $0x5b0] sm:$0xff] }
  0x46   : > { %v877_v28 = vld [vmem:[%s4230_s3 + $0x5c0] sm:$0xff]  ;;  %874 = vst [vmem:[%s4235_s4 + $0x2d0] sm:$0xff] %v873_v26  ;;  %876 = vst [vmem:[%s4235_s4 + $0x2d8] sm:$0xff] %v875_v27  ;;  %v879_v29 = vld [vmem:[%s4230_s3 + $0x5d0] sm:$0xff] }
  0x47   : > { %878 = vst [vmem:[%s4235_s4 + $0x2e0] sm:$0xff] %v877_v28  ;;  %v881_v30 = vld [vmem:[%s4230_s3 + $0x5e0] sm:$0xff]  ;;  %v883_v31 = vld [vmem:[%s4230_s3 + $0x5f0] sm:$0xff]  ;;  %880 = vst [vmem:[%s4235_s4 + $0x2e8] sm:$0xff] %v879_v29 }
  0x48   : > { %882 = vst [vmem:[%s4235_s4 + $0x2f0] sm:$0xff] %v881_v30  ;;  %884 = vst [vmem:[%s4235_s4 + $0x2f8] sm:$0xff] %v883_v31  ;;  %v885_v32 = vld [vmem:[%s4230_s3 + $0x600] sm:$0xff]  ;;  %v887_v33 = vld [vmem:[%s4230_s3 + $0x610] sm:$0xff] }
  0x49   : > { %v889_v34 = vld [vmem:[%s4230_s3 + $0x620] sm:$0xff]  ;;  %886 = vst [vmem:[%s4235_s4 + $0x300] sm:$0xff] %v885_v32  ;;  %888 = vst [vmem:[%s4235_s4 + $0x308] sm:$0xff] %v887_v33  ;;  %v891_v35 = vld [vmem:[%s4230_s3 + $0x630] sm:$0xff] }
  0x4a   : > { %890 = vst [vmem:[%s4235_s4 + $0x310] sm:$0xff] %v889_v34  ;;  %v893_v36 = vld [vmem:[%s4230_s3 + $0x640] sm:$0xff]  ;;  %v895_v37 = vld [vmem:[%s4230_s3 + $0x650] sm:$0xff]  ;;  %892 = vst [vmem:[%s4235_s4 + $0x318] sm:$0xff] %v891_v35 }
  0x4b   : > { %894 = vst [vmem:[%s4235_s4 + $0x320] sm:$0xff] %v893_v36  ;;  %896 = vst [vmem:[%s4235_s4 + $0x328] sm:$0xff] %v895_v37  ;;  %v897_v38 = vld [vmem:[%s4230_s3 + $0x660] sm:$0xff]  ;;  %v899_v39 = vld [vmem:[%s4230_s3 + $0x670] sm:$0xff] }
  0x4c   : > { %v901_v40 = vld [vmem:[%s4230_s3 + $0x680] sm:$0xff]  ;;  %898 = vst [vmem:[%s4235_s4 + $0x330] sm:$0xff] %v897_v38  ;;  %900 = vst [vmem:[%s4235_s4 + $0x338] sm:$0xff] %v899_v39  ;;  %v903_v41 = vld [vmem:[%s4230_s3 + $0x690] sm:$0xff] }
  0x4d   : > { %902 = vst [vmem:[%s4235_s4 + $0x340] sm:$0xff] %v901_v40  ;;  %v905_v42 = vld [vmem:[%s4230_s3 + $0x6a0] sm:$0xff]  ;;  %v907_v43 = vld [vmem:[%s4230_s3 + $0x6b0] sm:$0xff]  ;;  %904 = vst [vmem:[%s4235_s4 + $0x348] sm:$0xff] %v903_v41 }
  0x4e   : > { %906 = vst [vmem:[%s4235_s4 + $0x350] sm:$0xff] %v905_v42  ;;  %908 = vst [vmem:[%s4235_s4 + $0x358] sm:$0xff] %v907_v43  ;;  %v909_v44 = vld [vmem:[%s4230_s3 + $0x6c0] sm:$0xff]  ;;  %v911_v45 = vld [vmem:[%s4230_s3 + $0x6d0] sm:$0xff] }
  0x4f   : > { %v913_v46 = vld [vmem:[%s4230_s3 + $0x6e0] sm:$0xff]  ;;  %910 = vst [vmem:[%s4235_s4 + $0x360] sm:$0xff] %v909_v44  ;;  %912 = vst [vmem:[%s4235_s4 + $0x368] sm:$0xff] %v911_v45  ;;  %v915_v47 = vld [vmem:[%s4230_s3 + $0x6f0] sm:$0xff] }
  0x50   : > { %914 = vst [vmem:[%s4235_s4 + $0x370] sm:$0xff] %v913_v46  ;;  %v917_v48 = vld [vmem:[%s4230_s3 + $0x700] sm:$0xff]  ;;  %v919_v49 = vld [vmem:[%s4230_s3 + $0x710] sm:$0xff]  ;;  %916 = vst [vmem:[%s4235_s4 + $0x378] sm:$0xff] %v915_v47 }
  0x51   : > { %918 = vst [vmem:[%s4235_s4 + $0x380] sm:$0xff] %v917_v48  ;;  %920 = vst [vmem:[%s4235_s4 + $0x388] sm:$0xff] %v919_v49  ;;  %v921_v50 = vld [vmem:[%s4230_s3 + $0x720] sm:$0xff]  ;;  %v923_v51 = vld [vmem:[%s4230_s3 + $0x730] sm:$0xff] }
  0x52   : > { %v925_v52 = vld [vmem:[%s4230_s3 + $0x740] sm:$0xff]  ;;  %922 = vst [vmem:[%s4235_s4 + $0x390] sm:$0xff] %v921_v50  ;;  %924 = vst [vmem:[%s4235_s4 + $0x398] sm:$0xff] %v923_v51  ;;  %v927_v53 = vld [vmem:[%s4230_s3 + $0x750] sm:$0xff] }
  0x53   : > { %926 = vst [vmem:[%s4235_s4 + $0x3a0] sm:$0xff] %v925_v52  ;;  %v929_v54 = vld [vmem:[%s4230_s3 + $0x760] sm:$0xff]  ;;  %v931_v55 = vld [vmem:[%s4230_s3 + $0x770] sm:$0xff]  ;;  %928 = vst [vmem:[%s4235_s4 + $0x3a8] sm:$0xff] %v927_v53 }
  0x54   : > { %930 = vst [vmem:[%s4235_s4 + $0x3b0] sm:$0xff] %v929_v54  ;;  %932 = vst [vmem:[%s4235_s4 + $0x3b8] sm:$0xff] %v931_v55  ;;  %v933_v56 = vld [vmem:[%s4230_s3 + $0x780] sm:$0xff]  ;;  %v935_v57 = vld [vmem:[%s4230_s3 + $0x790] sm:$0xff] }
  0x55   : > { %v937_v58 = vld [vmem:[%s4230_s3 + $0x7a0] sm:$0xff]  ;;  %934 = vst [vmem:[%s4235_s4 + $0x3c0] sm:$0xff] %v933_v56  ;;  %936 = vst [vmem:[%s4235_s4 + $0x3c8] sm:$0xff] %v935_v57  ;;  %v939_v59 = vld [vmem:[%s4230_s3 + $0x7b0] sm:$0xff] }
  0x56   : > { %938 = vst [vmem:[%s4235_s4 + $0x3d0] sm:$0xff] %v937_v58  ;;  %v941_v60 = vld [vmem:[%s4230_s3 + $0x7c0] sm:$0xff]  ;;  %v943_v61 = vld [vmem:[%s4230_s3 + $0x7d0] sm:$0xff]  ;;  %940 = vst [vmem:[%s4235_s4 + $0x3d8] sm:$0xff] %v939_v59 }
  0x57   : > { %942 = vst [vmem:[%s4235_s4 + $0x3e0] sm:$0xff] %v941_v60  ;;  %944 = vst [vmem:[%s4235_s4 + $0x3e8] sm:$0xff] %v943_v61  ;;  %v945_v62 = vld [vmem:[%s4230_s3 + $0x7e0] sm:$0xff]  ;;  %v947_v63 = vld [vmem:[%s4230_s3 + $0x7f0] sm:$0xff] }
  0x58   : > { %v949_v0 = vld [vmem:[%s4230_s3 + $0x800] sm:$0xff]  ;;  %946 = vst [vmem:[%s4235_s4 + $0x3f0] sm:$0xff] %v945_v62  ;;  %948 = vst [vmem:[%s4235_s4 + $0x3f8] sm:$0xff] %v947_v63  ;;  %v951_v1 = vld [vmem:[%s4230_s3 + $0x810] sm:$0xff] }
  0x59   : > { %950 = vst [vmem:[%s4235_s4 + $0x400] sm:$0xff] %v949_v0  ;;  %v953_v2 = vld [vmem:[%s4230_s3 + $0x820] sm:$0xff]  ;;  %v955_v3 = vld [vmem:[%s4230_s3 + $0x830] sm:$0xff]  ;;  %952 = vst [vmem:[%s4235_s4 + $0x408] sm:$0xff] %v951_v1 }
  0x5a   : > { %954 = vst [vmem:[%s4235_s4 + $0x410] sm:$0xff] %v953_v2  ;;  %956 = vst [vmem:[%s4235_s4 + $0x418] sm:$0xff] %v955_v3  ;;  %v957_v4 = vld [vmem:[%s4230_s3 + $0x840] sm:$0xff]  ;;  %v959_v5 = vld [vmem:[%s4230_s3 + $0x850] sm:$0xff] }
  0x5b   : > { %v961_v6 = vld [vmem:[%s4230_s3 + $0x860] sm:$0xff]  ;;  %958 = vst [vmem:[%s4235_s4 + $0x420] sm:$0xff] %v957_v4  ;;  %960 = vst [vmem:[%s4235_s4 + $0x428] sm:$0xff] %v959_v5  ;;  %v963_v7 = vld [vmem:[%s4230_s3 + $0x870] sm:$0xff] }
  0x5c   : > { %962 = vst [vmem:[%s4235_s4 + $0x430] sm:$0xff] %v961_v6  ;;  %v965_v8 = vld [vmem:[%s4230_s3 + $0x880] sm:$0xff]  ;;  %v967_v9 = vld [vmem:[%s4230_s3 + $0x890] sm:$0xff]  ;;  %964 = vst [vmem:[%s4235_s4 + $0x438] sm:$0xff] %v963_v7 }
  0x5d   : > { %966 = vst [vmem:[%s4235_s4 + $0x440] sm:$0xff] %v965_v8  ;;  %968 = vst [vmem:[%s4235_s4 + $0x448] sm:$0xff] %v967_v9  ;;  %v969_v10 = vld [vmem:[%s4230_s3 + $0x8a0] sm:$0xff]  ;;  %v971_v11 = vld [vmem:[%s4230_s3 + $0x8b0] sm:$0xff] }
  0x5e   : > { %v973_v12 = vld [vmem:[%s4230_s3 + $0x8c0] sm:$0xff]  ;;  %970 = vst [vmem:[%s4235_s4 + $0x450] sm:$0xff] %v969_v10  ;;  %972 = vst [vmem:[%s4235_s4 + $0x458] sm:$0xff] %v971_v11  ;;  %v975_v13 = vld [vmem:[%s4230_s3 + $0x8d0] sm:$0xff] }
  0x5f   : > { %974 = vst [vmem:[%s4235_s4 + $0x460] sm:$0xff] %v973_v12  ;;  %v977_v14 = vld [vmem:[%s4230_s3 + $0x8e0] sm:$0xff]  ;;  %v979_v15 = vld [vmem:[%s4230_s3 + $0x8f0] sm:$0xff]  ;;  %976 = vst [vmem:[%s4235_s4 + $0x468] sm:$0xff] %v975_v13 }
  0x60   : > { %978 = vst [vmem:[%s4235_s4 + $0x470] sm:$0xff] %v977_v14  ;;  %980 = vst [vmem:[%s4235_s4 + $0x478] sm:$0xff] %v979_v15  ;;  %v981_v16 = vld [vmem:[%s4230_s3 + $0x900] sm:$0xff]  ;;  %v983_v17 = vld [vmem:[%s4230_s3 + $0x910] sm:$0xff] }
  0x61   : > { %v985_v18 = vld [vmem:[%s4230_s3 + $0x920] sm:$0xff]  ;;  %982 = vst [vmem:[%s4235_s4 + $0x480] sm:$0xff] %v981_v16  ;;  %984 = vst [vmem:[%s4235_s4 + $0x488] sm:$0xff] %v983_v17  ;;  %v987_v19 = vld [vmem:[%s4230_s3 + $0x930] sm:$0xff] }
  0x62   : > { %986 = vst [vmem:[%s4235_s4 + $0x490] sm:$0xff] %v985_v18  ;;  %v989_v20 = vld [vmem:[%s4230_s3 + $0x940] sm:$0xff]  ;;  %v991_v21 = vld [vmem:[%s4230_s3 + $0x950] sm:$0xff]  ;;  %988 = vst [vmem:[%s4235_s4 + $0x498] sm:$0xff] %v987_v19 }
  0x63   : > { %990 = vst [vmem:[%s4235_s4 + $0x4a0] sm:$0xff] %v989_v20  ;;  %992 = vst [vmem:[%s4235_s4 + $0x4a8] sm:$0xff] %v991_v21  ;;  %v993_v22 = vld [vmem:[%s4230_s3 + $0x960] sm:$0xff]  ;;  %v995_v23 = vld [vmem:[%s4230_s3 + $0x970] sm:$0xff] }
  0x64   : > { %v997_v24 = vld [vmem:[%s4230_s3 + $0x980] sm:$0xff]  ;;  %994 = vst [vmem:[%s4235_s4 + $0x4b0] sm:$0xff] %v993_v22  ;;  %996 = vst [vmem:[%s4235_s4 + $0x4b8] sm:$0xff] %v995_v23  ;;  %v999_v25 = vld [vmem:[%s4230_s3 + $0x990] sm:$0xff] }
  0x65   : > { %998 = vst [vmem:[%s4235_s4 + $0x4c0] sm:$0xff] %v997_v24  ;;  %v1001_v26 = vld [vmem:[%s4230_s3 + $0x9a0] sm:$0xff]  ;;  %v1003_v27 = vld [vmem:[%s4230_s3 + $0x9b0] sm:$0xff]  ;;  %1000 = vst [vmem:[%s4235_s4 + $0x4c8] sm:$0xff] %v999_v25 }
  0x66   : > { %1002 = vst [vmem:[%s4235_s4 + $0x4d0] sm:$0xff] %v1001_v26  ;;  %1004 = vst [vmem:[%s4235_s4 + $0x4d8] sm:$0xff] %v1003_v27  ;;  %v1005_v28 = vld [vmem:[%s4230_s3 + $0x9c0] sm:$0xff]  ;;  %v1007_v29 = vld [vmem:[%s4230_s3 + $0x9d0] sm:$0xff] }
  0x67   : > { %v1009_v30 = vld [vmem:[%s4230_s3 + $0x9e0] sm:$0xff]  ;;  %1006 = vst [vmem:[%s4235_s4 + $0x4e0] sm:$0xff] %v1005_v28  ;;  %1008 = vst [vmem:[%s4235_s4 + $0x4e8] sm:$0xff] %v1007_v29  ;;  %v1011_v31 = vld [vmem:[%s4230_s3 + $0x9f0] sm:$0xff] }
  0x68   : > { %1010 = vst [vmem:[%s4235_s4 + $0x4f0] sm:$0xff] %v1009_v30  ;;  %v1013_v32 = vld [vmem:[%s4230_s3 + $0xa00] sm:$0xff]  ;;  %v1015_v33 = vld [vmem:[%s4230_s3 + $0xa10] sm:$0xff]  ;;  %1012 = vst [vmem:[%s4235_s4 + $0x4f8] sm:$0xff] %v1011_v31 }
  0x69   : > { %1014 = vst [vmem:[%s4235_s4 + $0x500] sm:$0xff] %v1013_v32  ;;  %1016 = vst [vmem:[%s4235_s4 + $0x508] sm:$0xff] %v1015_v33  ;;  %v1017_v34 = vld [vmem:[%s4230_s3 + $0xa20] sm:$0xff]  ;;  %v1019_v35 = vld [vmem:[%s4230_s3 + $0xa30] sm:$0xff] }
  0x6a   : > { %v1021_v36 = vld [vmem:[%s4230_s3 + $0xa40] sm:$0xff]  ;;  %1018 = vst [vmem:[%s4235_s4 + $0x510] sm:$0xff] %v1017_v34  ;;  %1020 = vst [vmem:[%s4235_s4 + $0x518] sm:$0xff] %v1019_v35  ;;  %v1023_v37 = vld [vmem:[%s4230_s3 + $0xa50] sm:$0xff] }
  0x6b   : > { %1022 = vst [vmem:[%s4235_s4 + $0x520] sm:$0xff] %v1021_v36  ;;  %v1025_v38 = vld [vmem:[%s4230_s3 + $0xa60] sm:$0xff]  ;;  %v1027_v39 = vld [vmem:[%s4230_s3 + $0xa70] sm:$0xff]  ;;  %1024 = vst [vmem:[%s4235_s4 + $0x528] sm:$0xff] %v1023_v37 }
  0x6c   : > { %1026 = vst [vmem:[%s4235_s4 + $0x530] sm:$0xff] %v1025_v38  ;;  %1028 = vst [vmem:[%s4235_s4 + $0x538] sm:$0xff] %v1027_v39  ;;  %v1029_v40 = vld [vmem:[%s4230_s3 + $0xa80] sm:$0xff]  ;;  %v1031_v41 = vld [vmem:[%s4230_s3 + $0xa90] sm:$0xff] }
  0x6d   : > { %v1033_v42 = vld [vmem:[%s4230_s3 + $0xaa0] sm:$0xff]  ;;  %1030 = vst [vmem:[%s4235_s4 + $0x540] sm:$0xff] %v1029_v40  ;;  %1032 = vst [vmem:[%s4235_s4 + $0x548] sm:$0xff] %v1031_v41  ;;  %v1035_v43 = vld [vmem:[%s4230_s3 + $0xab0] sm:$0xff] }
  0x6e   : > { %1034 = vst [vmem:[%s4235_s4 + $0x550] sm:$0xff] %v1033_v42  ;;  %v1037_v44 = vld [vmem:[%s4230_s3 + $0xac0] sm:$0xff]  ;;  %v1039_v45 = vld [vmem:[%s4230_s3 + $0xad0] sm:$0xff]  ;;  %1036 = vst [vmem:[%s4235_s4 + $0x558] sm:$0xff] %v1035_v43 }
  0x6f   : > { %1038 = vst [vmem:[%s4235_s4 + $0x560] sm:$0xff] %v1037_v44  ;;  %1040 = vst [vmem:[%s4235_s4 + $0x568] sm:$0xff] %v1039_v45  ;;  %v1041_v46 = vld [vmem:[%s4230_s3 + $0xae0] sm:$0xff]  ;;  %v1043_v47 = vld [vmem:[%s4230_s3 + $0xaf0] sm:$0xff] }
  0x70   : > { %v1045_v48 = vld [vmem:[%s4230_s3 + $0xb00] sm:$0xff]  ;;  %1042 = vst [vmem:[%s4235_s4 + $0x570] sm:$0xff] %v1041_v46  ;;  %1044 = vst [vmem:[%s4235_s4 + $0x578] sm:$0xff] %v1043_v47  ;;  %v1047_v49 = vld [vmem:[%s4230_s3 + $0xb10] sm:$0xff] }
  0x71   : > { %1046 = vst [vmem:[%s4235_s4 + $0x580] sm:$0xff] %v1045_v48  ;;  %v1049_v50 = vld [vmem:[%s4230_s3 + $0xb20] sm:$0xff]  ;;  %v1051_v51 = vld [vmem:[%s4230_s3 + $0xb30] sm:$0xff]  ;;  %1048 = vst [vmem:[%s4235_s4 + $0x588] sm:$0xff] %v1047_v49 }
  0x72   : > { %1050 = vst [vmem:[%s4235_s4 + $0x590] sm:$0xff] %v1049_v50  ;;  %1052 = vst [vmem:[%s4235_s4 + $0x598] sm:$0xff] %v1051_v51  ;;  %v1053_v52 = vld [vmem:[%s4230_s3 + $0xb40] sm:$0xff]  ;;  %v1055_v53 = vld [vmem:[%s4230_s3 + $0xb50] sm:$0xff] }
  0x73   : > { %v1057_v54 = vld [vmem:[%s4230_s3 + $0xb60] sm:$0xff]  ;;  %1054 = vst [vmem:[%s4235_s4 + $0x5a0] sm:$0xff] %v1053_v52  ;;  %1056 = vst [vmem:[%s4235_s4 + $0x5a8] sm:$0xff] %v1055_v53  ;;  %v1059_v55 = vld [vmem:[%s4230_s3 + $0xb70] sm:$0xff] }
  0x74   : > { %1058 = vst [vmem:[%s4235_s4 + $0x5b0] sm:$0xff] %v1057_v54  ;;  %v1061_v56 = vld [vmem:[%s4230_s3 + $0xb80] sm:$0xff]  ;;  %v1063_v57 = vld [vmem:[%s4230_s3 + $0xb90] sm:$0xff]  ;;  %1060 = vst [vmem:[%s4235_s4 + $0x5b8] sm:$0xff] %v1059_v55 }
  0x75   : > { %1062 = vst [vmem:[%s4235_s4 + $0x5c0] sm:$0xff] %v1061_v56  ;;  %1064 = vst [vmem:[%s4235_s4 + $0x5c8] sm:$0xff] %v1063_v57  ;;  %v1065_v58 = vld [vmem:[%s4230_s3 + $0xba0] sm:$0xff]  ;;  %v1067_v59 = vld [vmem:[%s4230_s3 + $0xbb0] sm:$0xff] }
  0x76   : > { %v1069_v60 = vld [vmem:[%s4230_s3 + $0xbc0] sm:$0xff]  ;;  %1066 = vst [vmem:[%s4235_s4 + $0x5d0] sm:$0xff] %v1065_v58  ;;  %1068 = vst [vmem:[%s4235_s4 + $0x5d8] sm:$0xff] %v1067_v59  ;;  %v1071_v61 = vld [vmem:[%s4230_s3 + $0xbd0] sm:$0xff] }
  0x77   : > { %1070 = vst [vmem:[%s4235_s4 + $0x5e0] sm:$0xff] %v1069_v60  ;;  %v1073_v62 = vld [vmem:[%s4230_s3 + $0xbe0] sm:$0xff]  ;;  %v1075_v63 = vld [vmem:[%s4230_s3 + $0xbf0] sm:$0xff]  ;;  %1072 = vst [vmem:[%s4235_s4 + $0x5e8] sm:$0xff] %v1071_v61 }
  0x78   : > { %1074 = vst [vmem:[%s4235_s4 + $0x5f0] sm:$0xff] %v1073_v62  ;;  %1076 = vst [vmem:[%s4235_s4 + $0x5f8] sm:$0xff] %v1075_v63  ;;  %v1077_v0 = vld [vmem:[%s4230_s3 + $0xc00] sm:$0xff]  ;;  %v1079_v1 = vld [vmem:[%s4230_s3 + $0xc10] sm:$0xff] }
  0x79   : > { %v1081_v2 = vld [vmem:[%s4230_s3 + $0xc20] sm:$0xff]  ;;  %1078 = vst [vmem:[%s4235_s4 + $0x600] sm:$0xff] %v1077_v0  ;;  %1080 = vst [vmem:[%s4235_s4 + $0x608] sm:$0xff] %v1079_v1  ;;  %v1083_v3 = vld [vmem:[%s4230_s3 + $0xc30] sm:$0xff] }
  0x7a   : > { %1082 = vst [vmem:[%s4235_s4 + $0x610] sm:$0xff] %v1081_v2  ;;  %v1085_v4 = vld [vmem:[%s4230_s3 + $0xc40] sm:$0xff]  ;;  %v1087_v5 = vld [vmem:[%s4230_s3 + $0xc50] sm:$0xff]  ;;  %1084 = vst [vmem:[%s4235_s4 + $0x618] sm:$0xff] %v1083_v3 }
  0x7b   : > { %1086 = vst [vmem:[%s4235_s4 + $0x620] sm:$0xff] %v1085_v4  ;;  %1088 = vst [vmem:[%s4235_s4 + $0x628] sm:$0xff] %v1087_v5  ;;  %v1089_v6 = vld [vmem:[%s4230_s3 + $0xc60] sm:$0xff]  ;;  %v1091_v7 = vld [vmem:[%s4230_s3 + $0xc70] sm:$0xff] }
  0x7c   : > { %v1093_v8 = vld [vmem:[%s4230_s3 + $0xc80] sm:$0xff]  ;;  %1090 = vst [vmem:[%s4235_s4 + $0x630] sm:$0xff] %v1089_v6  ;;  %1092 = vst [vmem:[%s4235_s4 + $0x638] sm:$0xff] %v1091_v7  ;;  %v1095_v9 = vld [vmem:[%s4230_s3 + $0xc90] sm:$0xff] }
  0x7d   : > { %1094 = vst [vmem:[%s4235_s4 + $0x640] sm:$0xff] %v1093_v8  ;;  %v1097_v10 = vld [vmem:[%s4230_s3 + $0xca0] sm:$0xff]  ;;  %v1099_v11 = vld [vmem:[%s4230_s3 + $0xcb0] sm:$0xff]  ;;  %1096 = vst [vmem:[%s4235_s4 + $0x648] sm:$0xff] %v1095_v9 }
  0x7e   : > { %1098 = vst [vmem:[%s4235_s4 + $0x650] sm:$0xff] %v1097_v10  ;;  %1100 = vst [vmem:[%s4235_s4 + $0x658] sm:$0xff] %v1099_v11  ;;  %v1101_v12 = vld [vmem:[%s4230_s3 + $0xcc0] sm:$0xff]  ;;  %v1103_v13 = vld [vmem:[%s4230_s3 + $0xcd0] sm:$0xff] }
  0x7f   : > { %v1105_v14 = vld [vmem:[%s4230_s3 + $0xce0] sm:$0xff]  ;;  %1102 = vst [vmem:[%s4235_s4 + $0x660] sm:$0xff] %v1101_v12  ;;  %1104 = vst [vmem:[%s4235_s4 + $0x668] sm:$0xff] %v1103_v13  ;;  %v1107_v15 = vld [vmem:[%s4230_s3 + $0xcf0] sm:$0xff] }
  0x80   : > { %1106 = vst [vmem:[%s4235_s4 + $0x670] sm:$0xff] %v1105_v14  ;;  %v1109_v16 = vld [vmem:[%s4230_s3 + $0xd00] sm:$0xff]  ;;  %v1111_v17 = vld [vmem:[%s4230_s3 + $0xd10] sm:$0xff]  ;;  %1108 = vst [vmem:[%s4235_s4 + $0x678] sm:$0xff] %v1107_v15 }
  0x81   : > { %1110 = vst [vmem:[%s4235_s4 + $0x680] sm:$0xff] %v1109_v16  ;;  %1112 = vst [vmem:[%s4235_s4 + $0x688] sm:$0xff] %v1111_v17  ;;  %v1113_v18 = vld [vmem:[%s4230_s3 + $0xd20] sm:$0xff]  ;;  %v1115_v19 = vld [vmem:[%s4230_s3 + $0xd30] sm:$0xff] }
  0x82   : > { %v1117_v20 = vld [vmem:[%s4230_s3 + $0xd40] sm:$0xff]  ;;  %1114 = vst [vmem:[%s4235_s4 + $0x690] sm:$0xff] %v1113_v18  ;;  %1116 = vst [vmem:[%s4235_s4 + $0x698] sm:$0xff] %v1115_v19  ;;  %v1119_v21 = vld [vmem:[%s4230_s3 + $0xd50] sm:$0xff] }
  0x83   : > { %1118 = vst [vmem:[%s4235_s4 + $0x6a0] sm:$0xff] %v1117_v20  ;;  %v1121_v22 = vld [vmem:[%s4230_s3 + $0xd60] sm:$0xff]  ;;  %v1123_v23 = vld [vmem:[%s4230_s3 + $0xd70] sm:$0xff]  ;;  %1120 = vst [vmem:[%s4235_s4 + $0x6a8] sm:$0xff] %v1119_v21 }
  0x84   : > { %1122 = vst [vmem:[%s4235_s4 + $0x6b0] sm:$0xff] %v1121_v22  ;;  %1124 = vst [vmem:[%s4235_s4 + $0x6b8] sm:$0xff] %v1123_v23  ;;  %v1125_v24 = vld [vmem:[%s4230_s3 + $0xd80] sm:$0xff]  ;;  %v1127_v25 = vld [vmem:[%s4230_s3 + $0xd90] sm:$0xff] }
  0x85   : > { %v1129_v26 = vld [vmem:[%s4230_s3 + $0xda0] sm:$0xff]  ;;  %1126 = vst [vmem:[%s4235_s4 + $0x6c0] sm:$0xff] %v1125_v24  ;;  %1128 = vst [vmem:[%s4235_s4 + $0x6c8] sm:$0xff] %v1127_v25  ;;  %v1131_v27 = vld [vmem:[%s4230_s3 + $0xdb0] sm:$0xff] }
  0x86   : > { %1130 = vst [vmem:[%s4235_s4 + $0x6d0] sm:$0xff] %v1129_v26  ;;  %v1133_v28 = vld [vmem:[%s4230_s3 + $0xdc0] sm:$0xff]  ;;  %v1135_v29 = vld [vmem:[%s4230_s3 + $0xdd0] sm:$0xff]  ;;  %1132 = vst [vmem:[%s4235_s4 + $0x6d8] sm:$0xff] %v1131_v27 }
  0x87   : > { %1134 = vst [vmem:[%s4235_s4 + $0x6e0] sm:$0xff] %v1133_v28  ;;  %1136 = vst [vmem:[%s4235_s4 + $0x6e8] sm:$0xff] %v1135_v29  ;;  %v1137_v30 = vld [vmem:[%s4230_s3 + $0xde0] sm:$0xff]  ;;  %v1139_v31 = vld [vmem:[%s4230_s3 + $0xdf0] sm:$0xff] }
  0x88   : > { %v1141_v32 = vld [vmem:[%s4230_s3 + $0xe00] sm:$0xff]  ;;  %1138 = vst [vmem:[%s4235_s4 + $0x6f0] sm:$0xff] %v1137_v30  ;;  %1140 = vst [vmem:[%s4235_s4 + $0x6f8] sm:$0xff] %v1139_v31  ;;  %v1143_v33 = vld [vmem:[%s4230_s3 + $0xe10] sm:$0xff] }
  0x89   : > { %1142 = vst [vmem:[%s4235_s4 + $0x700] sm:$0xff] %v1141_v32  ;;  %v1145_v34 = vld [vmem:[%s4230_s3 + $0xe20] sm:$0xff]  ;;  %v1147_v35 = vld [vmem:[%s4230_s3 + $0xe30] sm:$0xff]  ;;  %1144 = vst [vmem:[%s4235_s4 + $0x708] sm:$0xff] %v1143_v33 }
  0x8a   : > { %1146 = vst [vmem:[%s4235_s4 + $0x710] sm:$0xff] %v1145_v34  ;;  %1148 = vst [vmem:[%s4235_s4 + $0x718] sm:$0xff] %v1147_v35  ;;  %v1149_v36 = vld [vmem:[%s4230_s3 + $0xe40] sm:$0xff]  ;;  %v1151_v37 = vld [vmem:[%s4230_s3 + $0xe50] sm:$0xff] }
  0x8b   : > { %v1153_v38 = vld [vmem:[%s4230_s3 + $0xe60] sm:$0xff]  ;;  %1150 = vst [vmem:[%s4235_s4 + $0x720] sm:$0xff] %v1149_v36  ;;  %1152 = vst [vmem:[%s4235_s4 + $0x728] sm:$0xff] %v1151_v37  ;;  %v1155_v39 = vld [vmem:[%s4230_s3 + $0xe70] sm:$0xff] }
  0x8c   : > { %1154 = vst [vmem:[%s4235_s4 + $0x730] sm:$0xff] %v1153_v38  ;;  %v1157_v40 = vld [vmem:[%s4230_s3 + $0xe80] sm:$0xff]  ;;  %v1159_v41 = vld [vmem:[%s4230_s3 + $0xe90] sm:$0xff]  ;;  %1156 = vst [vmem:[%s4235_s4 + $0x738] sm:$0xff] %v1155_v39 }
  0x8d   : > { %1158 = vst [vmem:[%s4235_s4 + $0x740] sm:$0xff] %v1157_v40  ;;  %1160 = vst [vmem:[%s4235_s4 + $0x748] sm:$0xff] %v1159_v41  ;;  %v1161_v42 = vld [vmem:[%s4230_s3 + $0xea0] sm:$0xff]  ;;  %v1163_v43 = vld [vmem:[%s4230_s3 + $0xeb0] sm:$0xff] }
  0x8e   : > { %v1165_v44 = vld [vmem:[%s4230_s3 + $0xec0] sm:$0xff]  ;;  %1162 = vst [vmem:[%s4235_s4 + $0x750] sm:$0xff] %v1161_v42  ;;  %1164 = vst [vmem:[%s4235_s4 + $0x758] sm:$0xff] %v1163_v43  ;;  %v1167_v45 = vld [vmem:[%s4230_s3 + $0xed0] sm:$0xff] }
  0x8f   : > { %1166 = vst [vmem:[%s4235_s4 + $0x760] sm:$0xff] %v1165_v44  ;;  %v1169_v46 = vld [vmem:[%s4230_s3 + $0xee0] sm:$0xff]  ;;  %v1171_v47 = vld [vmem:[%s4230_s3 + $0xef0] sm:$0xff]  ;;  %1168 = vst [vmem:[%s4235_s4 + $0x768] sm:$0xff] %v1167_v45 }
  0x90   : > { %1170 = vst [vmem:[%s4235_s4 + $0x770] sm:$0xff] %v1169_v46  ;;  %1172 = vst [vmem:[%s4235_s4 + $0x778] sm:$0xff] %v1171_v47  ;;  %v1173_v48 = vld [vmem:[%s4230_s3 + $0xf00] sm:$0xff]  ;;  %v1175_v49 = vld [vmem:[%s4230_s3 + $0xf10] sm:$0xff] }
  0x91   : > { %v1177_v50 = vld [vmem:[%s4230_s3 + $0xf20] sm:$0xff]  ;;  %1174 = vst [vmem:[%s4235_s4 + $0x780] sm:$0xff] %v1173_v48  ;;  %1176 = vst [vmem:[%s4235_s4 + $0x788] sm:$0xff] %v1175_v49  ;;  %v1179_v51 = vld [vmem:[%s4230_s3 + $0xf30] sm:$0xff] }
  0x92   : > { %1178 = vst [vmem:[%s4235_s4 + $0x790] sm:$0xff] %v1177_v50  ;;  %v1181_v52 = vld [vmem:[%s4230_s3 + $0xf40] sm:$0xff]  ;;  %v1183_v53 = vld [vmem:[%s4230_s3 + $0xf50] sm:$0xff]  ;;  %1180 = vst [vmem:[%s4235_s4 + $0x798] sm:$0xff] %v1179_v51 }
  0x93   : > { %1182 = vst [vmem:[%s4235_s4 + $0x7a0] sm:$0xff] %v1181_v52  ;;  %1184 = vst [vmem:[%s4235_s4 + $0x7a8] sm:$0xff] %v1183_v53  ;;  %v1185_v54 = vld [vmem:[%s4230_s3 + $0xf60] sm:$0xff]  ;;  %v1187_v55 = vld [vmem:[%s4230_s3 + $0xf70] sm:$0xff] }
  0x94   : > { %v1189_v56 = vld [vmem:[%s4230_s3 + $0xf80] sm:$0xff]  ;;  %1186 = vst [vmem:[%s4235_s4 + $0x7b0] sm:$0xff] %v1185_v54  ;;  %1188 = vst [vmem:[%s4235_s4 + $0x7b8] sm:$0xff] %v1187_v55  ;;  %v1191_v57 = vld [vmem:[%s4230_s3 + $0xf90] sm:$0xff] }
  0x95   : > { %1190 = vst [vmem:[%s4235_s4 + $0x7c0] sm:$0xff] %v1189_v56  ;;  %v1193_v58 = vld [vmem:[%s4230_s3 + $0xfa0] sm:$0xff]  ;;  %v1195_v59 = vld [vmem:[%s4230_s3 + $0xfb0] sm:$0xff]  ;;  %1192 = vst [vmem:[%s4235_s4 + $0x7c8] sm:$0xff] %v1191_v57 }
  0x96   : > { %1194 = vst [vmem:[%s4235_s4 + $0x7d0] sm:$0xff] %v1193_v58  ;;  %1196 = vst [vmem:[%s4235_s4 + $0x7d8] sm:$0xff] %v1195_v59  ;;  %v1197_v60 = vld [vmem:[%s4230_s3 + $0xfc0] sm:$0xff]  ;;  %v1199_v61 = vld [vmem:[%s4230_s3 + $0xfd0] sm:$0xff] }
  0x97   : > { %v1201_v62 = vld [vmem:[%s4230_s3 + $0xfe0] sm:$0xff]  ;;  %1198 = vst [vmem:[%s4235_s4 + $0x7e0] sm:$0xff] %v1197_v60  ;;  %1200 = vst [vmem:[%s4235_s4 + $0x7e8] sm:$0xff] %v1199_v61  ;;  %v1203_v63 = vld [vmem:[%s4230_s3 + $0xff0] sm:$0xff] }
  0x98   : > { %1202 = vst [vmem:[%s4235_s4 + $0x7f0] sm:$0xff] %v1201_v62  ;;  %1204 = vst [vmem:[%s4235_s4 + $0x7f8] sm:$0xff] %v1203_v63 }
  0x99 PF: > { %p3356_p7 = scmp.ge.s32.totalorder %s4152_s15, 1  ;;  %p1209_p8 = scmp.lt.s32.totalorder %s4152_s15, 5 }
  0x9b   : > { %p1210_p9 = pnand %p3356_p7, %p1209_p8 }
  0x9c   : > { %s1216_s5 = sand.u32 (!%p1210_p9), 1, %s4128_s9   ;;  %s3358_s6 = sshll.u32 (!%p1210_p9), %s4136_s11, 4 }
  0x9d   : > { %1213 = sbr.rel (%p1210_p9) target bundleno = 664 (0x298), region = 62  ;;  %s3357_s7 = sshll.u32 (!%p1210_p9), %s1216_s5, 11 }
  0x9e   : > { %p1253_p10 = scmp.lt.s32.totalorder (!%p1210_p9), %s3358_s6, 31  ;;  %s3360_s8 = sshll.u32 (!%p1210_p9), %s4140_s12, 1 }
  0x9f   : > { %p1265_p11 = scmp.lt.s32.totalorder (!%p1210_p9), %s3360_s8, 3  ;;  %s4761_s9 = scalar_lea.vmem (!%p1210_p9), [#allocation3], %s3357_s7 }
  0xa0   : > { %p3362_p12 = scmp.ne.s32.totalorder (!%p1210_p9), %s4136_s11, 0 }
  0xa4   : > { %s5103_s6 = smov (!%p1253_p10, %s3358_s6), 31  ;;  %s5105_s8 = smov (!%p1265_p11, %s3360_s8), 3 }
  0xa5   : > { %s3359_s18 = sshll.u32 %s5103_s6, 2  ;;  %s3361_s23 = sshll.u32 %s5105_s8, 2  ;;  %v4154_v0 = vmov (!%p3362_p12), 0.0  }
  0xa6   : > { %s4754_s21 = scalar_lea.vmem %s5087_s0, %s3359_s18  ;;  %s4759_s26 = scalar_lea.vmem %s5089_s2, %s3361_s23  ;;  %1276 = vst [vmem:[#allocation2] sm:$0xff] (!%p3362_p12), %v4154_v0  ;;  %1277 = vst [vmem:[#allocation2 + $0x8] sm:$0xff] (!%p3362_p12), %v4154_v0 }
  0xa7   : > { %1275 = sbr.rel (%p3362_p12) target bundleno = 174 (0xae), region = 70 }
  0xae PF: > { %v3698_v1 = vld [vmem:[%s4761_s9 + $0x4] ss:$8 sps:$4 sm:$0xff]   ;;  %v3702_v3 = vld [vmem:[%s4761_s9] ss:$8 sps:$4 sm:$0xff]   ;;  %v3704_v5 = vld [vmem:[%s4761_s9 + $0x14] ss:$8 sps:$4 sm:$0xff]  }
  0xaf   : > { %v3700_v2 = vld [vmem:[%s4761_s9 + $0x104] ss:$8 sps:$4 sm:$0xff]   ;;  %2880 = vmatprep.subr.bf16.mxu0 %v3698_v1  ;;  %v3703_v4 = vld [vmem:[%s4761_s9 + $0x100] ss:$8 sps:$4 sm:$0xff]   ;;  %v3706_v6 = vld [vmem:[%s4761_s9 + $0x114] ss:$8 sps:$4 sm:$0xff]  }
  0xb0   : > { %2921 = vmatprep.subr.bf16.mxu1 %v3700_v2  ;;  %2881 = vmatpush1.bf16.msra.mxu0 %v3702_v3  ;;  %v3708_v7 = vld [vmem:[%s4761_s9 + $0x10] ss:$8 sps:$4 sm:$0xff]   ;;  %v3710_v9 = vld [vmem:[%s4761_s9 + $0x24] ss:$8 sps:$4 sm:$0xff]   ;;  %v3714_v11 = vld [vmem:[%s4761_s9 + $0x20] ss:$8 sps:$4 sm:$0xff]  }
  0xb1   : > { %2922 = vmatpush1.bf16.msra.mxu1 %v3703_v4  ;;  %2882 = vmatprep.subr.bf16.mxu0 %v3704_v5  ;;  %v3709_v8 = vld [vmem:[%s4761_s9 + $0x110] ss:$8 sps:$4 sm:$0xff]   ;;  %v3712_v10 = vld [vmem:[%s4761_s9 + $0x124] ss:$8 sps:$4 sm:$0xff]   ;;  %v3715_v12 = vld [vmem:[%s4761_s9 + $0x120] ss:$8 sps:$4 sm:$0xff]  }
  0xb2   : > { %2923 = vmatprep.subr.bf16.mxu1 %v3706_v6  ;;  %v3716_v13 = vld [vmem:[%s4761_s9 + $0x34] ss:$8 sps:$4 sm:$0xff]   ;;  %v3720_v15 = vld [vmem:[%s4761_s9 + $0x30] ss:$8 sps:$4 sm:$0xff]   ;;  %v3722_v17 = vld [vmem:[%s4761_s9 + $0x44] ss:$8 sps:$4 sm:$0xff]  }
  0xb3   : > { %v3718_v14 = vld [vmem:[%s4761_s9 + $0x134] ss:$8 sps:$4 sm:$0xff]   ;;  %v3721_v16 = vld [vmem:[%s4761_s9 + $0x130] ss:$8 sps:$4 sm:$0xff]   ;;  %v3724_v18 = vld [vmem:[%s4761_s9 + $0x144] ss:$8 sps:$4 sm:$0xff]  }
  0xb4   : > { %2883 = vmatpush1.bf16.msra.mxu0 %v3708_v7  ;;  %v3726_v19 = vld [vmem:[%s4761_s9 + $0x40] ss:$8 sps:$4 sm:$0xff]   ;;  %v3728_v21 = vld [vmem:[%s4761_s9 + $0x54] ss:$8 sps:$4 sm:$0xff]   ;;  %v3732_v23 = vld [vmem:[%s4761_s9 + $0x50] ss:$8 sps:$4 sm:$0xff]  }
  0xb5   : > { %2924 = vmatpush1.bf16.msra.mxu1 %v3709_v8  ;;  %2884 = vmatprep.subr.bf16.mxu0 %v3710_v9  ;;  %v3727_v20 = vld [vmem:[%s4761_s9 + $0x140] ss:$8 sps:$4 sm:$0xff]   ;;  %v3730_v22 = vld [vmem:[%s4761_s9 + $0x154] ss:$8 sps:$4 sm:$0xff]   ;;  %v3733_v24 = vld [vmem:[%s4761_s9 + $0x150] ss:$8 sps:$4 sm:$0xff]  }
  0xb6   : > { %2925 = vmatprep.subr.bf16.mxu1 %v3712_v10  ;;  %v3734_v25 = vld [vmem:[%s4761_s9 + $0x64] ss:$8 sps:$4 sm:$0xff]   ;;  %v3738_v27 = vld [vmem:[%s4761_s9 + $0x60] ss:$8 sps:$4 sm:$0xff]   ;;  %v3740_v29 = vld [vmem:[%s4761_s9 + $0x74] ss:$8 sps:$4 sm:$0xff]  }
  0xb7   : > { %v3736_v26 = vld [vmem:[%s4761_s9 + $0x164] ss:$8 sps:$4 sm:$0xff]   ;;  %v3739_v28 = vld [vmem:[%s4761_s9 + $0x160] ss:$8 sps:$4 sm:$0xff]   ;;  %v3742_v30 = vld [vmem:[%s4761_s9 + $0x174] ss:$8 sps:$4 sm:$0xff]  }
  0xb8   : > { %2885 = vmatpush1.bf16.msra.mxu0 %v3714_v11  ;;  %v3744_v31 = vld [vmem:[%s4761_s9 + $0x70] ss:$8 sps:$4 sm:$0xff]   ;;  %v3746_v33 = vld [vmem:[%s4761_s9 + $0x84] ss:$8 sps:$4 sm:$0xff]   ;;  %v3750_v35 = vld [vmem:[%s4761_s9 + $0x80] ss:$8 sps:$4 sm:$0xff]  }
  0xb9   : > { %2926 = vmatpush1.bf16.msra.mxu1 %v3715_v12  ;;  %2886 = vmatprep.subr.bf16.mxu0 %v3716_v13  ;;  %v3745_v32 = vld [vmem:[%s4761_s9 + $0x170] ss:$8 sps:$4 sm:$0xff]   ;;  %v3748_v34 = vld [vmem:[%s4761_s9 + $0x184] ss:$8 sps:$4 sm:$0xff]   ;;  %v3751_v36 = vld [vmem:[%s4761_s9 + $0x180] ss:$8 sps:$4 sm:$0xff]  }
  0xba   : > { %2927 = vmatprep.subr.bf16.mxu1 %v3718_v14  ;;  %v3752_v37 = vld [vmem:[%s4761_s9 + $0x94] ss:$8 sps:$4 sm:$0xff]   ;;  %v3756_v39 = vld [vmem:[%s4761_s9 + $0x90] ss:$8 sps:$4 sm:$0xff]   ;;  %v3758_v41 = vld [vmem:[%s4761_s9 + $0xa4] ss:$8 sps:$4 sm:$0xff]  }
  0xbb   : > { %v3754_v38 = vld [vmem:[%s4761_s9 + $0x194] ss:$8 sps:$4 sm:$0xff]   ;;  %v3757_v40 = vld [vmem:[%s4761_s9 + $0x190] ss:$8 sps:$4 sm:$0xff]   ;;  %v3760_v42 = vld [vmem:[%s4761_s9 + $0x1a4] ss:$8 sps:$4 sm:$0xff]  }
  0xbc   : > { %2887 = vmatpush1.bf16.msra.mxu0 %v3720_v15  ;;  %v3762_v43 = vld [vmem:[%s4761_s9 + $0xa0] ss:$8 sps:$4 sm:$0xff]   ;;  %v3764_v45 = vld [vmem:[%s4761_s9 + $0xb4] ss:$8 sps:$4 sm:$0xff]   ;;  %v3768_v50 = vld [vmem:[%s4761_s9 + $0xb0] ss:$8 sps:$4 sm:$0xff]  }
  0xbd   : > { %2928 = vmatpush1.bf16.msra.mxu1 %v3721_v16  ;;  %2888 = vmatprep.subr.bf16.mxu0 %v3722_v17  ;;  %v3763_v44 = vld [vmem:[%s4761_s9 + $0x1a0] ss:$8 sps:$4 sm:$0xff]   ;;  %v3766_v46 = vld [vmem:[%s4761_s9 + $0x1b4] ss:$8 sps:$4 sm:$0xff]   ;;  %v3769_v51 = vld [vmem:[%s4761_s9 + $0x1b0] ss:$8 sps:$4 sm:$0xff]  }
  0xbe   : > { %2929 = vmatprep.subr.bf16.mxu1 %v3724_v18  ;;  %v1280_v47 = vld [vmem:[%s4754_s21] sm:$0xff]  ;;  %v1281_v49 = vld [vmem:[%s4754_s21 + $0x8] sm:$0xff]  ;;  %v3770_v53 = vld [vmem:[%s4761_s9 + $0xc4] ss:$8 sps:$4 sm:$0xff]   ;;  %p3635_p13 = scmp.ne.s32.totalorder %s4136_s11, 1 }
  0xbf   : > { %v3364_v48 = vcombine.high %v1280_v47, %v1280_v47  ;;  %v3366_v52 = vcombine.high %v1281_v49, %v1281_v49  ;;  %v3772_v54 = vld [vmem:[%s4761_s9 + $0x1c4] ss:$8 sps:$4 sm:$0xff]   ;;  %v3774_v55 = vld [vmem:[%s4761_s9 + $0xc0] ss:$8 sps:$4 sm:$0xff]   ;;  %v3776_v57 = vld [vmem:[%s4761_s9 + $0xd4] ss:$8 sps:$4 sm:$0xff]   ;;  %v3363_v7 = vcombine.low %v1280_v47, %v1280_v47  ;;  %v3365_v8 = vcombine.low %v1281_v49, %v1281_v49 }
  0xc0   : > { %2889 = vmatpush1.bf16.msra.mxu0 %v3726_v19  ;;  %v3775_v56 = vld [vmem:[%s4761_s9 + $0x1c0] ss:$8 sps:$4 sm:$0xff]   ;;  %v3778_v58 = vld [vmem:[%s4761_s9 + $0x1d4] ss:$8 sps:$4 sm:$0xff]   ;;  %v3780_v59 = vld [vmem:[%s4761_s9 + $0xd0] ss:$8 sps:$4 sm:$0xff]  }
  0xc1   : > { %2930 = vmatpush1.bf16.msra.mxu1 %v3727_v20  ;;  %2890 = vmatprep.subr.bf16.mxu0 %v3728_v21  ;;  %v3781_v60 = vld [vmem:[%s4761_s9 + $0x1d0] ss:$8 sps:$4 sm:$0xff]   ;;  %v3782_v61 = vld [vmem:[%s4761_s9 + $0xe4] ss:$8 sps:$4 sm:$0xff]   ;;  %v3786_v63 = vld [vmem:[%s4761_s9 + $0xe0] ss:$8 sps:$4 sm:$0xff]  }
  0xc2   : > { %2931 = vmatprep.subr.bf16.mxu1 %v3730_v22  ;;  %2912 = vmatprep.mubr.bf16.mxu0 %v3364_v48  ;;  %v3784_v62 = vld [vmem:[%s4761_s9 + $0x1e4] ss:$8 sps:$4 sm:$0xff]   ;;  %v3787_v0 = vld [vmem:[%s4761_s9 + $0x1e0] ss:$8 sps:$4 sm:$0xff]   ;;  %v3788_v1 = vld [vmem:[%s4761_s9 + $0xf4] ss:$8 sps:$4 sm:$0xff]  }
  0xc3   : > { %2953 = vmatprep.mubr.bf16.mxu1 %v3366_v52  ;;  %v3790_v2 = vld [vmem:[%s4761_s9 + $0x1f4] ss:$8 sps:$4 sm:$0xff]   ;;  %v3792_v3 = vld [vmem:[%s4761_s9 + $0xf0] ss:$8 sps:$4 sm:$0xff]   ;;  %v3800_v5 = vld [vmem:[%s4761_s9 + $0x204] ss:$8 sps:$4 sm:$0xff]  }
  0xc4   : > { %2891 = vmatpush1.bf16.msra.mxu0 %v3732_v23  ;;  %v3793_v4 = vld [vmem:[%s4761_s9 + $0x1f0] ss:$8 sps:$4 sm:$0xff]   ;;  %v3803_v6 = vld [vmem:[%s4761_s9 + $0x304] ss:$8 sps:$4 sm:$0xff]   ;;  %v3798_v9 = vld [vmem:[%s4761_s9 + $0x200] ss:$8 sps:$4 sm:$0xff]  }
  0xc5   : > { %2932 = vmatpush1.bf16.msra.mxu1 %v3733_v24  ;;  %2892 = vmatprep.subr.bf16.mxu0 %v3734_v25  ;;  %v3801_v10 = vld [vmem:[%s4761_s9 + $0x300] ss:$8 sps:$4 sm:$0xff]   ;;  %v3806_v11 = vld [vmem:[%s4761_s9 + $0x214] ss:$8 sps:$4 sm:$0xff]   ;;  %v3804_v13 = vld [vmem:[%s4761_s9 + $0x210] ss:$8 sps:$4 sm:$0xff]  }
  0xc6   : > { %2933 = vmatprep.subr.bf16.mxu1 %v3736_v26  ;;  %v3809_v12 = vld [vmem:[%s4761_s9 + $0x314] ss:$8 sps:$4 sm:$0xff]   ;;  %v3807_v14 = vld [vmem:[%s4761_s9 + $0x310] ss:$8 sps:$4 sm:$0xff]   ;;  %v3812_v15 = vld [vmem:[%s4761_s9 + $0x224] ss:$8 sps:$4 sm:$0xff]  }
  0xc7   : > { %v3815_v16 = vld [vmem:[%s4761_s9 + $0x324] ss:$8 sps:$4 sm:$0xff]   ;;  %v3810_v17 = vld [vmem:[%s4761_s9 + $0x220] ss:$8 sps:$4 sm:$0xff]   ;;  %v3818_v19 = vld [vmem:[%s4761_s9 + $0x234] ss:$8 sps:$4 sm:$0xff]  }
  0xc8   : > { %2893 = vmatpush1.bf16.msra.mxu0 %v3738_v27  ;;  %v3813_v18 = vld [vmem:[%s4761_s9 + $0x320] ss:$8 sps:$4 sm:$0xff]   ;;  %v3821_v20 = vld [vmem:[%s4761_s9 + $0x334] ss:$8 sps:$4 sm:$0xff]   ;;  %v3816_v21 = vld [vmem:[%s4761_s9 + $0x230] ss:$8 sps:$4 sm:$0xff]  }
  0xc9   : > { %2934 = vmatpush1.bf16.msra.mxu1 %v3739_v28  ;;  %2894 = vmatprep.subr.bf16.mxu0 %v3740_v29  ;;  %v3819_v22 = vld [vmem:[%s4761_s9 + $0x330] ss:$8 sps:$4 sm:$0xff]   ;;  %v3824_v23 = vld [vmem:[%s4761_s9 + $0x244] ss:$8 sps:$4 sm:$0xff]   ;;  %v3822_v25 = vld [vmem:[%s4761_s9 + $0x240] ss:$8 sps:$4 sm:$0xff]  }
  0xca   : > { %2935 = vmatprep.subr.bf16.mxu1 %v3742_v30  ;;  %v3827_v24 = vld [vmem:[%s4761_s9 + $0x344] ss:$8 sps:$4 sm:$0xff]   ;;  %v3825_v26 = vld [vmem:[%s4761_s9 + $0x340] ss:$8 sps:$4 sm:$0xff]   ;;  %v3830_v27 = vld [vmem:[%s4761_s9 + $0x254] ss:$8 sps:$4 sm:$0xff]  }
  0xcb   : > { %v3833_v28 = vld [vmem:[%s4761_s9 + $0x354] ss:$8 sps:$4 sm:$0xff]   ;;  %v3828_v29 = vld [vmem:[%s4761_s9 + $0x250] ss:$8 sps:$4 sm:$0xff]   ;;  %v3863_v52 = vld [vmem:[%s4761_s9 + $0x3a4] ss:$8 sps:$4 sm:$0xff]  }
  0xcc   : > { %2895 = vmatpush1.bf16.msra.mxu0 %v3744_v31  ;;  %v3831_v30 = vld [vmem:[%s4761_s9 + $0x350] ss:$8 sps:$4 sm:$0xff]   ;;  %v3836_v31 = vld [vmem:[%s4761_s9 + $0x264] ss:$8 sps:$4 sm:$0xff]   ;;  %v3854_v47 = vld [vmem:[%s4761_s9 + $0x294] ss:$8 sps:$4 sm:$0xff]  }
  0xcd   : > { %2936 = vmatpush1.bf16.msra.mxu1 %v3745_v32  ;;  %2896 = vmatprep.subr.bf16.mxu0 %v3746_v33  ;;  %v3839_v32 = vld [vmem:[%s4761_s9 + $0x364] ss:$8 sps:$4 sm:$0xff]   ;;  %v3857_v48 = vld [vmem:[%s4761_s9 + $0x394] ss:$8 sps:$4 sm:$0xff]   ;;  %v3852_v49 = vld [vmem:[%s4761_s9 + $0x290] ss:$8 sps:$4 sm:$0xff]  }
  0xce   : > { %2937 = vmatprep.subr.bf16.mxu1 %v3748_v34  ;;  %v4857_v33 = vld [vmem:[%s4754_s21 + $0x10] sm:$0xff]  ;;  %v4860_v34 = vld [vmem:[%s4754_s21 + $0x18] sm:$0xff] }
  0xd0   : > { %2897 = vmatpush1.bf16.msra.mxu0 %v3750_v35  ;;  %v3834_v35 = vld [vmem:[%s4761_s9 + $0x260] ss:$8 sps:$4 sm:$0xff]  }
  0xd1   : > { %2938 = vmatpush1.bf16.msra.mxu1 %v3751_v36  ;;  %2898 = vmatprep.subr.bf16.mxu0 %v3752_v37  ;;  %v3837_v36 = vld [vmem:[%s4761_s9 + $0x360] ss:$8 sps:$4 sm:$0xff]   ;;  %v3368_v37 = vcombine.high %v4857_v33, %v4857_v33 }
  0xd2   : > { %2939 = vmatprep.subr.bf16.mxu1 %v3754_v38  ;;  %v3370_v38 = vcombine.high %v4860_v34, %v4860_v34 }
  0xd4   : > { %2899 = vmatpush1.bf16.msra.mxu0 %v3756_v39  ;;  %v3842_v39 = vld [vmem:[%s4761_s9 + $0x274] ss:$8 sps:$4 sm:$0xff]  }
  0xd5   : > { %2940 = vmatpush1.bf16.msra.mxu1 %v3757_v40  ;;  %2900 = vmatprep.subr.bf16.mxu0 %v3758_v41  ;;  %v3845_v40 = vld [vmem:[%s4761_s9 + $0x374] ss:$8 sps:$4 sm:$0xff]   ;;  %v3840_v41 = vld [vmem:[%s4761_s9 + $0x270] ss:$8 sps:$4 sm:$0xff]  }
  0xd6   : > { %2941 = vmatprep.subr.bf16.mxu1 %v3760_v42  ;;  %v3843_v42 = vld [vmem:[%s4761_s9 + $0x370] ss:$8 sps:$4 sm:$0xff]  }
  0xd8   : > { %2901 = vmatpush1.bf16.msra.mxu0 %v3762_v43  ;;  %v3848_v43 = vld [vmem:[%s4761_s9 + $0x284] ss:$8 sps:$4 sm:$0xff]  }
  0xd9   : > { %2942 = vmatpush1.bf16.msra.mxu1 %v3763_v44  ;;  %2902 = vmatprep.subr.bf16.mxu0 %v3764_v45  ;;  %v3851_v44 = vld [vmem:[%s4761_s9 + $0x384] ss:$8 sps:$4 sm:$0xff]   ;;  %v3846_v45 = vld [vmem:[%s4761_s9 + $0x280] ss:$8 sps:$4 sm:$0xff]  }
  0xda   : > { %2943 = vmatprep.subr.bf16.mxu1 %v3766_v46  ;;  %v3849_v46 = vld [vmem:[%s4761_s9 + $0x380] ss:$8 sps:$4 sm:$0xff]  }
  0xdc   : > { %2903 = vmatpush1.bf16.msra.mxu0 %v3768_v50  ;;  %v3855_v50 = vld [vmem:[%s4761_s9 + $0x390] ss:$8 sps:$4 sm:$0xff]  }
  0xdd   : > { %2944 = vmatpush1.bf16.msra.mxu1 %v3769_v51  ;;  %2904 = vmatprep.subr.bf16.mxu0 %v3770_v53  ;;  %v3860_v51 = vld [vmem:[%s4761_s9 + $0x2a4] ss:$8 sps:$4 sm:$0xff]   ;;  %v3858_v53 = vld [vmem:[%s4761_s9 + $0x2a0] ss:$8 sps:$4 sm:$0xff]  }
  0xde   : > { %2945 = vmatprep.subr.bf16.mxu1 %v3772_v54  ;;  %v3861_v54 = vld [vmem:[%s4761_s9 + $0x3a0] ss:$8 sps:$4 sm:$0xff]  }
  0xe0   : > { %2905 = vmatpush1.bf16.msra.mxu0 %v3774_v55  ;;  %v3866_v55 = vld [vmem:[%s4761_s9 + $0x2b4] ss:$8 sps:$4 sm:$0xff]  }
  0xe1   : > { %2946 = vmatpush1.bf16.msra.mxu1 %v3775_v56  ;;  %2906 = vmatprep.subr.bf16.mxu0 %v3776_v57  ;;  %v3869_v56 = vld [vmem:[%s4761_s9 + $0x3b4] ss:$8 sps:$4 sm:$0xff]   ;;  %v3864_v57 = vld [vmem:[%s4761_s9 + $0x2b0] ss:$8 sps:$4 sm:$0xff]  }
  0xe2   : > { %2947 = vmatprep.subr.bf16.mxu1 %v3778_v58  ;;  %v3867_v58 = vld [vmem:[%s4761_s9 + $0x3b0] ss:$8 sps:$4 sm:$0xff]  }
  0xe4   : > { %2907 = vmatpush1.bf16.msra.mxu0 %v3780_v59  ;;  %v3872_v59 = vld [vmem:[%s4761_s9 + $0x2c4] ss:$8 sps:$4 sm:$0xff]  }
  0xe5   : > { %2948 = vmatpush1.bf16.msra.mxu1 %v3781_v60  ;;  %2908 = vmatprep.subr.bf16.mxu0 %v3782_v61  ;;  %v3875_v60 = vld [vmem:[%s4761_s9 + $0x3c4] ss:$8 sps:$4 sm:$0xff]   ;;  %v3870_v61 = vld [vmem:[%s4761_s9 + $0x2c0] ss:$8 sps:$4 sm:$0xff]  }
  0xe6   : > { %2949 = vmatprep.subr.bf16.mxu1 %v3784_v62  ;;  %v3873_v62 = vld [vmem:[%s4761_s9 + $0x3c0] ss:$8 sps:$4 sm:$0xff]  }
  0xe8   : > { %2909 = vmatpush1.bf16.msra.mxu0 %v3786_v63  ;;  %v3878_v63 = vld [vmem:[%s4761_s9 + $0x2d4] ss:$8 sps:$4 sm:$0xff]  }
  0xe9   : > { %2950 = vmatpush1.bf16.msra.mxu1 %v3787_v0  ;;  %2910 = vmatprep.subr.bf16.mxu0 %v3788_v1  ;;  %v3881_v0 = vld [vmem:[%s4761_s9 + $0x3d4] ss:$8 sps:$4 sm:$0xff]   ;;  %v3876_v1 = vld [vmem:[%s4761_s9 + $0x2d0] ss:$8 sps:$4 sm:$0xff]  }
  0xea   : > { %2951 = vmatprep.subr.bf16.mxu1 %v3790_v2  ;;  %v3879_v2 = vld [vmem:[%s4761_s9 + $0x3d0] ss:$8 sps:$4 sm:$0xff]  }
  0xec   : > { %2911 = vmatpush1.bf16.msra.mxu0 %v3792_v3  ;;  %v3884_v3 = vld [vmem:[%s4761_s9 + $0x2e4] ss:$8 sps:$4 sm:$0xff]  }
  0xed   : > { %2952 = vmatpush1.bf16.msra.mxu1 %v3793_v4  ;;  %2962 = vmatprep.subr.bf16.mxu0 %v3800_v5  ;;  %v3887_v4 = vld [vmem:[%s4761_s9 + $0x3e4] ss:$8 sps:$4 sm:$0xff]   ;;  %v3882_v5 = vld [vmem:[%s4761_s9 + $0x2e0] ss:$8 sps:$4 sm:$0xff]  }
  0xee   : > { %3003 = vmatprep.subr.bf16.mxu1 %v3803_v6  ;;  %v3885_v6 = vld [vmem:[%s4761_s9 + $0x3e0] ss:$8 sps:$4 sm:$0xff]  }
  0xef   : > { %2913 = vmatmul.mubr.bf16.vlgmr.msra.gmra.mrb[0].mxu0 %v3363_v7  ;;  %v3890_v7 = vld [vmem:[%s4761_s9 + $0x2f4] ss:$8 sps:$4 sm:$0xff]  }
  0xf0   : > { %2954 = vmatmul.mubr.bf16.vlgmr.msra.gmra.mrb[0].mxu1 %v3365_v8  ;;  %2963 = vmatpush1.bf16.msra.mxu0 %v3798_v9  ;;  %v3893_v8 = vld [vmem:[%s4761_s9 + $0x3f4] ss:$8 sps:$4 sm:$0xff]   ;;  %v3888_v9 = vld [vmem:[%s4761_s9 + $0x2f0] ss:$8 sps:$4 sm:$0xff]  }
  0xf1   : > { %3004 = vmatpush1.bf16.msra.mxu1 %v3801_v10  ;;  %2964 = vmatprep.subr.bf16.mxu0 %v3806_v11  ;;  %v3891_v10 = vld [vmem:[%s4761_s9 + $0x3f0] ss:$8 sps:$4 sm:$0xff]   ;;  %v3900_v11 = vld [vmem:[%s4761_s9 + $0x404] ss:$8 sps:$4 sm:$0xff]  }
  0xf2   : > { %3005 = vmatprep.subr.bf16.mxu1 %v3809_v12  ;;  %2994 = vmatprep.mubr.bf16.mxu0 %v3368_v37  ;;  %v3903_v12 = vld [vmem:[%s4761_s9 + $0x504] ss:$8 sps:$4 sm:$0xff]   ;;  %v3930_v37 = vld [vmem:[%s4761_s9 + $0x454] ss:$8 sps:$4 sm:$0xff]  }
  0xf3   : > { %3035 = vmatprep.mubr.bf16.mxu1 %v3370_v38  ;;  %v3933_v38 = vld [vmem:[%s4761_s9 + $0x554] ss:$8 sps:$4 sm:$0xff]  }
  0xf4   : > { %2965 = vmatpush1.bf16.msra.mxu0 %v3804_v13  ;;  %v3367_v13 = vcombine.low %v4857_v33, %v4857_v33  ;;  %v3924_v33 = vld [vmem:[%s4761_s9 + $0x444] ss:$8 sps:$4 sm:$0xff]  }
  0xf5   : > { %3006 = vmatpush1.bf16.msra.mxu1 %v3807_v14  ;;  %2966 = vmatprep.subr.bf16.mxu0 %v3812_v15  ;;  %v3369_v14 = vcombine.low %v4860_v34, %v4860_v34  ;;  %v3898_v15 = vld [vmem:[%s4761_s9 + $0x400] ss:$8 sps:$4 sm:$0xff]   ;;  %v3927_v34 = vld [vmem:[%s4761_s9 + $0x544] ss:$8 sps:$4 sm:$0xff]  }
  0xf6   : > { %3007 = vmatprep.subr.bf16.mxu1 %v3815_v16  ;;  %v3901_v16 = vld [vmem:[%s4761_s9 + $0x500] ss:$8 sps:$4 sm:$0xff]  }
  0xf8   : > { %2967 = vmatpush1.bf16.msra.mxu0 %v3810_v17  ;;  %v3906_v17 = vld [vmem:[%s4761_s9 + $0x414] ss:$8 sps:$4 sm:$0xff]  }
  0xf9   : > { %3008 = vmatpush1.bf16.msra.mxu1 %v3813_v18  ;;  %2968 = vmatprep.subr.bf16.mxu0 %v3818_v19  ;;  %v3909_v18 = vld [vmem:[%s4761_s9 + $0x514] ss:$8 sps:$4 sm:$0xff]  }
  0xfa   : > { %3009 = vmatprep.subr.bf16.mxu1 %v3821_v20  ;;  %v4915_v19 = vld [vmem:[%s4754_s21 + $0x20] sm:$0xff]  ;;  %v4918_v20 = vld [vmem:[%s4754_s21 + $0x28] sm:$0xff] }
  0xfc   : > { %2969 = vmatpush1.bf16.msra.mxu0 %v3816_v21  ;;  %v3372_v21 = vcombine.high %v4915_v19, %v4915_v19 }
  0xfd   : > { %3010 = vmatpush1.bf16.msra.mxu1 %v3819_v22  ;;  %2970 = vmatprep.subr.bf16.mxu0 %v3824_v23  ;;  %v3374_v22 = vcombine.high %v4918_v20, %v4918_v20  ;;  %v3904_v23 = vld [vmem:[%s4761_s9 + $0x410] ss:$8 sps:$4 sm:$0xff]  }
  0xfe   : > { %3011 = vmatprep.subr.bf16.mxu1 %v3827_v24  ;;  %v3907_v24 = vld [vmem:[%s4761_s9 + $0x510] ss:$8 sps:$4 sm:$0xff]  }
 0x100   : > { %2971 = vmatpush1.bf16.msra.mxu0 %v3822_v25  ;;  %v3912_v25 = vld [vmem:[%s4761_s9 + $0x424] ss:$8 sps:$4 sm:$0xff]  }
 0x101   : > { %3012 = vmatpush1.bf16.msra.mxu1 %v3825_v26  ;;  %2972 = vmatprep.subr.bf16.mxu0 %v3830_v27  ;;  %v3915_v26 = vld [vmem:[%s4761_s9 + $0x524] ss:$8 sps:$4 sm:$0xff]   ;;  %v3910_v27 = vld [vmem:[%s4761_s9 + $0x420] ss:$8 sps:$4 sm:$0xff]  }
 0x102   : > { %3013 = vmatprep.subr.bf16.mxu1 %v3833_v28  ;;  %v3913_v28 = vld [vmem:[%s4761_s9 + $0x520] ss:$8 sps:$4 sm:$0xff]  }
 0x104   : > { %2973 = vmatpush1.bf16.msra.mxu0 %v3828_v29  ;;  %v3918_v29 = vld [vmem:[%s4761_s9 + $0x434] ss:$8 sps:$4 sm:$0xff]  }
 0x105   : > { %3014 = vmatpush1.bf16.msra.mxu1 %v3831_v30  ;;  %2974 = vmatprep.subr.bf16.mxu0 %v3836_v31  ;;  %v3921_v30 = vld [vmem:[%s4761_s9 + $0x534] ss:$8 sps:$4 sm:$0xff]   ;;  %v3916_v31 = vld [vmem:[%s4761_s9 + $0x430] ss:$8 sps:$4 sm:$0xff]  }
 0x106   : > { %3015 = vmatprep.subr.bf16.mxu1 %v3839_v32  ;;  %v3919_v32 = vld [vmem:[%s4761_s9 + $0x530] ss:$8 sps:$4 sm:$0xff]  }
 0x108   : > { %2975 = vmatpush1.bf16.msra.mxu0 %v3834_v35  ;;  %v3922_v35 = vld [vmem:[%s4761_s9 + $0x440] ss:$8 sps:$4 sm:$0xff]  }
 0x109   : > { %3016 = vmatpush1.bf16.msra.mxu1 %v3837_v36  ;;  %2976 = vmatprep.subr.bf16.mxu0 %v3842_v39  ;;  %v3925_v36 = vld [vmem:[%s4761_s9 + $0x540] ss:$8 sps:$4 sm:$0xff]   ;;  %v3928_v39 = vld [vmem:[%s4761_s9 + $0x450] ss:$8 sps:$4 sm:$0xff]  }
 0x10a   : > { %3017 = vmatprep.subr.bf16.mxu1 %v3845_v40  ;;  %v3931_v40 = vld [vmem:[%s4761_s9 + $0x550] ss:$8 sps:$4 sm:$0xff]  }
 0x10c   : > { %2977 = vmatpush1.bf16.msra.mxu0 %v3840_v41  ;;  %v3936_v41 = vld [vmem:[%s4761_s9 + $0x464] ss:$8 sps:$4 sm:$0xff]  }
 0x10d   : > { %3018 = vmatpush1.bf16.msra.mxu1 %v3843_v42  ;;  %2978 = vmatprep.subr.bf16.mxu0 %v3848_v43  ;;  %v3939_v42 = vld [vmem:[%s4761_s9 + $0x564] ss:$8 sps:$4 sm:$0xff]   ;;  %v3934_v43 = vld [vmem:[%s4761_s9 + $0x460] ss:$8 sps:$4 sm:$0xff]  }
 0x10e   : > { %3019 = vmatprep.subr.bf16.mxu1 %v3851_v44  ;;  %v3937_v44 = vld [vmem:[%s4761_s9 + $0x560] ss:$8 sps:$4 sm:$0xff]  }
 0x110   : > { %2979 = vmatpush1.bf16.msra.mxu0 %v3846_v45  ;;  %v3942_v45 = vld [vmem:[%s4761_s9 + $0x474] ss:$8 sps:$4 sm:$0xff]  }
 0x111   : > { %3020 = vmatpush1.bf16.msra.mxu1 %v3849_v46  ;;  %2980 = vmatprep.subr.bf16.mxu0 %v3854_v47  ;;  %v3945_v46 = vld [vmem:[%s4761_s9 + $0x574] ss:$8 sps:$4 sm:$0xff]   ;;  %v3940_v47 = vld [vmem:[%s4761_s9 + $0x470] ss:$8 sps:$4 sm:$0xff]  }
 0x112   : > { %3021 = vmatprep.subr.bf16.mxu1 %v3857_v48  ;;  %v3943_v48 = vld [vmem:[%s4761_s9 + $0x570] ss:$8 sps:$4 sm:$0xff]  }
 0x114   : > { %2981 = vmatpush1.bf16.msra.mxu0 %v3852_v49  ;;  %v3948_v49 = vld [vmem:[%s4761_s9 + $0x484] ss:$8 sps:$4 sm:$0xff]  }
 0x115   : > { %3022 = vmatpush1.bf16.msra.mxu1 %v3855_v50  ;;  %2982 = vmatprep.subr.bf16.mxu0 %v3860_v51  ;;  %v3951_v50 = vld [vmem:[%s4761_s9 + $0x584] ss:$8 sps:$4 sm:$0xff]   ;;  %v3946_v51 = vld [vmem:[%s4761_s9 + $0x480] ss:$8 sps:$4 sm:$0xff]  }
 0x116   : > { %3023 = vmatprep.subr.bf16.mxu1 %v3863_v52  ;;  %v3949_v52 = vld [vmem:[%s4761_s9 + $0x580] ss:$8 sps:$4 sm:$0xff]  }
 0x118   : > { %2983 = vmatpush1.bf16.msra.mxu0 %v3858_v53  ;;  %v3954_v53 = vld [vmem:[%s4761_s9 + $0x494] ss:$8 sps:$4 sm:$0xff]  }
 0x119   : > { %3024 = vmatpush1.bf16.msra.mxu1 %v3861_v54  ;;  %2984 = vmatprep.subr.bf16.mxu0 %v3866_v55  ;;  %v3957_v54 = vld [vmem:[%s4761_s9 + $0x594] ss:$8 sps:$4 sm:$0xff]   ;;  %v3952_v55 = vld [vmem:[%s4761_s9 + $0x490] ss:$8 sps:$4 sm:$0xff]  }
 0x11a   : > { %3025 = vmatprep.subr.bf16.mxu1 %v3869_v56  ;;  %v3955_v56 = vld [vmem:[%s4761_s9 + $0x590] ss:$8 sps:$4 sm:$0xff]  }
 0x11c   : > { %2985 = vmatpush1.bf16.msra.mxu0 %v3864_v57  ;;  %v3960_v57 = vld [vmem:[%s4761_s9 + $0x4a4] ss:$8 sps:$4 sm:$0xff]  }
 0x11d   : > { %3026 = vmatpush1.bf16.msra.mxu1 %v3867_v58  ;;  %2986 = vmatprep.subr.bf16.mxu0 %v3872_v59  ;;  %v3963_v58 = vld [vmem:[%s4761_s9 + $0x5a4] ss:$8 sps:$4 sm:$0xff]   ;;  %v3958_v59 = vld [vmem:[%s4761_s9 + $0x4a0] ss:$8 sps:$4 sm:$0xff]  }
 0x11e   : > { %3027 = vmatprep.subr.bf16.mxu1 %v3875_v60  ;;  %v3961_v60 = vld [vmem:[%s4761_s9 + $0x5a0] ss:$8 sps:$4 sm:$0xff]  }
 0x120   : > { %2987 = vmatpush1.bf16.msra.mxu0 %v3870_v61  ;;  %v3966_v61 = vld [vmem:[%s4761_s9 + $0x4b4] ss:$8 sps:$4 sm:$0xff]  }
 0x121   : > { %3028 = vmatpush1.bf16.msra.mxu1 %v3873_v62  ;;  %2988 = vmatprep.subr.bf16.mxu0 %v3878_v63  ;;  %v3969_v62 = vld [vmem:[%s4761_s9 + $0x5b4] ss:$8 sps:$4 sm:$0xff]   ;;  %v3964_v63 = vld [vmem:[%s4761_s9 + $0x4b0] ss:$8 sps:$4 sm:$0xff]  }
 0x122   : > { %3029 = vmatprep.subr.bf16.mxu1 %v3881_v0  ;;  %v3967_v0 = vld [vmem:[%s4761_s9 + $0x5b0] ss:$8 sps:$4 sm:$0xff]  }
 0x124   : > { %2989 = vmatpush1.bf16.msra.mxu0 %v3876_v1  ;;  %v3972_v1 = vld [vmem:[%s4761_s9 + $0x4c4] ss:$8 sps:$4 sm:$0xff]  }
 0x125   : > { %3030 = vmatpush1.bf16.msra.mxu1 %v3879_v2  ;;  %2990 = vmatprep.subr.bf16.mxu0 %v3884_v3  ;;  %v3975_v2 = vld [vmem:[%s4761_s9 + $0x5c4] ss:$8 sps:$4 sm:$0xff]   ;;  %v3970_v3 = vld [vmem:[%s4761_s9 + $0x4c0] ss:$8 sps:$4 sm:$0xff]  }
 0x126   : > { %3031 = vmatprep.subr.bf16.mxu1 %v3887_v4  ;;  %v3973_v4 = vld [vmem:[%s4761_s9 + $0x5c0] ss:$8 sps:$4 sm:$0xff]  }
 0x128   : > { %2991 = vmatpush1.bf16.msra.mxu0 %v3882_v5  ;;  %v3978_v5 = vld [vmem:[%s4761_s9 + $0x4d4] ss:$8 sps:$4 sm:$0xff]  }
 0x129   : > { %3032 = vmatpush1.bf16.msra.mxu1 %v3885_v6  ;;  %2992 = vmatprep.subr.bf16.mxu0 %v3890_v7  ;;  %v3981_v6 = vld [vmem:[%s4761_s9 + $0x5d4] ss:$8 sps:$4 sm:$0xff]   ;;  %v3976_v7 = vld [vmem:[%s4761_s9 + $0x4d0] ss:$8 sps:$4 sm:$0xff]  }
 0x12a   : > { %3033 = vmatprep.subr.bf16.mxu1 %v3893_v8  ;;  %v3979_v8 = vld [vmem:[%s4761_s9 + $0x5d0] ss:$8 sps:$4 sm:$0xff]  }
 0x12c   : > { %2993 = vmatpush1.bf16.msra.mxu0 %v3888_v9  ;;  %v3984_v9 = vld [vmem:[%s4761_s9 + $0x4e4] ss:$8 sps:$4 sm:$0xff]  }
 0x12d   : > { %3034 = vmatpush1.bf16.msra.mxu1 %v3891_v10  ;;  %3044 = vmatprep.subr.bf16.mxu0 %v3900_v11  ;;  %v3987_v10 = vld [vmem:[%s4761_s9 + $0x5e4] ss:$8 sps:$4 sm:$0xff]   ;;  %v3982_v11 = vld [vmem:[%s4761_s9 + $0x4e0] ss:$8 sps:$4 sm:$0xff]  }
 0x12e   : > { %3085 = vmatprep.subr.bf16.mxu1 %v3903_v12  ;;  %v3985_v12 = vld [vmem:[%s4761_s9 + $0x5e0] ss:$8 sps:$4 sm:$0xff]  }
 0x12f   : > { %2995 = vmatmul.mubr.bf16.vlgmr.msra.gmra.mrb[4].mxu0 %v3367_v13  ;;  %v3990_v13 = vld [vmem:[%s4761_s9 + $0x4f4] ss:$8 sps:$4 sm:$0xff]  }
 0x130   : > { %3036 = vmatmul.mubr.bf16.vlgmr.msra.gmra.mrb[4].mxu1 %v3369_v14  ;;  %3045 = vmatpush1.bf16.msra.mxu0 %v3898_v15  ;;  %v3993_v14 = vld [vmem:[%s4761_s9 + $0x5f4] ss:$8 sps:$4 sm:$0xff]   ;;  %v3988_v15 = vld [vmem:[%s4761_s9 + $0x4f0] ss:$8 sps:$4 sm:$0xff]  }
 0x131   : > { %3086 = vmatpush1.bf16.msra.mxu1 %v3901_v16  ;;  %3046 = vmatprep.subr.bf16.mxu0 %v3906_v17  ;;  %v3991_v16 = vld [vmem:[%s4761_s9 + $0x5f0] ss:$8 sps:$4 sm:$0xff]   ;;  %v4000_v17 = vld [vmem:[%s4761_s9 + $0x604] ss:$8 sps:$4 sm:$0xff]  }
 0x132   : > { %3087 = vmatprep.subr.bf16.mxu1 %v3909_v18  ;;  %3076 = vmatprep.mubr.bf16.mxu0 %v3372_v21  ;;  %v4003_v18 = vld [vmem:[%s4761_s9 + $0x704] ss:$8 sps:$4 sm:$0xff]   ;;  %v3371_v21 = vcombine.low %v4915_v19, %v4915_v19 }
 0x133   : > { %3117 = vmatprep.mubr.bf16.mxu1 %v3374_v22  ;;  %v3373_v22 = vcombine.low %v4918_v20, %v4918_v20 }
 0x134   : > { %3047 = vmatpush1.bf16.msra.mxu0 %v3904_v23  ;;  %v4989_v23 = vld [vmem:[%s4754_s21 + $0x30] sm:$0xff] }
 0x135   : > { %3088 = vmatpush1.bf16.msra.mxu1 %v3907_v24  ;;  %3048 = vmatprep.subr.bf16.mxu0 %v3912_v25  ;;  %v4992_v24 = vld [vmem:[%s4754_s21 + $0x38] sm:$0xff]  ;;  %v3376_v19 = vcombine.high %v4989_v23, %v4989_v23 }
 0x136   : > { %3089 = vmatprep.subr.bf16.mxu1 %v3915_v26  ;;  %v3998_v25 = vld [vmem:[%s4761_s9 + $0x600] ss:$8 sps:$4 sm:$0xff]   ;;  %v3378_v20 = vcombine.high %v4992_v24, %v4992_v24 }
 0x137   : > { %v4001_v26 = vld [vmem:[%s4761_s9 + $0x700] ss:$8 sps:$4 sm:$0xff]  }
 0x138   : > { %3049 = vmatpush1.bf16.msra.mxu0 %v3910_v27  ;;  %v4006_v27 = vld [vmem:[%s4761_s9 + $0x614] ss:$8 sps:$4 sm:$0xff]  }
 0x139   : > { %3090 = vmatpush1.bf16.msra.mxu1 %v3913_v28  ;;  %3050 = vmatprep.subr.bf16.mxu0 %v3918_v29  ;;  %v4009_v28 = vld [vmem:[%s4761_s9 + $0x714] ss:$8 sps:$4 sm:$0xff]   ;;  %v4004_v29 = vld [vmem:[%s4761_s9 + $0x610] ss:$8 sps:$4 sm:$0xff]  }
 0x13a   : > { %3091 = vmatprep.subr.bf16.mxu1 %v3921_v30  ;;  %v4007_v30 = vld [vmem:[%s4761_s9 + $0x710] ss:$8 sps:$4 sm:$0xff]  }
 0x13c   : > { %3051 = vmatpush1.bf16.msra.mxu0 %v3916_v31  ;;  %v4012_v31 = vld [vmem:[%s4761_s9 + $0x624] ss:$8 sps:$4 sm:$0xff]  }
 0x13d   : > { %3092 = vmatpush1.bf16.msra.mxu1 %v3919_v32  ;;  %3052 = vmatprep.subr.bf16.mxu0 %v3924_v33  ;;  %v4015_v32 = vld [vmem:[%s4761_s9 + $0x724] ss:$8 sps:$4 sm:$0xff]   ;;  %v4010_v33 = vld [vmem:[%s4761_s9 + $0x620] ss:$8 sps:$4 sm:$0xff]  }
 0x13e   : > { %3093 = vmatprep.subr.bf16.mxu1 %v3927_v34  ;;  %v4013_v34 = vld [vmem:[%s4761_s9 + $0x720] ss:$8 sps:$4 sm:$0xff]  }
 0x140   : > { %3053 = vmatpush1.bf16.msra.mxu0 %v3922_v35  ;;  %v4018_v35 = vld [vmem:[%s4761_s9 + $0x634] ss:$8 sps:$4 sm:$0xff]  }
 0x141   : > { %3094 = vmatpush1.bf16.msra.mxu1 %v3925_v36  ;;  %3054 = vmatprep.subr.bf16.mxu0 %v3930_v37  ;;  %v4021_v36 = vld [vmem:[%s4761_s9 + $0x734] ss:$8 sps:$4 sm:$0xff]   ;;  %v4016_v37 = vld [vmem:[%s4761_s9 + $0x630] ss:$8 sps:$4 sm:$0xff]  }
 0x142   : > { %3095 = vmatprep.subr.bf16.mxu1 %v3933_v38  ;;  %v4019_v38 = vld [vmem:[%s4761_s9 + $0x730] ss:$8 sps:$4 sm:$0xff]  }
 0x144   : > { %3055 = vmatpush1.bf16.msra.mxu0 %v3928_v39  ;;  %v4024_v39 = vld [vmem:[%s4761_s9 + $0x644] ss:$8 sps:$4 sm:$0xff]  }
 0x145   : > { %3096 = vmatpush1.bf16.msra.mxu1 %v3931_v40  ;;  %3056 = vmatprep.subr.bf16.mxu0 %v3936_v41  ;;  %v4027_v40 = vld [vmem:[%s4761_s9 + $0x744] ss:$8 sps:$4 sm:$0xff]   ;;  %v4022_v41 = vld [vmem:[%s4761_s9 + $0x640] ss:$8 sps:$4 sm:$0xff]  }
 0x146   : > { %3097 = vmatprep.subr.bf16.mxu1 %v3939_v42  ;;  %v4025_v42 = vld [vmem:[%s4761_s9 + $0x740] ss:$8 sps:$4 sm:$0xff]  }
 0x148   : > { %3057 = vmatpush1.bf16.msra.mxu0 %v3934_v43  ;;  %v4030_v43 = vld [vmem:[%s4761_s9 + $0x654] ss:$8 sps:$4 sm:$0xff]  }
 0x149   : > { %3098 = vmatpush1.bf16.msra.mxu1 %v3937_v44  ;;  %3058 = vmatprep.subr.bf16.mxu0 %v3942_v45  ;;  %v4033_v44 = vld [vmem:[%s4761_s9 + $0x754] ss:$8 sps:$4 sm:$0xff]   ;;  %v4028_v45 = vld [vmem:[%s4761_s9 + $0x650] ss:$8 sps:$4 sm:$0xff]  }
 0x14a   : > { %3099 = vmatprep.subr.bf16.mxu1 %v3945_v46  ;;  %v4031_v46 = vld [vmem:[%s4761_s9 + $0x750] ss:$8 sps:$4 sm:$0xff]  }
 0x14c   : > { %3059 = vmatpush1.bf16.msra.mxu0 %v3940_v47  ;;  %v4036_v47 = vld [vmem:[%s4761_s9 + $0x664] ss:$8 sps:$4 sm:$0xff]  }
 0x14d   : > { %3100 = vmatpush1.bf16.msra.mxu1 %v3943_v48  ;;  %3060 = vmatprep.subr.bf16.mxu0 %v3948_v49  ;;  %v4039_v48 = vld [vmem:[%s4761_s9 + $0x764] ss:$8 sps:$4 sm:$0xff]   ;;  %v4034_v49 = vld [vmem:[%s4761_s9 + $0x660] ss:$8 sps:$4 sm:$0xff]  }
 0x14e   : > { %3101 = vmatprep.subr.bf16.mxu1 %v3951_v50  ;;  %v4037_v50 = vld [vmem:[%s4761_s9 + $0x760] ss:$8 sps:$4 sm:$0xff]  }
 0x150   : > { %3061 = vmatpush1.bf16.msra.mxu0 %v3946_v51  ;;  %v4042_v51 = vld [vmem:[%s4761_s9 + $0x674] ss:$8 sps:$4 sm:$0xff]  }
 0x151   : > { %3102 = vmatpush1.bf16.msra.mxu1 %v3949_v52  ;;  %3062 = vmatprep.subr.bf16.mxu0 %v3954_v53  ;;  %v4045_v52 = vld [vmem:[%s4761_s9 + $0x774] ss:$8 sps:$4 sm:$0xff]   ;;  %v4040_v53 = vld [vmem:[%s4761_s9 + $0x670] ss:$8 sps:$4 sm:$0xff]  }
 0x152   : > { %3103 = vmatprep.subr.bf16.mxu1 %v3957_v54  ;;  %v4043_v54 = vld [vmem:[%s4761_s9 + $0x770] ss:$8 sps:$4 sm:$0xff]  }
 0x154   : > { %3063 = vmatpush1.bf16.msra.mxu0 %v3952_v55  ;;  %v4048_v55 = vld [vmem:[%s4761_s9 + $0x684] ss:$8 sps:$4 sm:$0xff]  }
 0x155   : > { %3104 = vmatpush1.bf16.msra.mxu1 %v3955_v56  ;;  %3064 = vmatprep.subr.bf16.mxu0 %v3960_v57  ;;  %v4051_v56 = vld [vmem:[%s4761_s9 + $0x784] ss:$8 sps:$4 sm:$0xff]   ;;  %v4046_v57 = vld [vmem:[%s4761_s9 + $0x680] ss:$8 sps:$4 sm:$0xff]  }
 0x156   : > { %3105 = vmatprep.subr.bf16.mxu1 %v3963_v58  ;;  %v4049_v58 = vld [vmem:[%s4761_s9 + $0x780] ss:$8 sps:$4 sm:$0xff]  }
 0x158   : > { %3065 = vmatpush1.bf16.msra.mxu0 %v3958_v59  ;;  %v4054_v59 = vld [vmem:[%s4761_s9 + $0x694] ss:$8 sps:$4 sm:$0xff]  }
 0x159   : > { %3106 = vmatpush1.bf16.msra.mxu1 %v3961_v60  ;;  %3066 = vmatprep.subr.bf16.mxu0 %v3966_v61  ;;  %v4057_v60 = vld [vmem:[%s4761_s9 + $0x794] ss:$8 sps:$4 sm:$0xff]   ;;  %v4052_v61 = vld [vmem:[%s4761_s9 + $0x690] ss:$8 sps:$4 sm:$0xff]  }
 0x15a   : > { %3107 = vmatprep.subr.bf16.mxu1 %v3969_v62  ;;  %v4055_v62 = vld [vmem:[%s4761_s9 + $0x790] ss:$8 sps:$4 sm:$0xff]  }
 0x15c   : > { %3067 = vmatpush1.bf16.msra.mxu0 %v3964_v63  ;;  %v4060_v63 = vld [vmem:[%s4761_s9 + $0x6a4] ss:$8 sps:$4 sm:$0xff]  }
 0x15d   : > { %3108 = vmatpush1.bf16.msra.mxu1 %v3967_v0  ;;  %3068 = vmatprep.subr.bf16.mxu0 %v3972_v1  ;;  %v4063_v0 = vld [vmem:[%s4761_s9 + $0x7a4] ss:$8 sps:$4 sm:$0xff]   ;;  %v4058_v1 = vld [vmem:[%s4761_s9 + $0x6a0] ss:$8 sps:$4 sm:$0xff]  }
 0x15e   : > { %3109 = vmatprep.subr.bf16.mxu1 %v3975_v2  ;;  %v4061_v2 = vld [vmem:[%s4761_s9 + $0x7a0] ss:$8 sps:$4 sm:$0xff]  }
 0x160   : > { %3069 = vmatpush1.bf16.msra.mxu0 %v3970_v3  ;;  %v4066_v3 = vld [vmem:[%s4761_s9 + $0x6b4] ss:$8 sps:$4 sm:$0xff]  }
 0x161   : > { %3110 = vmatpush1.bf16.msra.mxu1 %v3973_v4  ;;  %3070 = vmatprep.subr.bf16.mxu0 %v3978_v5  ;;  %v4069_v4 = vld [vmem:[%s4761_s9 + $0x7b4] ss:$8 sps:$4 sm:$0xff]   ;;  %v4064_v5 = vld [vmem:[%s4761_s9 + $0x6b0] ss:$8 sps:$4 sm:$0xff]  }
 0x162   : > { %3111 = vmatprep.subr.bf16.mxu1 %v3981_v6  ;;  %v4067_v6 = vld [vmem:[%s4761_s9 + $0x7b0] ss:$8 sps:$4 sm:$0xff]  }
 0x164   : > { %3071 = vmatpush1.bf16.msra.mxu0 %v3976_v7  ;;  %v4072_v7 = vld [vmem:[%s4761_s9 + $0x6c4] ss:$8 sps:$4 sm:$0xff]  }
 0x165   : > { %3112 = vmatpush1.bf16.msra.mxu1 %v3979_v8  ;;  %3072 = vmatprep.subr.bf16.mxu0 %v3984_v9  ;;  %v4075_v8 = vld [vmem:[%s4761_s9 + $0x7c4] ss:$8 sps:$4 sm:$0xff]   ;;  %v4070_v9 = vld [vmem:[%s4761_s9 + $0x6c0] ss:$8 sps:$4 sm:$0xff]  }
 0x166   : > { %3113 = vmatprep.subr.bf16.mxu1 %v3987_v10  ;;  %v4073_v10 = vld [vmem:[%s4761_s9 + $0x7c0] ss:$8 sps:$4 sm:$0xff]  }
 0x168   : > { %3073 = vmatpush1.bf16.msra.mxu0 %v3982_v11  ;;  %v4078_v11 = vld [vmem:[%s4761_s9 + $0x6d4] ss:$8 sps:$4 sm:$0xff]  }
 0x169   : > { %3114 = vmatpush1.bf16.msra.mxu1 %v3985_v12  ;;  %3074 = vmatprep.subr.bf16.mxu0 %v3990_v13  ;;  %v4081_v12 = vld [vmem:[%s4761_s9 + $0x7d4] ss:$8 sps:$4 sm:$0xff]   ;;  %v4076_v13 = vld [vmem:[%s4761_s9 + $0x6d0] ss:$8 sps:$4 sm:$0xff]  }
 0x16a   : > { %3115 = vmatprep.subr.bf16.mxu1 %v3993_v14  ;;  %v4079_v14 = vld [vmem:[%s4761_s9 + $0x7d0] ss:$8 sps:$4 sm:$0xff]  }
 0x16c   : > { %3075 = vmatpush1.bf16.msra.mxu0 %v3988_v15  ;;  %v4084_v15 = vld [vmem:[%s4761_s9 + $0x6e4] ss:$8 sps:$4 sm:$0xff]  }
 0x16d   : > { %3116 = vmatpush1.bf16.msra.mxu1 %v3991_v16  ;;  %3126 = vmatprep.subr.bf16.mxu0 %v4000_v17  ;;  %v4087_v16 = vld [vmem:[%s4761_s9 + $0x7e4] ss:$8 sps:$4 sm:$0xff]   ;;  %v4082_v17 = vld [vmem:[%s4761_s9 + $0x6e0] ss:$8 sps:$4 sm:$0xff]  }
 0x16e   : > { %3167 = vmatprep.subr.bf16.mxu1 %v4003_v18  ;;  %v4085_v18 = vld [vmem:[%s4761_s9 + $0x7e0] ss:$8 sps:$4 sm:$0xff]  }
 0x16f   : > { %3077 = vmatmul.mubr.bf16.vlgmr.msra.gmra.mrb[8].mxu0 %v3371_v21  ;;  %v4090_v21 = vld [vmem:[%s4761_s9 + $0x6f4] ss:$8 sps:$4 sm:$0xff]  }
 0x170   : > { %3118 = vmatmul.mubr.bf16.vlgmr.msra.gmra.mrb[8].mxu1 %v3373_v22  ;;  %3127 = vmatpush1.bf16.msra.mxu0 %v3998_v25  ;;  %v4093_v22 = vld [vmem:[%s4761_s9 + $0x7f4] ss:$8 sps:$4 sm:$0xff]   ;;  %v4088_v25 = vld [vmem:[%s4761_s9 + $0x6f0] ss:$8 sps:$4 sm:$0xff]  }
 0x171   : > { %3168 = vmatpush1.bf16.msra.mxu1 %v4001_v26  ;;  %3128 = vmatprep.subr.bf16.mxu0 %v4006_v27  ;;  %v4091_v26 = vld [vmem:[%s4761_s9 + $0x7f0] ss:$8 sps:$4 sm:$0xff]   ;;  %v3375_v27 = vcombine.low %v4989_v23, %v4989_v23 }
 0x172   : > { %3169 = vmatprep.subr.bf16.mxu1 %v4009_v28  ;;  %3158 = vmatprep.mubr.bf16.mxu0 %v3376_v19  ;;  %v3377_v28 = vcombine.low %v4992_v24, %v4992_v24 }
 0x173   : > { %3199 = vmatprep.mubr.bf16.mxu1 %v3378_v20 }
 0x174   : > { %3129 = vmatpush1.bf16.msra.mxu0 %v4004_v29 }
 0x175   : > { %3170 = vmatpush1.bf16.msra.mxu1 %v4007_v30  ;;  %3130 = vmatprep.subr.bf16.mxu0 %v4012_v31 }
 0x176   : > { %3171 = vmatprep.subr.bf16.mxu1 %v4015_v32 }
 0x178   : > { %3131 = vmatpush1.bf16.msra.mxu0 %v4010_v33 }
 0x179   : > { %3172 = vmatpush1.bf16.msra.mxu1 %v4013_v34  ;;  %3132 = vmatprep.subr.bf16.mxu0 %v4018_v35 }
 0x17a   : > { %3173 = vmatprep.subr.bf16.mxu1 %v4021_v36 }
 0x17c   : > { %3133 = vmatpush1.bf16.msra.mxu0 %v4016_v37 }
 0x17d   : > { %3174 = vmatpush1.bf16.msra.mxu1 %v4019_v38  ;;  %3134 = vmatprep.subr.bf16.mxu0 %v4024_v39 }
 0x17e   : > { %3175 = vmatprep.subr.bf16.mxu1 %v4027_v40 }
 0x180   : > { %3135 = vmatpush1.bf16.msra.mxu0 %v4022_v41 }
 0x181   : > { %3176 = vmatpush1.bf16.msra.mxu1 %v4025_v42  ;;  %3136 = vmatprep.subr.bf16.mxu0 %v4030_v43 }
 0x182   : > { %3177 = vmatprep.subr.bf16.mxu1 %v4033_v44 }
 0x184   : > { %3137 = vmatpush1.bf16.msra.mxu0 %v4028_v45 }
 0x185   : > { %3178 = vmatpush1.bf16.msra.mxu1 %v4031_v46  ;;  %3138 = vmatprep.subr.bf16.mxu0 %v4036_v47 }
 0x186   : > { %3179 = vmatprep.subr.bf16.mxu1 %v4039_v48 }
 0x188   : > { %3139 = vmatpush1.bf16.msra.mxu0 %v4034_v49 }
 0x189   : > { %3180 = vmatpush1.bf16.msra.mxu1 %v4037_v50  ;;  %3140 = vmatprep.subr.bf16.mxu0 %v4042_v51 }
 0x18a   : > { %3181 = vmatprep.subr.bf16.mxu1 %v4045_v52 }
 0x18c   : > { %3141 = vmatpush1.bf16.msra.mxu0 %v4040_v53 }
 0x18d   : > { %3182 = vmatpush1.bf16.msra.mxu1 %v4043_v54  ;;  %3142 = vmatprep.subr.bf16.mxu0 %v4048_v55 }
 0x18e   : > { %3183 = vmatprep.subr.bf16.mxu1 %v4051_v56 }
 0x190   : > { %3143 = vmatpush1.bf16.msra.mxu0 %v4046_v57 }
 0x191   : > { %3184 = vmatpush1.bf16.msra.mxu1 %v4049_v58  ;;  %3144 = vmatprep.subr.bf16.mxu0 %v4054_v59 }
 0x192   : > { %3185 = vmatprep.subr.bf16.mxu1 %v4057_v60 }
 0x194   : > { %3145 = vmatpush1.bf16.msra.mxu0 %v4052_v61 }
 0x195   : > { %3186 = vmatpush1.bf16.msra.mxu1 %v4055_v62  ;;  %3146 = vmatprep.subr.bf16.mxu0 %v4060_v63 }
 0x196   : > { %3187 = vmatprep.subr.bf16.mxu1 %v4063_v0  ;;  %v1278_v0 = vld [vmem:[#allocation2] sm:$0xff] }
 0x198   : > { %3147 = vmatpush1.bf16.msra.mxu0 %v4058_v1 }
 0x199   : > { %3188 = vmatpush1.bf16.msra.mxu1 %v4061_v2  ;;  %3148 = vmatprep.subr.bf16.mxu0 %v4066_v3 }
 0x19a   : > { %3189 = vmatprep.subr.bf16.mxu1 %v4069_v4 }
 0x19c   : > { %3149 = vmatpush1.bf16.msra.mxu0 %v4064_v5  ;;  %v1279_v5 = vld [vmem:[#allocation2 + $0x8] sm:$0xff] }
 0x19d   : > { %3190 = vmatpush1.bf16.msra.mxu1 %v4067_v6  ;;  %3150 = vmatprep.subr.bf16.mxu0 %v4072_v7 }
 0x19e   : > { %3191 = vmatprep.subr.bf16.mxu1 %v4075_v8 }
 0x1a0   : > { %3151 = vmatpush1.bf16.msra.mxu0 %v4070_v9 }
 0x1a1   : > { %3192 = vmatpush1.bf16.msra.mxu1 %v4073_v10  ;;  %3152 = vmatprep.subr.bf16.mxu0 %v4078_v11 }
 0x1a2   : > { %3193 = vmatprep.subr.bf16.mxu1 %v4081_v12 }
 0x1a4   : > { %3153 = vmatpush1.bf16.msra.mxu0 %v4076_v13 }
 0x1a5   : > { %3194 = vmatpush1.bf16.msra.mxu1 %v4079_v14  ;;  %3154 = vmatprep.subr.bf16.mxu0 %v4084_v15 }
 0x1a6   : > { %3195 = vmatprep.subr.bf16.mxu1 %v4087_v16 }
 0x1a8   : > { %3155 = vmatpush1.bf16.msra.mxu0 %v4082_v17 }
 0x1a9   : > { %3196 = vmatpush1.bf16.msra.mxu1 %v4085_v18  ;;  %3156 = vmatprep.subr.bf16.mxu0 %v4090_v21 }
 0x1aa   : > { %3197 = vmatprep.subr.bf16.mxu1 %v4093_v22 }
 0x1ac   : > { %3157 = vmatpush1.bf16.msra.mxu0 %v4088_v25 }
 0x1ad   : > { %3198 = vmatpush1.bf16.msra.mxu1 %v4091_v26 }
 0x1af   : > { %3159 = vmatmul.mubr.bf16.vlgmr.msra.gmra.mrb[12].mxu0 %v3375_v27 }
 0x1b0   : > { %3200 = vmatmul.mubr.bf16.vlgmr.msra.gmra.mrb[12].mxu1 %v3377_v28 }
 0x1c2   : > { %v2914_v19 = vpop.f32.mrb[0].mxu0 }
 0x1c3   : > { %v2955_v20 = vpop.f32.mrb[0].mxu1  ;;  %v2916_v30 = vpop.f32.mrb[1].mxu0 }
 0x1c4   : > { %v2956_v29 = vadd.f32 %v2955_v20, %v2914_v19  ;;  %v2957_v31 = vpop.f32.mrb[1].mxu1  ;;  %v2918_v33 = vpop.f32.mrb[2].mxu0 }
 0x1c5   : > { %v2958_v32 = vadd.f32 %v2957_v31, %v2916_v30  ;;  %v2959_v34 = vpop.f32.mrb[2].mxu1  ;;  %v2919_v35 = vpop.f32.mrb[3].mxu0 }
 0x1c6   : > { %v2960_v36 = vpop.f32.mrb[3].mxu1 }
 0x202   : > { %v2996_v37 = vpop.f32.mrb[4].mxu0 }
 0x203   : > { %v3037_v38 = vpop.f32.mrb[4].mxu1  ;;  %v2997_v23 = vadd.f32 %v2996_v37, %v2956_v29  ;;  %v2998_v39 = vpop.f32.mrb[5].mxu0 }
 0x204   : > { %v3039_v40 = vpop.f32.mrb[5].mxu1  ;;  %v2999_v24 = vadd.f32 %v2998_v39, %v2958_v32  ;;  %v3000_v41 = vpop.f32.mrb[6].mxu0 }
 0x205   : > { %v3041_v42 = vpop.f32.mrb[6].mxu1  ;;  %v3038_v43 = vadd.f32 %v3037_v38, %v2997_v23  ;;  %v3001_v44 = vpop.f32.mrb[7].mxu0 }
 0x206   : > { %v3042_v45 = vpop.f32.mrb[7].mxu1  ;;  %v3040_v46 = vadd.f32 %v3039_v40, %v2999_v24 }
 0x242   : > { %v3078_v47 = vpop.f32.mrb[8].mxu0 }
 0x243   : > { %v3119_v48 = vpop.f32.mrb[8].mxu1  ;;  %v3079_v49 = vadd.f32 %v3078_v47, %v3038_v43  ;;  %v3080_v50 = vpop.f32.mrb[9].mxu0 }
 0x244   : > { %v3121_v51 = vpop.f32.mrb[9].mxu1  ;;  %v3081_v52 = vadd.f32 %v3080_v50, %v3040_v46  ;;  %v3082_v53 = vpop.f32.mrb[10].mxu0 }
 0x245   : > { %v3123_v54 = vpop.f32.mrb[10].mxu1  ;;  %v3120_v55 = vadd.f32 %v3119_v48, %v3079_v49  ;;  %v3083_v56 = vpop.f32.mrb[11].mxu0 }
 0x246   : > { %v3124_v57 = vpop.f32.mrb[11].mxu1  ;;  %v3122_v58 = vadd.f32 %v3121_v51, %v3081_v52 }
 0x282   : > { %v3160_v59 = vpop.f32.mrb[12].mxu0 }
 0x283   : > { %v3201_v60 = vpop.f32.mrb[12].mxu1  ;;  %v3161_v61 = vadd.f32 %v3160_v59, %v3120_v55  ;;  %v3162_v62 = vpop.f32.mrb[13].mxu0 }
 0x284   : > { %v3203_v63 = vpop.f32.mrb[13].mxu1  ;;  %v3163_v1 = vadd.f32 %v3162_v62, %v3122_v58  ;;  %v3164_v2 = vpop.f32.mrb[14].mxu0  ;;  %3215 = sbr.rel (%p3635_p13) target bundleno = 664 (0x298), region = 74 }
 0x285   : > { %v3205_v3 = vpop.f32.mrb[14].mxu1  ;;  %v3202_v4 = vadd.f32 %v3201_v60, %v3161_v61  ;;  %v3165_v6 = vpop.f32.mrb[15].mxu0 }
 0x286   : > { %v3206_v7 = vpop.f32.mrb[15].mxu1  ;;  %v3204_v8 = vadd.f32 %v3203_v63, %v3163_v1 }
 0x287   : > { %v3208_v9 = vadd.f32 %v3202_v4, %v1278_v0 }
 0x288   : > { %v3209_v10 = vadd.f32 %v3204_v8, %v1279_v5 }
 0x289   : > { %3210 = vst [vmem:[#allocation2] sm:$0xff] %v3208_v9 }
 0x28a   : > { %3211 = vst [vmem:[#allocation2 + $0x8] sm:$0xff] %v3209_v10 }
 0x290   : > { %v3216_v11 = vld [vmem:[#allocation2] sm:$0xff] }
 0x291   : > { %v3217_v12 = vld [vmem:[#allocation2 + $0x8] sm:$0xff]  ;;  %vm3218_vm0 = vcmp.ge.f32.partialorder %v3216_v11, 0.0  ;;  %v3220_v13 = vmul.f32 0.2, %v3216_v11 }
 0x292   : > { %vm3219_vm1 = vcmp.ge.f32.partialorder %v3217_v12, 0.0  ;;  %v3221_v14 = vmul.f32 0.2, %v3217_v12 }
 0x293   : > { %v3222_v15 = vsel %vm3218_vm0, %v3216_v11, %v3220_v13 }
 0x294   : > { %v3223_v16 = vsel %vm3219_vm1, %v3217_v12, %v3221_v14 }
 0x295   : > { %v3640_v17 = vpack.c.bf16 %v3223_v16, %v3222_v15 }
 0x297   : > { %3232 = vst [vmem:[%s4759_s26] sm:$0xff] %v3640_v17 }
 0x298 PF: > { %s12_s15 = sadd.s32 1, %s4152_s15   ;;  %s5090_s9 = smov %s4132_s10 }
 0x299   : > { %p9_p0 = scmp.ge.s32.totalorder %s12_s15, 6   ;;  %s5091_s10 = smov %s4221_s22 }
 0x29a   : > { %s5092_s11 = smov %s4144_s13  ;;  %s5093_s12 = smov %s4148_s14 }
 0x29b   : > { %s5094_s13 = smov %s5097_s16  ;;  %s5095_s14 = smov %s5101_s17 }
 0x29c   :  { %11 = sbr.rel (!%p9_p0) target bundleno = 4 (0x4), region = 112 }

// kernel: boundary_ent_discriminator.9
= control target key start
LH: loop header
LB: loop body
LE: loop exit
PB: predicated region body
PF: predicated region fallthrough
CT: control target
= control target key end

     0   :  { %v147_v0 = vlaneseq  ;;  %vm852_vm0 = vcmask 7168   ;;  %s1552_s1 = inlined_call_operand.vmem [shape: bf16[1,8192], index: 1, kind: input, shape index: {}]   ;;  %s1553_s0 = inlined_call_operand.vmem [shape: bf16[8,8192], index: 0, kind: input, shape index: {}]   ;;  %s1554_s2 = inlined_call_operand.vmem [shape: f32[8,1], index: 2, kind: output, shape index: {}]  }
   0x1   :  { %v112_v1 = vld [vmem:[%s1552_s1 + $0x28] sm:$0xff]  ;;  %v113_v2 = vld [vmem:[%s1552_s1 + $0x30] sm:$0xff]  ;;  %v114_v4 = vld [vmem:[%s1552_s1 + $0x38] sm:$0xff] }
   0x2   :  { %v148_v3 = vshrl.u32 %v147_v0, 7  ;;  %v882_v5 = vunpack.c.l.bf16 %v112_v1  ;;  %v884_v6 = vunpack.c.h.bf16 %v112_v1  ;;  %v886_v7 = vunpack.c.l.bf16 %v113_v2  ;;  %v937_v31 = vld [vmem:[%s1553_s0] sm:$0xff]  ;;  %v942_v32 = vld [vmem:[%s1553_s0 + $0x8] sm:$0xff]  ;;  %v955_v37 = vld [vmem:[%s1553_s0 + $0x10] sm:$0xff] }
   0x3   :  { %v896_v12 = vunpack.c.h.bf16 %v113_v2  ;;  %v898_v13 = vunpack.c.l.bf16 %v114_v4  ;;  %v900_v14 = vunpack.c.h.bf16 %v114_v4  ;;  %1572 = vst [vmem:[#allocation6_spill] sm:$0xff] %v955_v37  ;;  %v960_v38 = vld [vmem:[%s1553_s0 + $0x88] sm:$0xff]  ;;  %v111_v39 = vld [vmem:[%s1552_s1 + $0x20] sm:$0xff]  ;;  %v976_v44 = vld [vmem:[%s1553_s0 + $0x90] sm:$0xff] }
   0x4   :  { %v888_v8 = vsub.s32 0, %v148_v3  ;;  %v890_v9 = vsub.s32 2, %v148_v3  ;;  %v892_v10 = vsub.s32 4, %v148_v3  ;;  %v894_v11 = vsub.s32 6, %v148_v3  ;;  %v981_v45 = vld [vmem:[%s1553_s0 + $0x98] sm:$0xff]  ;;  %v107_v53 = vld [vmem:[%s1552_s1] sm:$0xff] }
   0x5   :  { %v993_v54 = vunpack.c.l.bf16 %v111_v39  ;;  %v998_v55 = vld [vmem:[%s1553_s0 + $0xa0] sm:$0xff]  ;;  %v1003_v56 = vld [vmem:[%s1553_s0 + $0xa8] sm:$0xff]  ;;  %v1008_v60 = vunpack.c.h.bf16 %v111_v39  ;;  %v1013_v61 = vld [vmem:[%s1553_s0 + $0xb0] sm:$0xff]  ;;  %v1027_v3 = vunpack.c.l.bf16 %v107_v53  ;;  %v1043_v47 = vunpack.c.h.bf16 %v107_v53 }
   0x6   :  { %1568 = vst [vmem:[#allocation2_spill] sm:$0xff] %v888_v8  ;;  %1569 = vst [vmem:[#allocation3_spill] sm:$0xff] %v890_v9  ;;  %v310_v15 = vrot.slane %v882_v5, %v888_v8  ;;  %v314_v16 = vrot.slane %v882_v5, %v890_v9  ;;  %v318_v17 = vrot.slane %v882_v5, %v892_v10  ;;  %v1018_v62 = vld [vmem:[%s1553_s0 + $0xb8] sm:$0xff]  ;;  %v41_v49 = vld [vmem:[%s1553_s0 + $0xf0] sm:$0xff] }
   0x7   :  { %1570 = vst [vmem:[#allocation4_spill] sm:$0xff] %v892_v10  ;;  %1571 = vst [vmem:[#allocation5_spill] sm:$0xff] %v894_v11  ;;  %v322_v18 = vrot.slane %v882_v5, %v894_v11  ;;  %v326_v19 = vrot.slane %v884_v6, %v888_v8  ;;  %v330_v20 = vrot.slane %v884_v6, %v890_v9 }
   0x8   :  { %v334_v21 = vrot.slane %v884_v6, %v892_v10  ;;  %v338_v22 = vrot.slane %v884_v6, %v894_v11  ;;  %v342_v23 = vrot.slane %v886_v7, %v888_v8  ;;  %v346_v24 = vrot.slane %v886_v7, %v890_v9  ;;  %1573 = vst [vmem:[#allocation7_spill] sm:$0xff] %v993_v54 }
   0x9   :  { %v350_v25 = vrot.slane %v886_v7, %v892_v10  ;;  %v354_v26 = vrot.slane %v886_v7, %v894_v11  ;;  %v358_v27 = vrot.slane %v896_v12, %v888_v8  ;;  %v362_v28 = vrot.slane %v896_v12, %v890_v9 }
   0xa   :  { %v366_v29 = vrot.slane %v896_v12, %v892_v10  ;;  %v370_v30 = vrot.slane %v896_v12, %v894_v11  ;;  %v374_v33 = vrot.slane %v898_v13, %v888_v8  ;;  %v378_v34 = vrot.slane %v898_v13, %v890_v9 }
   0xb   :  { %v382_v35 = vrot.slane %v898_v13, %v892_v10  ;;  %v386_v36 = vrot.slane %v898_v13, %v894_v11  ;;  %v390_v40 = vrot.slane %v900_v14, %v888_v8  ;;  %v394_v41 = vrot.slane %v900_v14, %v890_v9 }
   0xc   :  { %v398_v42 = vrot.slane %v900_v14, %v892_v10  ;;  %v402_v43 = vrot.slane %v900_v14, %v894_v11  ;;  %v282_v0 = vrot.slane %v993_v54, %v890_v9  ;;  %v286_v1 = vrot.slane %v993_v54, %v892_v10  ;;  %v40_v14 = vld [vmem:[%s1553_s0 + $0xe8] sm:$0xff] }
   0xd   :  { %v290_v2 = vrot.slane %v993_v54, %v894_v11  ;;  %v298_v4 = vrot.slane %v1008_v60, %v890_v9  ;;  %v302_v39 = vrot.slane %v1008_v60, %v892_v10  ;;  %v306_v51 = vrot.slane %v1008_v60, %v894_v11 }
   0xe   :  { %v1046_v46 = vrot.slane %v282_v0, %v888_v8  ;;  %v1049_v50 = vrot.slane %v286_v1, %v888_v8  ;;  %v150_v58 = vrot.slane %v1027_v3, %v888_v8  ;;  %v1069_v0 = vrot.slane %v310_v15, %v888_v8 }
   0xf   :  { %v1052_v63 = vrot.slane %v290_v2, %v888_v8  ;;  %v1057_v57 = vrot.slane %v298_v4, %v888_v8  ;;  %v1060_v52 = vrot.slane %v302_v39, %v888_v8  ;;  %v1063_v53 = vrot.slane %v306_v51, %v888_v8 }
  0x10   :  { %1574 = vst [vmem:[#allocation8_spill] sm:$0xff] %v1046_v46  ;;  %v1075_v1 = vrot.slane %v314_v16, %v888_v8  ;;  %v1081_v2 = vrot.slane %v318_v17, %v888_v8  ;;  %v1087_v51 = vrot.slane %v322_v18, %v888_v8  ;;  %v1093_v15 = vrot.slane %v326_v19, %v888_v8 }
  0x11   :  { %v1099_v16 = vrot.slane %v330_v20, %v888_v8  ;;  %v1105_v17 = vrot.slane %v334_v21, %v888_v8  ;;  %v1111_v5 = vrot.slane %v338_v22, %v888_v8  ;;  %v1117_v18 = vrot.slane %v342_v23, %v888_v8  ;;  %v1140_v21 = vld [vmem:[%s1553_s0 + $0xc0] sm:$0xff] }
  0x12   :  { %v1123_v19 = vrot.slane %v346_v24, %v888_v8  ;;  %v1129_v20 = vrot.slane %v350_v25, %v888_v8  ;;  %v1135_v6 = vrot.slane %v354_v26, %v888_v8  ;;  %v1146_v22 = vrot.slane %v358_v27, %v888_v8  ;;  %v1169_v25 = vld [vmem:[%s1553_s0 + $0xc8] sm:$0xff] }
  0x13   :  { %v1152_v23 = vrot.slane %v362_v28, %v888_v8  ;;  %v1158_v7 = vrot.slane %v366_v29, %v888_v8  ;;  %v1164_v24 = vrot.slane %v370_v30, %v888_v8  ;;  %v1175_v26 = vrot.slane %v374_v33, %v888_v8  ;;  %v1198_v29 = vld [vmem:[%s1553_s0 + $0xd0] sm:$0xff]  ;;  %v1203_v30 = vld [vmem:[%s1553_s0 + $0xd8] sm:$0xff] }
  0x14   :  { %1575 = vst [vmem:[#allocation9_spill] sm:$0xff] %v1146_v22  ;;  %v1181_v27 = vrot.slane %v378_v34, %v888_v8  ;;  %v1187_v12 = vrot.slane %v382_v35, %v888_v8  ;;  %v1193_v28 = vrot.slane %v386_v36, %v888_v8  ;;  %v1209_v33 = vrot.slane %v390_v40, %v888_v8  ;;  %v1232_v36 = vld [vmem:[%s1553_s0 + $0xe0] sm:$0xff] }
  0x15   :  { %1576 = vst [vmem:[#allocation10_spill] sm:$0xff] %v1152_v23  ;;  %1577 = vst [vmem:[#allocation11_spill] sm:$0xff] %v1158_v7  ;;  %v1215_v13 = vrot.slane %v394_v41, %v888_v8  ;;  %v1221_v34 = vrot.slane %v398_v42, %v888_v8  ;;  %v1227_v35 = vrot.slane %v402_v43, %v888_v8  ;;  %v90_v40 = vunpack.c.h.bf16 %v1018_v62 }
  0x16   :  { %1578 = vst [vmem:[#allocation12_spill] sm:$0xff] %v1164_v24  ;;  %1579 = vst [vmem:[#allocation13_spill] sm:$0xff] %v1175_v26  ;;  %v91_v41 = vunpack.c.l.bf16 %v1140_v21  ;;  %v154_v4 = vrot.slane %v1027_v3, %v890_v9  ;;  %v158_v42 = vrot.slane %v1027_v3, %v892_v10  ;;  %v92_v43 = vunpack.c.h.bf16 %v1140_v21  ;;  %v42_v21 = vld [vmem:[%s1553_s0 + $0xf8] sm:$0xff] }
  0x17   :  { %1580 = vst [vmem:[#allocation14_spill] sm:$0xff] %v1181_v27  ;;  %1581 = vst [vmem:[#allocation15_spill] sm:$0xff] %v1187_v12  ;;  %v93_v39 = vunpack.c.l.bf16 %v1169_v25  ;;  %v94_v48 = vunpack.c.h.bf16 %v1169_v25  ;;  %v294_v59 = vrot.slane %v1008_v60, %v888_v8  ;;  %v95_v46 = vunpack.c.l.bf16 %v1198_v29  ;;  %v1262_v60 = vld [vmem:[%s1552_s1 + $0x8] sm:$0xff] }
  0x18   :  { %1582 = vst [vmem:[#allocation16_spill] sm:$0xff] %v1193_v28  ;;  %1583 = vst [vmem:[#allocation17_spill] sm:$0xff] %v1209_v33  ;;  %v96_v54 = vunpack.c.h.bf16 %v1198_v29  ;;  %v97_v37 = vunpack.c.l.bf16 %v1203_v30  ;;  %v99_v25 = vunpack.c.l.bf16 %v1232_v36  ;;  %v166_v29 = vrot.slane %v1043_v47, %v888_v8 }
  0x19   :  { %1584 = vst [vmem:[#allocation18_spill] sm:$0xff] %v1215_v13  ;;  %1585 = vst [vmem:[#allocation19_spill] sm:$0xff] %v1221_v34  ;;  %v162_v34 = vrot.slane %v1027_v3, %v894_v11  ;;  %v470_v13 = vrot.slane %v150_v58, %v888_v8  ;;  %v101_v33 = vunpack.c.l.bf16 %v40_v14  ;;  %v474_v28 = vrot.slane %v154_v4, %v888_v8 }
  0x1a   :  { %1586 = vst [vmem:[#allocation20_spill] sm:$0xff] %v1227_v35  ;;  %v98_v35 = vunpack.c.h.bf16 %v1203_v30  ;;  %1587 = vst [vmem:[#allocation21_spill] sm:$0xff] %v1262_v60  ;;  %v100_v30 = vunpack.c.h.bf16 %v1232_v36  ;;  %v478_v12 = vrot.slane %v158_v42, %v888_v8  ;;  %v102_v27 = vunpack.c.h.bf16 %v40_v14 }
  0x1b   :  { %v103_v26 = vunpack.c.l.bf16 %v41_v49  ;;  %v104_v24 = vunpack.c.h.bf16 %v41_v49  ;;  %v614_v7 = vrot.slane %v294_v59, %v888_v8  ;;  %v105_v23 = vunpack.c.l.bf16 %v42_v21 }
  0x1c   :  { %v106_v22 = vunpack.c.h.bf16 %v42_v21  ;;  %v1274_v3 = vunpack.c.l.bf16 %v1262_v60  ;;  %v170_v58 = vrot.slane %v1043_v47, %v890_v9  ;;  %v174_v36 = vrot.slane %v1043_v47, %v892_v10 }
  0x1d   :  { %v482_v4 = vrot.slane %v162_v34, %v888_v8  ;;  %v486_v42 = vrot.slane %v166_v29, %v888_v8  ;;  %v1589_v14 = vunpack.c.l.bf16 %v937_v31  ;;  %v1590_v59 = vunpack.c.h.bf16 %v937_v31 }
  0x1e   :  { %1588 = vst [vmem:[#allocation22_spill] sm:$0xff] %v1274_v3  ;;  %v1591_v21 = vunpack.c.l.bf16 %v942_v32  ;;  %v1592_v3 = vunpack.c.l.bf16 %v960_v38  ;;  %v1593_v10 = vunpack.c.h.bf16 %v960_v38  ;;  %v1594_v29 = vunpack.c.l.bf16 %v976_v44 }
  0x1f   :  { %v723_v49 = vmul.f32 %v470_v13, %v1589_v14  ;;  %v724_v11 = vmul.f32 %v474_v28, %v1590_v59  ;;  %v1595_v31 = vunpack.c.h.bf16 %v976_v44  ;;  %v1599_v44 = vunpack.c.h.bf16 %v998_v55 }
  0x20   :  { %v725_v60 = vmul.f32 %v478_v12, %v1591_v21  ;;  %v1291_v9 = vmul.f32 %v1049_v50, %v1592_v3  ;;  %v1296_v34 = vmul.f32 %v1052_v63, %v1593_v10  ;;  %v1300_v8 = vmul.f32 %v614_v7, %v1594_v29 }
  0x21   :  { %v1305_v28 = vmul.f32 %v1057_v57, %v1595_v31  ;;  %v1596_v12 = vunpack.c.l.bf16 %v981_v45  ;;  %v1597_v50 = vunpack.c.h.bf16 %v981_v45  ;;  %v1598_v10 = vunpack.c.l.bf16 %v998_v55 }
  0x22   :  { %v1325_v57 = vmul.f32 %v1075_v1, %v1599_v44  ;;  %v1600_v7 = vunpack.c.l.bf16 %v1003_v56  ;;  %v1601_v45 = vunpack.c.h.bf16 %v1003_v56  ;;  %v1602_v3 = vunpack.c.l.bf16 %v1013_v61 }
  0x23   :  { %v1310_v13 = vmul.f32 %v1060_v52, %v1596_v12  ;;  %v1315_v38 = vmul.f32 %v1063_v53, %v1597_v50  ;;  %v1320_v63 = vmul.f32 %v1069_v0, %v1598_v10  ;;  %v1603_v55 = vunpack.c.h.bf16 %v1013_v61  ;;  %v1615_v50 = vld [vmem:[#allocation19_spill] sm:$0xff] }
  0x24   :  { %v1330_v52 = vmul.f32 %v1081_v2, %v1600_v7  ;;  %v1335_v53 = vmul.f32 %v1087_v51, %v1601_v45  ;;  %v1340_v0 = vmul.f32 %v1093_v15, %v1602_v3  ;;  %v1604_v14 = vunpack.c.l.bf16 %v1018_v62 }
  0x25   :  { %v1345_v1 = vmul.f32 %v1099_v16, %v1603_v55  ;;  %v1353_v56 = vmul.f32 %v1111_v5, %v90_v40  ;;  %v1356_v51 = vmul.f32 %v1117_v18, %v91_v41  ;;  %v1359_v59 = vmul.f32 %v1123_v19, %v92_v43  ;;  %v1605_v16 = vld [vmem:[#allocation9_spill] sm:$0xff]  ;;  %v1607_v5 = vld [vmem:[#allocation11_spill] sm:$0xff]  ;;  %v1608_v18 = vld [vmem:[#allocation12_spill] sm:$0xff] }
  0x26   :  { %v1350_v2 = vmul.f32 %v1105_v17, %v1604_v14  ;;  %v1362_v15 = vmul.f32 %v1129_v20, %v93_v39  ;;  %v1365_v61 = vmul.f32 %v1135_v6, %v94_v48  ;;  %v1368_v62 = vmul.f32 %v1605_v16, %v95_v46  ;;  %v1606_v17 = vld [vmem:[#allocation10_spill] sm:$0xff]  ;;  %v14_v19 = vld [vmem:[%s1553_s0 + $0x18] sm:$0xff]  ;;  %v1611_v46 = vld [vmem:[#allocation15_spill] sm:$0xff] }
  0x27   :  { %v1371_v21 = vmul.f32 %v1606_v17, %v96_v54  ;;  %v1374_v40 = vmul.f32 %v1607_v5, %v97_v37  ;;  %v1377_v41 = vmul.f32 %v1608_v18, %v98_v35  ;;  %v1609_v20 = vld [vmem:[#allocation13_spill] sm:$0xff]  ;;  %v1610_v48 = vld [vmem:[#allocation14_spill] sm:$0xff]  ;;  %v1389_v39 = vmul.f32 %v1611_v46, %v101_v33  ;;  %v1612_v54 = vld [vmem:[#allocation16_spill] sm:$0xff] }
  0x28   :  { %v1383_v43 = vmul.f32 %v1609_v20, %v99_v25  ;;  %v1386_v6 = vmul.f32 %v1610_v48, %v100_v30  ;;  %v1392_v29 = vmul.f32 %v1612_v54, %v102_v27  ;;  %v1613_v37 = vld [vmem:[#allocation17_spill] sm:$0xff]  ;;  %v1614_v35 = vld [vmem:[#allocation18_spill] sm:$0xff]  ;;  %v1401_v10 = vmul.f32 %v1615_v50, %v105_v23  ;;  %v1616_v25 = vld [vmem:[#allocation20_spill] sm:$0xff] }
  0x29   :  { %v1395_v31 = vmul.f32 %v1613_v37, %v103_v26  ;;  %v1398_v12 = vmul.f32 %v1614_v35, %v104_v24  ;;  %v1404_v44 = vmul.f32 %v1616_v25, %v106_v22  ;;  %v1617_v30 = vld [vmem:[#allocation5_spill] sm:$0xff]  ;;  %v1618_v33 = vld [vmem:[#allocation2_spill] sm:$0xff]  ;;  %v1619_v27 = vunpack.c.h.bf16 %v942_v32  ;;  %v1626_v37 = vld [vmem:[#allocation4_spill] sm:$0xff] }
  0x2a   :  { %v178_v7 = vrot.slane %v1043_v47, %v1617_v30  ;;  %v490_v45 = vrot.slane %v170_v58, %v1618_v33  ;;  %v787_v55 = vadd.f32 %v724_v11, %v723_v49  ;;  %v49_v26 = vunpack.c.l.bf16 %v14_v19  ;;  %v15_v24 = vld [vmem:[%s1553_s0 + $0x20] sm:$0xff]  ;;  %v1623_v58 = vld [vmem:[#allocation3_spill] sm:$0xff]  ;;  %v1625_v46 = vld [vmem:[#allocation21_spill] sm:$0xff] }
  0x2b   :  { %v726_v3 = vmul.f32 %v482_v4, %v1619_v27  ;;  %v1620_v23 = vld [vmem:[#allocation22_spill] sm:$0xff]  ;;  %v494_v22 = vrot.slane %v174_v36, %v1618_v33  ;;  %v50_v18 = vunpack.c.h.bf16 %v14_v19  ;;  %v51_v48 = vunpack.c.l.bf16 %v15_v24  ;;  %v16_v36 = vld [vmem:[%s1553_s0 + $0x28] sm:$0xff] }
  0x2c   :  { %v182_v14 = vrot.slane %v1620_v23, %v1618_v33  ;;  %v1621_v16 = vld [vmem:[#allocation6_spill] sm:$0xff]  ;;  %v788_v47 = vadd.f32 %v787_v55, %v725_v60  ;;  %v186_v32 = vrot.slane %v1620_v23, %v1623_v58  ;;  %v498_v11 = vrot.slane %v178_v7, %v1618_v33  ;;  %v17_v55 = vld [vmem:[%s1553_s0 + $0x30] sm:$0xff] }
  0x2d   :  { %v1622_v17 = vunpack.c.l.bf16 %v1621_v16  ;;  %v1624_v4 = vunpack.c.h.bf16 %v1621_v16  ;;  %v118_v54 = vunpack.c.h.bf16 %v1625_v46  ;;  %v190_v60 = vrot.slane %v1620_v23, %v1626_v37  ;;  %v109_v16 = vld [vmem:[%s1552_s1 + $0x10] sm:$0xff] }
  0x2e   :  { %v789_v20 = vadd.f32 %v788_v47, %v726_v3  ;;  %v729_v19 = vmul.f32 %v494_v22, %v49_v26  ;;  %v52_v50 = vunpack.c.h.bf16 %v15_v24  ;;  %v194_v25 = vrot.slane %v1620_v23, %v1617_v30 }
  0x2f   :  { %v727_v5 = vmul.f32 %v486_v42, %v1622_v17  ;;  %v728_v49 = vmul.f32 %v490_v45, %v1624_v4  ;;  %v502_v42 = vrot.slane %v182_v14, %v1618_v33  ;;  %v506_v7 = vrot.slane %v186_v32, %v1618_v33  ;;  %v18_v4 = vld [vmem:[%s1553_s0 + $0x38] sm:$0xff] }
  0x30   :  { %v730_v45 = vmul.f32 %v498_v11, %v50_v18  ;;  %v53_v3 = vunpack.c.l.bf16 %v16_v36  ;;  %v198_v26 = vrot.slane %v118_v54, %v1618_v33  ;;  %v510_v24 = vrot.slane %v190_v60, %v1618_v33 }
  0x31   :  { %v790_v35 = vadd.f32 %v789_v20, %v727_v5  ;;  %v731_v14 = vmul.f32 %v502_v42, %v51_v48  ;;  %v54_v23 = vunpack.c.h.bf16 %v16_v36  ;;  %v202_v17 = vrot.slane %v118_v54, %v1623_v58 }
  0x32   :  { %v514_v5 = vrot.slane %v194_v25, %v1618_v33  ;;  %v732_v47 = vmul.f32 %v506_v7, %v52_v50  ;;  %v55_v32 = vunpack.c.l.bf16 %v17_v55  ;;  %v119_v11 = vunpack.c.l.bf16 %v109_v16  ;;  %v19_v25 = vld [vmem:[%s1553_s0 + $0x40] sm:$0xff] }
  0x33   :  { %v791_v27 = vadd.f32 %v790_v35, %v728_v49  ;;  %v206_v49 = vrot.slane %v118_v54, %v1626_v37  ;;  %v518_v20 = vrot.slane %v198_v26, %v1618_v33  ;;  %v733_v46 = vmul.f32 %v510_v24, %v53_v3 }
  0x34   :  { %v56_v60 = vunpack.c.h.bf16 %v17_v55  ;;  %v210_v36 = vrot.slane %v118_v54, %v1617_v30  ;;  %v522_v42 = vrot.slane %v202_v17, %v1618_v33  ;;  %v57_v50 = vunpack.c.l.bf16 %v18_v4  ;;  %v20_v17 = vld [vmem:[%s1553_s0 + $0x48] sm:$0xff] }
  0x35   :  { %v792_v22 = vadd.f32 %v791_v27, %v729_v19  ;;  %v734_v19 = vmul.f32 %v514_v5, %v54_v23  ;;  %v214_v7 = vrot.slane %v119_v11, %v1618_v33  ;;  %v735_v27 = vmul.f32 %v518_v20, %v55_v32 }
  0x36   :  { %v58_v3 = vunpack.c.h.bf16 %v18_v4  ;;  %v218_v55 = vrot.slane %v119_v11, %v1623_v58  ;;  %v530_v54 = vrot.slane %v210_v36, %v1618_v33  ;;  %v736_v24 = vmul.f32 %v522_v42, %v56_v60  ;;  %v110_v36 = vld [vmem:[%s1552_s1 + $0x18] sm:$0xff] }
  0x37   :  { %v793_v18 = vadd.f32 %v792_v22, %v730_v45  ;;  %v526_v45 = vrot.slane %v206_v49, %v1618_v33  ;;  %v59_v22 = vunpack.c.l.bf16 %v19_v25  ;;  %v120_v23 = vunpack.c.h.bf16 %v109_v16  ;;  %v21_v16 = vld [vmem:[%s1553_s0 + $0x50] sm:$0xff] }
  0x38   :  { %v222_v5 = vrot.slane %v119_v11, %v1626_v37  ;;  %v60_v49 = vunpack.c.h.bf16 %v19_v25  ;;  %v226_v4 = vrot.slane %v119_v11, %v1617_v30  ;;  %v538_v20 = vrot.slane %v218_v55, %v1618_v33  ;;  %v22_v55 = vld [vmem:[%s1553_s0 + $0x58] sm:$0xff] }
  0x39   :  { %v794_v48 = vadd.f32 %v793_v18, %v731_v14  ;;  %v737_v18 = vmul.f32 %v526_v45, %v57_v50  ;;  %v61_v60 = vunpack.c.l.bf16 %v20_v17  ;;  %v230_v42 = vrot.slane %v120_v23, %v1618_v33 }
  0x3a   :  { %v62_v11 = vunpack.c.h.bf16 %v20_v17  ;;  %v234_v25 = vrot.slane %v120_v23, %v1623_v58  ;;  %v740_v45 = vmul.f32 %v538_v20, %v60_v49  ;;  %v242_v17 = vrot.slane %v120_v23, %v1617_v30 }
  0x3b   :  { %v795_v35 = vadd.f32 %v794_v48, %v732_v47  ;;  %v534_v47 = vrot.slane %v214_v7, %v1618_v33  ;;  %v546_v7 = vrot.slane %v226_v4, %v1618_v33  ;;  %v65_v49 = vunpack.c.l.bf16 %v22_v55  ;;  %v23_v4 = vld [vmem:[%s1553_s0 + $0x60] sm:$0xff] }
  0x3d   :  { %v796_v26 = vadd.f32 %v795_v35, %v733_v46  ;;  %v738_v46 = vmul.f32 %v530_v54, %v58_v3  ;;  %v739_v35 = vmul.f32 %v534_v47, %v59_v22  ;;  %v121_v3 = vunpack.c.l.bf16 %v110_v36 }
  0x3e   :  { %v238_v54 = vrot.slane %v120_v23, %v1626_v37  ;;  %v554_v47 = vrot.slane %v234_v25, %v1618_v33  ;;  %v562_v23 = vrot.slane %v242_v17, %v1618_v33  ;;  %v24_v25 = vld [vmem:[%s1553_s0 + $0x68] sm:$0xff] }
  0x3f   :  { %v797_v14 = vadd.f32 %v796_v26, %v734_v19  ;;  %v542_v19 = vrot.slane %v222_v5, %v1618_v33  ;;  %v63_v26 = vunpack.c.l.bf16 %v21_v16  ;;  %v64_v5 = vunpack.c.h.bf16 %v21_v16 }
  0x40   :  { %v246_v20 = vrot.slane %v121_v3, %v1618_v33  ;;  %v250_v16 = vrot.slane %v121_v3, %v1623_v58 }
  0x41   :  { %v798_v32 = vadd.f32 %v797_v14, %v735_v27  ;;  %v741_v14 = vmul.f32 %v542_v19, %v61_v60  ;;  %v66_v60 = vunpack.c.h.bf16 %v22_v55  ;;  %v744_v19 = vmul.f32 %v554_v47, %v64_v5 }
  0x42   :  { %v258_v55 = vrot.slane %v121_v3, %v1617_v30  ;;  %v69_v5 = vunpack.c.l.bf16 %v24_v25 }
  0x43   :  { %v799_v48 = vadd.f32 %v798_v32, %v736_v24  ;;  %v550_v24 = vrot.slane %v230_v42, %v1618_v33 }
  0x45   :  { %v800_v50 = vadd.f32 %v799_v48, %v737_v18  ;;  %v742_v18 = vmul.f32 %v546_v7, %v62_v11  ;;  %v743_v48 = vmul.f32 %v550_v24, %v63_v26  ;;  %v122_v11 = vunpack.c.h.bf16 %v110_v36  ;;  %v25_v36 = vld [vmem:[%s1553_s0 + $0x70] sm:$0xff] }
  0x46   :  { %v254_v7 = vrot.slane %v121_v3, %v1626_v37  ;;  %v570_v24 = vrot.slane %v250_v16, %v1618_v33  ;;  %v578_v3 = vrot.slane %v258_v55, %v1618_v33 }
  0x47   :  { %v801_v27 = vadd.f32 %v800_v50, %v738_v46  ;;  %v558_v46 = vrot.slane %v238_v54, %v1618_v33  ;;  %v67_v50 = vunpack.c.l.bf16 %v23_v4  ;;  %v68_v54 = vunpack.c.h.bf16 %v23_v4 }
  0x48   :  { %v262_v17 = vrot.slane %v122_v11, %v1618_v33  ;;  %v574_v47 = vrot.slane %v254_v7, %v1618_v33  ;;  %v266_v4 = vrot.slane %v122_v11, %v1623_v58 }
  0x49   :  { %v802_v22 = vadd.f32 %v801_v27, %v739_v35  ;;  %v745_v27 = vmul.f32 %v558_v46, %v65_v49  ;;  %v70_v49 = vunpack.c.h.bf16 %v24_v25 }
  0x4a   :  { %v582_v16 = vrot.slane %v262_v17, %v1618_v33  ;;  %v586_v58 = vrot.slane %v266_v4, %v1618_v33 }
  0x4b   :  { %v803_v32 = vadd.f32 %v802_v22, %v740_v45  ;;  %v566_v45 = vrot.slane %v246_v20, %v1618_v33  ;;  %v748_v20 = vmul.f32 %v570_v24, %v68_v54  ;;  %v750_v25 = vmul.f32 %v578_v3, %v70_v49 }
  0x4d   :  { %v804_v42 = vadd.f32 %v803_v32, %v741_v14  ;;  %v746_v14 = vmul.f32 %v562_v23, %v66_v60  ;;  %v270_v60 = vrot.slane %v122_v11, %v1626_v37  ;;  %v749_v23 = vmul.f32 %v574_v47, %v69_v5  ;;  %v27_v37 = vld [vmem:[%s1553_s0 + $0x80] sm:$0xff] }
  0x4e   :  { %v75_v5 = vunpack.c.l.bf16 %v27_v37 }
  0x4f   :  { %v805_v35 = vadd.f32 %v804_v42, %v742_v18  ;;  %v747_v18 = vmul.f32 %v566_v45, %v67_v50  ;;  %v26_v42 = vld [vmem:[%s1553_s0 + $0x78] sm:$0xff]  ;;  %v274_v50 = vrot.slane %v122_v11, %v1617_v30  ;;  %v590_v54 = vrot.slane %v270_v60, %v1618_v33 }
  0x50   :  { %v73_v45 = vunpack.c.l.bf16 %v26_v42 }
  0x51   :  { %v806_v26 = vadd.f32 %v805_v35, %v743_v48  ;;  %v71_v48 = vunpack.c.l.bf16 %v25_v36  ;;  %v72_v35 = vunpack.c.h.bf16 %v25_v36 }
  0x52   :  { %v753_v17 = vmul.f32 %v590_v54, %v73_v45 }
  0x53   :  { %v807_v22 = vadd.f32 %v806_v26, %v744_v19  ;;  %v751_v55 = vmul.f32 %v582_v16, %v71_v48  ;;  %v752_v30 = vmul.f32 %v586_v58, %v72_v35 }
  0x55   :  { %v808_v32 = vadd.f32 %v807_v22, %v745_v27  ;;  %v1627_v27 = vld [vmem:[#allocation7_spill] sm:$0xff]  ;;  %v594_v22 = vrot.slane %v274_v50, %v1618_v33 }
  0x56   :  { %v278_v26 = vrot.slane %v1627_v27, %v1618_v33 }
  0x57   :  { %v809_v46 = vadd.f32 %v808_v32, %v746_v14  ;;  %v74_v14 = vunpack.c.h.bf16 %v26_v42 }
  0x58   :  { %v598_v36 = vrot.slane %v278_v26, %v1618_v33 }
  0x59   :  { %v810_v19 = vadd.f32 %v809_v46, %v747_v18  ;;  %v76_v18 = vunpack.c.h.bf16 %v27_v37  ;;  %v754_v32 = vmul.f32 %v594_v22, %v74_v14 }
  0x5a   :  { %v755_v4 = vmul.f32 %v598_v36, %v75_v5 }
  0x5b   :  { %v811_v7 = vadd.f32 %v810_v19, %v748_v20  ;;  %v1628_v20 = vld [vmem:[#allocation8_spill] sm:$0xff] }
  0x5c   :  { %v756_v46 = vmul.f32 %v1628_v20, %v76_v18 }
  0x5d   :  { %v812_v24 = vadd.f32 %v811_v7, %v749_v23 }
  0x5f   :  { %v813_v11 = vadd.f32 %v812_v24, %v750_v25 }
  0x61   :  { %v814_v47 = vadd.f32 %v813_v11, %v751_v55 }
  0x63   :  { %v815_v49 = vadd.f32 %v814_v47, %v752_v30 }
  0x65   :  { %v816_v3 = vadd.f32 %v815_v49, %v753_v17 }
  0x67   :  { %v817_v48 = vadd.f32 %v816_v3, %v754_v32 }
  0x69   :  { %v818_v60 = vadd.f32 %v817_v48, %v755_v4 }
  0x6b   :  { %v819_v16 = vadd.f32 %v818_v60, %v756_v46 }
  0x6d   :  { %v820_v42 = vadd.f32 %v819_v16, %v1291_v9 }
  0x6f   :  { %v821_v23 = vadd.f32 %v820_v42, %v1296_v34 }
  0x71   :  { %v822_v19 = vadd.f32 %v821_v23, %v1300_v8 }
  0x73   :  { %v823_v33 = vadd.f32 %v822_v19, %v1305_v28 }
  0x75   :  { %v824_v35 = vadd.f32 %v823_v33, %v1310_v13 }
  0x77   :  { %v825_v50 = vadd.f32 %v824_v35, %v1315_v38 }
  0x79   :  { %v826_v58 = vadd.f32 %v825_v50, %v1320_v63 }
  0x7b   :  { %v827_v25 = vadd.f32 %v826_v58, %v1325_v57 }
  0x7d   :  { %v828_v7 = vadd.f32 %v827_v25, %v1330_v52 }
  0x7f   :  { %v829_v45 = vadd.f32 %v828_v7, %v1335_v53 }
  0x81   :  { %v830_v9 = vadd.f32 %v829_v45, %v1340_v0 }
  0x83   :  { %v831_v34 = vadd.f32 %v830_v9, %v1345_v1 }
  0x85   :  { %v832_v8 = vadd.f32 %v831_v34, %v1350_v2 }
  0x87   :  { %v833_v28 = vadd.f32 %v832_v8, %v1353_v56 }
  0x89   :  { %v834_v13 = vadd.f32 %v833_v28, %v1356_v51 }
  0x8b   :  { %v835_v38 = vadd.f32 %v834_v13, %v1359_v59 }
  0x8d   :  { %v836_v63 = vadd.f32 %v835_v38, %v1362_v15 }
  0x8f   :  { %v837_v57 = vadd.f32 %v836_v63, %v1365_v61 }
  0x91   :  { %v838_v52 = vadd.f32 %v837_v57, %v1368_v62 }
  0x93   :  { %v839_v53 = vadd.f32 %v838_v52, %v1371_v21 }
  0x95   :  { %v840_v0 = vadd.f32 %v839_v53, %v1374_v40 }
  0x97   :  { %v841_v1 = vadd.f32 %v840_v0, %v1377_v41 }
  0x99   :  { %v842_v2 = vadd.f32 %v841_v1, %v1383_v43 }
  0x9b   :  { %v843_v56 = vadd.f32 %v842_v2, %v1386_v6 }
  0x9d   :  { %v844_v51 = vadd.f32 %v843_v56, %v1389_v39 }
  0x9f   :  { %v845_v59 = vadd.f32 %v844_v51, %v1392_v29 }
  0xa1   :  { %v846_v15 = vadd.f32 %v845_v59, %v1395_v31 }
  0xa3   :  { %v847_v61 = vadd.f32 %v846_v15, %v1398_v12 }
  0xa5   :  { %v848_v62 = vadd.f32 %v847_v61, %v1401_v10 }
  0xa7   :  { %v849_v21 = vadd.f32 %v848_v62, %v1404_v44 }
  0xa9   :  { %850 = vadd.xlane.f32.xlu0 %v849_v21 }
 0x136   :  { %v851_v40 = vpop.xlane.xlu0 %850 }
 0x137   :  { %853 = vst.msk [vmem:[%s1554_s2] sm:$0xff] %vm852_vm0, %v851_v40 }

</bundles_post_ra>
